<compile_context>
chip_gen: v6e
topology: v6e:2x2x1
jax: 0.10.0
libtpu: 0.0.40
codegen_flags: <defaults>
</compile_context>

<pallas_src>
import jax
import jax.numpy as jnp
import numpy as np
from jax.experimental import pallas as pl
from jax.experimental.pallas import tpu as pltpu

TAPS = 27  # 3x3x3 Conv3d kernel taps


# ----------------------------------------------------------------------------
# Single fused kernel: conv1 -> (conv2 + global avg pool) -> pose MLP ->
# cls_token -> classifier.  Whole (small) batch handled in one invocation.
# ----------------------------------------------------------------------------
def _fused_encoder_kernel(patches_ref, w1_ref, b1_ref,
                          wtile_ref, pexp_ref, bsel_ref, w2_ref, b2_ref,
                          pose_ref, wp1_ref, bp1_ref, wp2_ref, bp2_ref,
                          wcr_ref, wcp_ref, bcls_ref, wc_ref, bc_ref,
                          emb_ref, out_ref):
    f32 = jnp.float32
    bf16 = jnp.bfloat16

    # ---- Conv3d #1 (k=3, pad=1) as a single im2col matmul + bias + ReLU ----
    h1 = jnp.dot(patches_ref[...], w1_ref[...], preferred_element_type=f32)
    h1 = jnp.maximum(h1 + b1_ref[...], 0.0)                  # (B*THW, C1) f32

    # ---- Conv3d #2 + AdaptiveAvgPool3d((1,1,1)), fused ---------------------
    # wtile = [I I ... I] replicates h1's channels 27x on the MXU (avoids an
    # in-kernel lane concat / relayout).  pexp carries the zero-padding window
    # masks and the 1/THW pooling factor; bsel sums rows of the same batch.
    h1cat = jnp.dot(h1.astype(bf16), wtile_ref[...],
                    preferred_element_type=f32)               # (B*THW, 27*C1)
    h1m = (h1cat * pexp_ref[...]).astype(bf16)
    s = jnp.dot(bsel_ref[...], h1m, preferred_element_type=f32)   # (B, 27*C1)
    rgb_feat = jnp.dot(s.astype(bf16), w2_ref[...],
                       preferred_element_type=f32) + b2_ref[...]  # (B, C2)

    # ---- pose MLP (time-mean was taken in the wrapper) ---------------------
    ph = jnp.dot(pose_ref[...], wp1_ref[...], preferred_element_type=f32)
    ph = jnp.maximum(ph + bp1_ref[...], 0.0)
    pose_feat = jnp.dot(ph.astype(bf16), wp2_ref[...],
                        preferred_element_type=f32) + bp2_ref[...]  # (B, 128)

    # ---- cls_token on concat([rgb_feat, pose_feat]) == split-weight matmuls
    cls_emb = (jnp.dot(rgb_feat.astype(bf16), wcr_ref[...],
                       preferred_element_type=f32)
               + jnp.dot(pose_feat.astype(bf16), wcp_ref[...],
                         preferred_element_type=f32)
               + bcls_ref[...])                               # (B, Hp)
    emb_ref[...] = cls_emb

    # ---- classifier ---------------------------------------------------------
    out_ref[...] = jnp.dot(cls_emb.astype(bf16), wc_ref[...],
                           preferred_element_type=f32) + bc_ref[...]


# ----------------------------------------------------------------------------
# Wrapper-side layout plumbing (host / XLA; no heavy compute here)
# ----------------------------------------------------------------------------
def _round_up(x, m):
    return ((x + m - 1) // m) * m


def _im2col_3x3x3(x_cl):
    """(B,T,H,W,C) channels-last -> (B*T*H*W, 27*C); taps (kt,kh,kw) major."""
    B, T, H, W, C = x_cl.shape
    xp = jnp.pad(x_cl, ((0, 0), (1, 1), (1, 1), (1, 1), (0, 0)))
    cols = [xp[:, kt:kt + T, kh:kh + H, kw:kw + W, :]
            for kt in range(3) for kh in range(3) for kw in range(3)]
    pat = jnp.stack(cols, axis=-2)                       # (B,T,H,W,27,C)
    return pat.reshape(B * T * H * W, TAPS * C)


def _conv2_pool_constants(B, T, H, W, C1):
    """Constants for the fused conv2+avgpool: replication matrix, position
    mask (with 1/THW folded in) and per-batch row summer."""
    def axis_mask(n):
        m = np.ones((3, n), np.float32)
        m[0, n - 1] = 0.0   # tap offset -1: pooled window misses last slice
        m[2, 0] = 0.0       # tap offset +1: pooled window misses first slice
        return m

    mt, mh, mw = axis_mask(T), axis_mask(H), axis_mask(W)
    p = np.einsum('at,bh,cw->thwabc', mt, mh, mw).reshape(T * H * W, TAPS)
    pexp = np.repeat(p, C1, axis=1)                       # (THW, 27*C1)
    pexp = np.tile(pexp, (B, 1)) / float(T * H * W)       # (B*THW, 27*C1)
    bsel = np.kron(np.eye(B, dtype=np.float32),
                   np.ones((1, T * H * W), np.float32))   # (B, B*THW)
    wtile = np.tile(np.eye(C1, dtype=np.float32), (1, TAPS))  # (C1, 27*C1)
    return (jnp.asarray(wtile, jnp.bfloat16),
            jnp.asarray(pexp, jnp.float32),
            jnp.asarray(bsel, jnp.bfloat16))


def _pad_cols(x, n):
    return jnp.pad(x, ((0, 0), (0, n - x.shape[1])))


def egom2p_encoder_forward(params, rgb, pose, return_embedding=False,
                           add_classifier=True):
    """rgb: (B, T, C, H, W);  pose: (B, T, J, D)."""
    f32, bf16 = jnp.float32, jnp.bfloat16
    B, T, C, H, W = rgb.shape
    C1 = params["w1"].shape[1]
    C2 = params["w2"].shape[1]
    hidden = params["wcls"].shape[1]
    ncls = params["wc"].shape[1]
    Hp = _round_up(hidden, 128)   # lane-dense padded output widths
    Np = _round_up(ncls, 128)

    # Layout plumbing (wrapper side): channels-last, im2col, pose time-mean,
    # lane-dense zero padding of the head weights.
    rgb_cl = jnp.transpose(rgb, (0, 1, 3, 4, 2))                # (B,T,H,W,C)
    patches = _im2col_3x3x3(rgb_cl).astype(bf16)                # (B*THW, 27*C)
    wtile, pexp, bsel = _conv2_pool_constants(B, T, H, W, C1)

    Bp, Tp, J, D = pose.shape
    pose_mean = pose.reshape(Bp, Tp, J * D).mean(axis=1)        # (B, J*D)

    wcls = params["wcls"]
    wcr = _pad_cols(wcls[:C2], Hp).astype(bf16)
    wcp = _pad_cols(wcls[C2:], Hp).astype(bf16)
    bcls = _pad_cols(params["bcls"], Hp)
    wc = jnp.pad(params["wc"],
                 ((0, Hp - hidden), (0, Np - ncls))).astype(bf16)
    bc = _pad_cols(params["bc"], Np)

    vmem = lambda: pl.BlockSpec(memory_space=pltpu.MemorySpace.VMEM)
    emb_p, logits_p = pl.pallas_call(
        _fused_encoder_kernel,
        out_shape=(jax.ShapeDtypeStruct((B, Hp), f32),
                   jax.ShapeDtypeStruct((B, Np), f32)),
        in_specs=[vmem() for _ in range(18)],
        out_specs=(vmem(), vmem()),
        compiler_params=pltpu.CompilerParams(
            vmem_limit_bytes=64 * 1024 * 1024),
        # TODO(synk): for realistic video sizes / large B, tile the batch with
        # a "parallel" grid axis (megacore on v7x) instead of whole-batch VMEM.
    )(patches, params["w1"].astype(bf16), params["b1"],
      wtile, pexp, bsel, params["w2"].astype(bf16), params["b2"],
      pose_mean.astype(bf16), params["wp1"].astype(bf16), params["bp1"],
      params["wp2"].astype(bf16), params["bp2"],
      wcr, wcp, bcls, wc, bc)

    if return_embedding or not add_classifier:
        return emb_p[:, :hidden]
    return logits_p[:, :ncls]


# ----------------------------------------------------------------------------
# Deterministic synthetic parameters (layouts documented in the header)
# ----------------------------------------------------------------------------
def init_params(key, input_channels=3, pose_dim=63, hidden_dim=512,
                num_classes=30):
    C1, C2 = 16, 32
    ks = jax.random.split(key, 10)

    def dense(k, fan_in, shape):
        return jax.random.normal(k, shape, jnp.float32) / np.sqrt(fan_in)

    return dict(
        w1=dense(ks[0], input_channels * TAPS, (TAPS * input_channels, C1)),
        b1=dense(ks[1], input_channels * TAPS, (1, C1)),
        w2=dense(ks[2], C1 * TAPS, (TAPS * C1, C2)),
        b2=dense(ks[3], C1 * TAPS, (1, C2)),
        wp1=dense(ks[4], pose_dim, (pose_dim, 256)),
        bp1=jnp.zeros((1, 256), jnp.float32),
        wp2=dense(ks[5], 256, (256, 128)),
        bp2=jnp.zeros((1, 128), jnp.float32),
        wcls=dense(ks[6], C2 + 128, (C2 + 128, hidden_dim)),
        bcls=dense(ks[7], C2 + 128, (1, hidden_dim)),
        wc=dense(ks[8], hidden_dim, (hidden_dim, num_classes)),
        bc=dense(ks[9], hidden_dim, (1, num_classes)),
    )


if __name__ == "__main__":
    key = jax.random.PRNGKey(0)
    kparam, krgb, kpose = jax.random.split(key, 3)

    # Small shapes consistent with the module's forward.
    B, T, C, H, W = 2, 4, 3, 8, 8
    J, D = 7, 3                      # pose_dim = J * D = 21
    hidden_dim, num_classes = 32, 10

    params = init_params(kparam, input_channels=C, pose_dim=J * D,
                         hidden_dim=hidden_dim, num_classes=num_classes)

    rgb = jax.random.normal(krgb, (B, T, C, H, W), jnp.float32)
    pose = jax.random.normal(kpose, (B, T, J, D), jnp.float32)

    logits = egom2p_encoder_forward(params, rgb, pose)
    logits = jax.block_until_ready(logits)
    assert logits.shape == (B, num_classes), logits.shape
    assert bool(jnp.all(jnp.isfinite(logits)))

    emb = egom2p_encoder_forward(params, rgb, pose, return_embedding=True)
    emb = jax.block_until_ready(emb)
    assert emb.shape == (B, hidden_dim), emb.shape
    assert bool(jnp.all(jnp.isfinite(emb)))

    print("KERNEL_OK")
</pallas_src>

<mosaic_0001>
module attributes {stable_mosaic.version = 11 : i64} {
  func.func @_fused_encoder_kernel(%arg0: memref<512x81xbf16, #tpu.memory_space<vmem>>, %arg1: memref<81x16xbf16, #tpu.memory_space<vmem>>, %arg2: memref<1x16xf32, #tpu.memory_space<vmem>>, %arg3: memref<16x432xbf16, #tpu.memory_space<vmem>>, %arg4: memref<512x432xf32, #tpu.memory_space<vmem>>, %arg5: memref<2x512xbf16, #tpu.memory_space<vmem>>, %arg6: memref<432x32xbf16, #tpu.memory_space<vmem>>, %arg7: memref<1x32xf32, #tpu.memory_space<vmem>>, %arg8: memref<2x21xbf16, #tpu.memory_space<vmem>>, %arg9: memref<21x256xbf16, #tpu.memory_space<vmem>>, %arg10: memref<1x256xf32, #tpu.memory_space<vmem>>, %arg11: memref<256x128xbf16, #tpu.memory_space<vmem>>, %arg12: memref<1x128xf32, #tpu.memory_space<vmem>>, %arg13: memref<32x128xbf16, #tpu.memory_space<vmem>>, %arg14: memref<128x128xbf16, #tpu.memory_space<vmem>>, %arg15: memref<1x128xf32, #tpu.memory_space<vmem>>, %arg16: memref<128x128xbf16, #tpu.memory_space<vmem>>, %arg17: memref<1x128xf32, #tpu.memory_space<vmem>>, %arg18: memref<2x128xf32, #tpu.memory_space<vmem>>, %arg19: memref<2x128xf32, #tpu.memory_space<vmem>>) attributes {dimension_semantics = [], scalar_prefetch = 0 : i64, scratch_operands = 0 : i64, tpu.core_type = #tpu.core_type<tc>} {
    %c0 = arith.constant 0 : index
    %c0_0 = arith.constant 0 : index
    %0 = vector.load %arg0[%c0, %c0_0] : memref<512x81xbf16, #tpu.memory_space<vmem>>, vector<512x81xbf16>
    %c0_1 = arith.constant 0 : index
    %c0_2 = arith.constant 0 : index
    %1 = vector.load %arg1[%c0_1, %c0_2] : memref<81x16xbf16, #tpu.memory_space<vmem>>, vector<81x16xbf16>
    %cst = arith.constant dense<0.000000e+00> : vector<512x16xf32>
    %2 = tpu.matmul %0, %1, %cst {dimension_numbers = #tpu.dot_dimension_numbers<[1], [0], [0], [1], [0, 0, 1, 1], [], []>} : vector<512x81xbf16>, vector<81x16xbf16>, vector<512x16xf32> -> vector<512x16xf32>
    %c0_3 = arith.constant 0 : index
    %c0_4 = arith.constant 0 : index
    %3 = vector.load %arg2[%c0_3, %c0_4] : memref<1x16xf32, #tpu.memory_space<vmem>>, vector<1x16xf32>
    %4 = vector.broadcast %3 : vector<1x16xf32> to vector<512x16xf32>
    %5 = arith.addf %2, %4 : vector<512x16xf32>
    %cst_5 = arith.constant 0.000000e+00 : f32
    %6 = vector.broadcast %cst_5 : f32 to vector<512x16xf32>
    %7 = arith.maximumf %5, %6 : vector<512x16xf32>
    %8 = arith.truncf %7 : vector<512x16xf32> to vector<512x16xbf16>
    %c0_6 = arith.constant 0 : index
    %c0_7 = arith.constant 0 : index
    %9 = vector.load %arg3[%c0_6, %c0_7] : memref<16x432xbf16, #tpu.memory_space<vmem>>, vector<16x432xbf16>
    %cst_8 = arith.constant dense<0.000000e+00> : vector<512x432xf32>
    %10 = tpu.matmul %8, %9, %cst_8 {dimension_numbers = #tpu.dot_dimension_numbers<[1], [0], [0], [1], [0, 0, 1, 1], [], []>} : vector<512x16xbf16>, vector<16x432xbf16>, vector<512x432xf32> -> vector<512x432xf32>
    %c0_9 = arith.constant 0 : index
    %c0_10 = arith.constant 0 : index
    %11 = vector.load %arg4[%c0_9, %c0_10] : memref<512x432xf32, #tpu.memory_space<vmem>>, vector<512x432xf32>
    %12 = arith.mulf %10, %11 : vector<512x432xf32>
    %13 = arith.truncf %12 : vector<512x432xf32> to vector<512x432xbf16>
    %c0_11 = arith.constant 0 : index
    %c0_12 = arith.constant 0 : index
    %14 = vector.load %arg5[%c0_11, %c0_12] : memref<2x512xbf16, #tpu.memory_space<vmem>>, vector<2x512xbf16>
    %cst_13 = arith.constant dense<0.000000e+00> : vector<2x432xf32>
    %15 = tpu.matmul %14, %13, %cst_13 {dimension_numbers = #tpu.dot_dimension_numbers<[1], [0], [0], [1], [0, 0, 1, 1], [], []>} : vector<2x512xbf16>, vector<512x432xbf16>, vector<2x432xf32> -> vector<2x432xf32>
    %16 = arith.truncf %15 : vector<2x432xf32> to vector<2x432xbf16>
    %c0_14 = arith.constant 0 : index
    %c0_15 = arith.constant 0 : index
    %17 = vector.load %arg6[%c0_14, %c0_15] : memref<432x32xbf16, #tpu.memory_space<vmem>>, vector<432x32xbf16>
    %cst_16 = arith.constant dense<0.000000e+00> : vector<2x32xf32>
    %18 = tpu.matmul %16, %17, %cst_16 {dimension_numbers = #tpu.dot_dimension_numbers<[1], [0], [0], [1], [0, 0, 1, 1], [], []>} : vector<2x432xbf16>, vector<432x32xbf16>, vector<2x32xf32> -> vector<2x32xf32>
    %c0_17 = arith.constant 0 : index
    %c0_18 = arith.constant 0 : index
    %19 = vector.load %arg7[%c0_17, %c0_18] : memref<1x32xf32, #tpu.memory_space<vmem>>, vector<1x32xf32>
    %20 = vector.broadcast %19 : vector<1x32xf32> to vector<2x32xf32>
    %21 = arith.addf %18, %20 : vector<2x32xf32>
    %c0_19 = arith.constant 0 : index
    %c0_20 = arith.constant 0 : index
    %22 = vector.load %arg8[%c0_19, %c0_20] : memref<2x21xbf16, #tpu.memory_space<vmem>>, vector<2x21xbf16>
    %c0_21 = arith.constant 0 : index
    %c0_22 = arith.constant 0 : index
    %23 = vector.load %arg9[%c0_21, %c0_22] : memref<21x256xbf16, #tpu.memory_space<vmem>>, vector<21x256xbf16>
    %cst_23 = arith.constant dense<0.000000e+00> : vector<2x256xf32>
    %24 = tpu.matmul %22, %23, %cst_23 {dimension_numbers = #tpu.dot_dimension_numbers<[1], [0], [0], [1], [0, 0, 1, 1], [], []>} : vector<2x21xbf16>, vector<21x256xbf16>, vector<2x256xf32> -> vector<2x256xf32>
    %c0_24 = arith.constant 0 : index
    %c0_25 = arith.constant 0 : index
    %25 = vector.load %arg10[%c0_24, %c0_25] : memref<1x256xf32, #tpu.memory_space<vmem>>, vector<1x256xf32>
    %26 = vector.broadcast %25 : vector<1x256xf32> to vector<2x256xf32>
    %27 = arith.addf %24, %26 : vector<2x256xf32>
    %cst_26 = arith.constant 0.000000e+00 : f32
    %28 = vector.broadcast %cst_26 : f32 to vector<2x256xf32>
    %29 = arith.maximumf %27, %28 : vector<2x256xf32>
    %30 = arith.truncf %29 : vector<2x256xf32> to vector<2x256xbf16>
    %c0_27 = arith.constant 0 : index
    %c0_28 = arith.constant 0 : index
    %31 = vector.load %arg11[%c0_27, %c0_28] : memref<256x128xbf16, #tpu.memory_space<vmem>>, vector<256x128xbf16>
    %cst_29 = arith.constant dense<0.000000e+00> : vector<2x128xf32>
    %32 = tpu.matmul %30, %31, %cst_29 {dimension_numbers = #tpu.dot_dimension_numbers<[1], [0], [0], [1], [0, 0, 1, 1], [], []>} : vector<2x256xbf16>, vector<256x128xbf16>, vector<2x128xf32> -> vector<2x128xf32>
    %c0_30 = arith.constant 0 : index
    %c0_31 = arith.constant 0 : index
    %33 = vector.load %arg12[%c0_30, %c0_31] : memref<1x128xf32, #tpu.memory_space<vmem>>, vector<1x128xf32>
    %34 = vector.broadcast %33 : vector<1x128xf32> to vector<2x128xf32>
    %35 = arith.addf %32, %34 : vector<2x128xf32>
    %36 = arith.truncf %21 : vector<2x32xf32> to vector<2x32xbf16>
    %c0_32 = arith.constant 0 : index
    %c0_33 = arith.constant 0 : index
    %37 = vector.load %arg13[%c0_32, %c0_33] : memref<32x128xbf16, #tpu.memory_space<vmem>>, vector<32x128xbf16>
    %cst_34 = arith.constant dense<0.000000e+00> : vector<2x128xf32>
    %38 = tpu.matmul %36, %37, %cst_34 {dimension_numbers = #tpu.dot_dimension_numbers<[1], [0], [0], [1], [0, 0, 1, 1], [], []>} : vector<2x32xbf16>, vector<32x128xbf16>, vector<2x128xf32> -> vector<2x128xf32>
    %39 = arith.truncf %35 : vector<2x128xf32> to vector<2x128xbf16>
    %c0_35 = arith.constant 0 : index
    %c0_36 = arith.constant 0 : index
    %40 = vector.load %arg14[%c0_35, %c0_36] : memref<128x128xbf16, #tpu.memory_space<vmem>>, vector<128x128xbf16>
    %cst_37 = arith.constant dense<0.000000e+00> : vector<2x128xf32>
    %41 = tpu.matmul %39, %40, %cst_37 {dimension_numbers = #tpu.dot_dimension_numbers<[1], [0], [0], [1], [0, 0, 1, 1], [], []>} : vector<2x128xbf16>, vector<128x128xbf16>, vector<2x128xf32> -> vector<2x128xf32>
    %42 = arith.addf %38, %41 : vector<2x128xf32>
    %c0_38 = arith.constant 0 : index
    %c0_39 = arith.constant 0 : index
    %43 = vector.load %arg15[%c0_38, %c0_39] : memref<1x128xf32, #tpu.memory_space<vmem>>, vector<1x128xf32>
    %44 = vector.broadcast %43 : vector<1x128xf32> to vector<2x128xf32>
    %45 = arith.addf %42, %44 : vector<2x128xf32>
    %c0_40 = arith.constant 0 : index
    %c0_41 = arith.constant 0 : index
    %46 = vector.load %arg18[%c0_40, %c0_41] : memref<2x128xf32, #tpu.memory_space<vmem>>, vector<2x128xf32>
    tpu.vector_store %arg18[%c0_40, %c0_41], %45 {strides = array<i32>} : memref<2x128xf32, #tpu.memory_space<vmem>>, vector<2x128xf32>,
    %47 = arith.truncf %45 : vector<2x128xf32> to vector<2x128xbf16>
    %c0_42 = arith.constant 0 : index
    %c0_43 = arith.constant 0 : index
    %48 = vector.load %arg16[%c0_42, %c0_43] : memref<128x128xbf16, #tpu.memory_space<vmem>>, vector<128x128xbf16>
    %cst_44 = arith.constant dense<0.000000e+00> : vector<2x128xf32>
    %49 = tpu.matmul %47, %48, %cst_44 {dimension_numbers = #tpu.dot_dimension_numbers<[1], [0], [0], [1], [0, 0, 1, 1], [], []>} : vector<2x128xbf16>, vector<128x128xbf16>, vector<2x128xf32> -> vector<2x128xf32>
    %c0_45 = arith.constant 0 : index
    %c0_46 = arith.constant 0 : index
    %50 = vector.load %arg17[%c0_45, %c0_46] : memref<1x128xf32, #tpu.memory_space<vmem>>, vector<1x128xf32>
    %51 = vector.broadcast %50 : vector<1x128xf32> to vector<2x128xf32>
    %52 = arith.addf %49, %51 : vector<2x128xf32>
    %c0_47 = arith.constant 0 : index
    %c0_48 = arith.constant 0 : index
    %53 = vector.load %arg19[%c0_47, %c0_48] : memref<2x128xf32, #tpu.memory_space<vmem>>, vector<2x128xf32>
    tpu.vector_store %arg19[%c0_47, %c0_48], %52 {strides = array<i32>} : memref<2x128xf32, #tpu.memory_space<vmem>>, vector<2x128xf32>,
    return
  }
}

</mosaic_0001>

<bundles_post_ra>
// kernel: tpu_custom_call.1
= control target key start
LH: loop header
LB: loop body
LE: loop exit
PB: predicated region body
PF: predicated region fallthrough
CT: control target
= control target key end

     0   :  { %s6352_s0 = inlined_call_operand.vmem [shape: bf16[512,81], index: 0, kind: input, shape index: {}]   ;;  %s6353_s1 = inlined_call_operand.vmem [shape: bf16[81,16], index: 1, kind: input, shape index: {}]   ;;  %s6354_s2 = inlined_call_operand.vmem [shape: f32[1,16], index: 2, kind: input, shape index: {}]   ;;  %s6355_s3 = inlined_call_operand.vmem [shape: bf16[16,432], index: 3, kind: input, shape index: {}]   ;;  %s6356_s4 = inlined_call_operand.vmem [shape: f32[512,432], index: 4, kind: input, shape index: {}]   ;;  %s6357_s5 = inlined_call_operand.vmem [shape: bf16[2,512], index: 5, kind: input, shape index: {}]   ;;  %s6358_s6 = inlined_call_operand.vmem [shape: bf16[432,32], index: 6, kind: input, shape index: {}]   ;;  %s6359_s7 = inlined_call_operand.vmem [shape: f32[1,32], index: 7, kind: input, shape index: {}]   ;;  %s6360_s8 = inlined_call_operand.vmem [shape: bf16[2,21], index: 8, kind: input, shape index: {}]   ;;  %s6361_s9 = inlined_call_operand.vmem [shape: bf16[21,256], index: 9, kind: input, shape index: {}]   ;;  %s6362_s10 = inlined_call_operand.vmem [shape: f32[1,256], index: 10, kind: input, shape index: {}]   ;;  %s6363_s11 = inlined_call_operand.vmem [shape: bf16[256,128], index: 11, kind: input, shape index: {}]   ;;  %s6364_s12 = inlined_call_operand.vmem [shape: f32[1,128], index: 12, kind: input, shape index: {}]   ;;  %s6365_s13 = inlined_call_operand.vmem [shape: bf16[32,128], index: 13, kind: input, shape index: {}]   ;;  %s6366_s14 = inlined_call_operand.vmem [shape: bf16[128,128], index: 14, kind: input, shape index: {}]   ;;  %s6367_s15 = inlined_call_operand.vmem [shape: f32[1,128], index: 15, kind: input, shape index: {}]   ;;  %s6368_s16 = inlined_call_operand.vmem [shape: bf16[128,128], index: 16, kind: input, shape index: {}]   ;;  %s6369_s17 = inlined_call_operand.vmem [shape: f32[1,128], index: 17, kind: input, shape index: {}]   ;;  %s6370_s18 = inlined_call_operand.hbm [shape: f32[2,128], index: 18, kind: output, shape index: {0}]   ;;  %s6371_s19 = inlined_call_operand.hbm [shape: f32[2,128], index: 19, kind: output, shape index: {1}]  }
   0x1   :  { %6456 = sst [smem:[#allocation93_spill]] %s6352_s0 }
   0x2   :  { %6457 = sst [smem:[#allocation94_spill]] %s6353_s1 }
   0x3   :  { %6458 = sst [smem:[#allocation95_spill]] %s6354_s2 }
   0x4   :  { %6459 = sst [smem:[#allocation96_spill]] %s6355_s3 }
   0x5   :  { %25 = vsyncpa [#allocation3], 0  ;;  %s6460_s20 = sld [smem:[#allocation94_spill]]  ;;  %vm436_vm0 = vcmask 1040384   ;;  %v6375_v1 = vmov 0   ;;  %vm339_vm1 = vcmask 662528  }
   0x6   :  { %v438_v2 = vsel %vm436_vm0, 65535, %v6375_v1  ;;  %990 = vmatprep.mubr.bf16.mxu1 %v6375_v1  ;;  %s6461_s23 = sld [smem:[#allocation93_spill]] }
   0xb   :  { %v3828_v0 = vld [vmem:[%s6460_s20 + $0x28] ss:$0 sps:$4 sm:$0x11]   ;;  %v3829_v4 = vld [vmem:[%s6460_s20 + $0x20] sm:$0xff]   ;;  %v3830_v6 = vld [vmem:[%s6460_s20 + $0x18] sm:$0xff]  }
   0xc   :  { %v440_v3 = vand.u32 %v3828_v0, %v438_v2  ;;  %v3834_v5 = vld [vmem:[%s6461_s23] sm:$0xff]   ;;  %v3831_v7 = vld [vmem:[%s6460_s20 + $0x10] sm:$0xff]   ;;  %v3832_v8 = vld [vmem:[%s6460_s20 + $0x8] sm:$0xff]  }
   0xd   :  { %3707 = vmatprep.mubr.msk.bf16.mxu0 %vm339_vm1, %v3834_v5  ;;  %v3833_v9 = vld [vmem:[%s6460_s20] sm:$0xff]   ;;  %v3835_v10 = vld [vmem:[%s6461_s23 + $0x8] sm:$0xff]   ;;  %v3836_v11 = vld [vmem:[%s6461_s23 + $0x10] sm:$0xff]  }
   0xe   :  { %3695 = vmatprep.subr.bf16.mxu0 %v440_v3  ;;  %v3837_v12 = vld [vmem:[%s6461_s23 + $0x18] sm:$0xff]   ;;  %v3838_v13 = vld [vmem:[%s6461_s23 + $0x20] sm:$0xff]   ;;  %v3839_v14 = vld [vmem:[%s6461_s23 + $0x28] sm:$0xff]  }
   0xf   :  { %3696 = vmatpush3.bf16.msra.mxu0 %v440_v3  ;;  %v3840_v15 = vld [vmem:[%s6461_s23 + $0x30] sm:$0xff]   ;;  %v3841_v16 = vld [vmem:[%s6461_s23 + $0x38] sm:$0xff]   ;;  %v3842_v17 = vld [vmem:[%s6461_s23 + $0x40] sm:$0xff]  }
  0x10   :  { %3697 = vmatprep.subr.bf16.mxu0 %v3829_v4  ;;  %v3843_v18 = vld [vmem:[%s6461_s23 + $0x48] sm:$0xff]   ;;  %v3844_v19 = vld [vmem:[%s6461_s23 + $0x50] sm:$0xff]   ;;  %v3845_v20 = vld [vmem:[%s6461_s23 + $0x58] sm:$0xff]  }
  0x11   :  { %v3846_v21 = vld [vmem:[%s6461_s23 + $0x60] sm:$0xff]   ;;  %v3847_v22 = vld [vmem:[%s6461_s23 + $0x68] sm:$0xff]   ;;  %v3848_v23 = vld [vmem:[%s6461_s23 + $0x70] sm:$0xff]  }
  0x13   :  { %3698 = vmatpush3.bf16.msra.mxu0 %v3829_v4 }
  0x14   :  { %3699 = vmatprep.subr.bf16.mxu0 %v3830_v6 }
  0x17   :  { %3700 = vmatpush3.bf16.msra.mxu0 %v3830_v6 }
  0x18   :  { %3701 = vmatprep.subr.bf16.mxu0 %v3831_v7 }
  0x1b   :  { %3702 = vmatpush3.bf16.msra.mxu0 %v3831_v7 }
  0x1c   :  { %3703 = vmatprep.subr.bf16.mxu0 %v3832_v8 }
  0x1f   :  { %3704 = vmatpush3.bf16.msra.mxu0 %v3832_v8 }
  0x20   :  { %3705 = vmatprep.subr.bf16.mxu0 %v3833_v9 }
  0x23   :  { %3706 = vmatpush3.bf16.msra.mxu0 %v3833_v9 }
  0x26   :  { %3708 = vmatmul.mubr.msk.bf16.vlgmr.msra.gmra.mxu0 %vm339_vm1, %v3835_v10 }
  0x27   :  { %3711 = vmatprep.mubr.msk.bf16.mxu0 %vm339_vm1, %v3836_v11 }
  0x2e   :  { %3712 = vmatmul.mubr.msk.bf16.gmra.mxu0 %vm339_vm1, %v3837_v12 }
  0x2f   :  { %3715 = vmatprep.mubr.msk.bf16.mxu0 %vm339_vm1, %v3838_v13 }
  0x36   :  { %3716 = vmatmul.mubr.msk.bf16.gmra.mxu0 %vm339_vm1, %v3839_v14 }
  0x37   :  { %3719 = vmatprep.mubr.msk.bf16.mxu0 %vm339_vm1, %v3840_v15 }
  0x3e   :  { %3720 = vmatmul.mubr.msk.bf16.gmra.mxu0 %vm339_vm1, %v3841_v16 }
  0x3f   :  { %3723 = vmatprep.mubr.msk.bf16.mxu0 %vm339_vm1, %v3842_v17 }
  0x46   :  { %3724 = vmatmul.mubr.msk.bf16.gmra.mxu0 %vm339_vm1, %v3843_v18 }
  0x47   :  { %3727 = vmatprep.mubr.msk.bf16.mxu0 %vm339_vm1, %v3844_v19 }
  0x4e   :  { %3728 = vmatmul.mubr.msk.bf16.gmra.mxu0 %vm339_vm1, %v3845_v20 }
  0x4f   :  { %3731 = vmatprep.mubr.msk.bf16.mxu0 %vm339_vm1, %v3846_v21 }
  0x56   :  { %3732 = vmatmul.mubr.msk.bf16.gmra.mxu0 %vm339_vm1, %v3847_v22 }
  0x57   :  { %3735 = vmatprep.mubr.msk.bf16.mxu0 %vm339_vm1, %v3848_v23 }
  0x58   :  { %26 = vsyncpa [#allocation5], 0  ;;  %v3849_v24 = vld [vmem:[%s6461_s23 + $0x78] sm:$0xff]   ;;  %v3850_v25 = vld [vmem:[%s6461_s23 + $0x80] sm:$0xff]   ;;  %s6462_s30 = sld [smem:[#allocation96_spill]]  ;;  %vm851_vm2 = vcmask 130048  }
  0x59   :  { %v3851_v26 = vld [vmem:[%s6461_s23 + $0x88] sm:$0xff]   ;;  %v3852_v27 = vld [vmem:[%s6461_s23 + $0x90] sm:$0xff]   ;;  %v3853_v28 = vld [vmem:[%s6461_s23 + $0x98] sm:$0xff]   ;;  %s6463_s22 = sld [smem:[#allocation95_spill]]  ;;  %vm2834_vm3 = vcmask 1041408   ;;  %vm2835_vm4 = vcmask 1042432  }
  0x5a   :  { %v3854_v29 = vld [vmem:[%s6461_s23 + $0xa0] sm:$0xff]   ;;  %v3855_v32 = vld [vmem:[%s6461_s23 + $0xa8] sm:$0xff]   ;;  %v3856_v33 = vld [vmem:[%s6461_s23 + $0xb0] sm:$0xff]   ;;  %vm2830_vm5 = vcmask 171008   ;;  %vm2715_vm6 = vcmask 392192   ;;  %vm3986_vm7 = vmmov 0  }
  0x5b   :  { %v3857_v35 = vld [vmem:[%s6461_s23 + $0xb8] sm:$0xff]   ;;  %v3858_v36 = vld [vmem:[%s6461_s23 + $0xc0] sm:$0xff]   ;;  %v3859_v37 = vld [vmem:[%s6461_s23 + $0xc8] sm:$0xff]   ;;  %vm3186_vm8 = vcmask 261120  }
  0x5c   :  { %v3860_v38 = vld [vmem:[%s6461_s23 + $0xd0] sm:$0xff]   ;;  %v3861_v39 = vld [vmem:[%s6461_s23 + $0xd8] sm:$0xff]   ;;  %v3862_v40 = vld [vmem:[%s6461_s23 + $0xe0] sm:$0xff]  }
  0x5d   :  { %v3863_v41 = vld [vmem:[%s6461_s23 + $0xe8] sm:$0xff]   ;;  %v3864_v42 = vld [vmem:[%s6461_s23 + $0xf0] sm:$0xff]   ;;  %v3865_v43 = vld [vmem:[%s6461_s23 + $0xf8] sm:$0xff]  }
  0x5e   :  { %3736 = vmatmul.mubr.msk.bf16.gmra.mxu0 %vm339_vm1, %v3849_v24  ;;  %v3866_v30 = vld [vmem:[%s6462_s30 + $0x4] ss:$16 sps:$4 sm:$0xff]   ;;  %v3868_v31 = vld [vmem:[%s6462_s30] ss:$16 sps:$4 sm:$0xff]   ;;  %v3871_v34 = vld [vmem:[%s6462_s30 + $0xc] ss:$16 sps:$4 sm:$0xff]  }
  0x5f   :  { %3739 = vmatprep.mubr.msk.bf16.mxu0 %vm339_vm1, %v3850_v25  ;;  %3819 = vmatprep.subr.bf16.mxu1 %v3866_v30  ;;  %v4250_v45 = vld [vmem:[%s6463_s22] ss:$0 sm:$0xff]  ;;  %v3869_v60 = vld [vmem:[%s6462_s30 + $0x8] ss:$16 sps:$4 sm:$0xff]  }
  0x60   :  { %962 = vmatprep.subr.bf16.mxu0 %v3866_v30  ;;  %3820 = vmatpush1.bf16.msra.mxu1 %v3868_v31 }
  0x61   :  { %963 = vmatpush1.bf16.msra.mxu0 %v3868_v31 }
  0x62   :  { %1315 = vmatprep.subr.bf16.mxu0 %v3871_v34 }
  0x66   :  { %3740 = vmatmul.mubr.msk.bf16.gmra.mxu0 %vm339_vm1, %v3851_v26 }
  0x67   :  { %3743 = vmatprep.mubr.msk.bf16.mxu0 %vm339_vm1, %v3852_v27 }
  0x6e   :  { %3744 = vmatmul.mubr.msk.bf16.gmra.mxu0 %vm339_vm1, %v3853_v28 }
  0x6f   :  { %3747 = vmatprep.mubr.msk.bf16.mxu0 %vm339_vm1, %v3854_v29 }
  0x76   :  { %3748 = vmatmul.mubr.msk.bf16.gmra.mxu0 %vm339_vm1, %v3855_v32 }
  0x77   :  { %3751 = vmatprep.mubr.msk.bf16.mxu0 %vm339_vm1, %v3856_v33 }
  0x7e   :  { %3752 = vmatmul.mubr.msk.bf16.gmra.mxu0 %vm339_vm1, %v3857_v35 }
  0x7f   :  { %3755 = vmatprep.mubr.msk.bf16.mxu0 %vm339_vm1, %v3858_v36 }
  0x86   :  { %3756 = vmatmul.mubr.msk.bf16.gmra.mxu0 %vm339_vm1, %v3859_v37 }
  0x87   :  { %3759 = vmatprep.mubr.msk.bf16.mxu0 %vm339_vm1, %v3860_v38 }
  0x8e   :  { %3760 = vmatmul.mubr.msk.bf16.gmra.mxu0 %vm339_vm1, %v3861_v39 }
  0x8f   :  { %3763 = vmatprep.mubr.msk.bf16.mxu0 %vm339_vm1, %v3862_v40 }
  0x96   :  { %3764 = vmatmul.mubr.msk.bf16.gmra.mxu0 %vm339_vm1, %v3863_v41 }
  0x97   :  { %3767 = vmatprep.mubr.msk.bf16.mxu0 %vm339_vm1, %v3864_v42 }
  0x9e   :  { %3768 = vmatmul.mubr.msk.bf16.gmra.mxu0 %vm339_vm1, %v3865_v43 }
  0x9f   :  { %980 = vmatprep.mubr.bf16.mxu0 %v6375_v1 }
  0xe6   :  { %v3709_v44 = vpop.f32.mrf.mxu0 }
  0xe7   :  { %v485_v47 = vadd.f32 %v3709_v44, %v4250_v45 }
  0xe8   :  { %v476_v46 = vpop.f32.mrf.mxu0 }
  0xe9   :  { %v477_v49 = vadd.f32 %v4250_v45, %v476_v46  ;;  %v733_v52 = vmax.f32 %v485_v47, 0.0 }
  0xea   :  { %v3710_v48 = vpop.f32.mrf.mxu0 }
  0xeb   :  { %v488_v50 = vadd.f32 %v3710_v48, %v4250_v45  ;;  %v731_v56 = vmax.f32 %v477_v49, 0.0 }
  0xec   :  { %v479_v51 = vpop.f32.mrf.mxu0 }
  0xed   :  { %v734_v53 = vmax.f32 %v488_v50, 0.0  ;;  %v480_v54 = vadd.f32 %v4250_v45, %v479_v51 }
  0xee   :  { %v3713_v55 = vpop.f32.mrf.mxu0 }
  0xef   :  { %v796_v57 = vpack.c.bf16 %v734_v53, %v733_v52  ;;  %v732_v58 = vmax.f32 %v480_v54, 0.0  ;;  %v501_v10 = vadd.f32 %v3713_v55, %v4250_v45 }
  0xf0   :  { %v492_v59 = vpop.f32.mrf.mxu0 }
  0xf1   :  { %v795_v61 = vpack.c.bf16 %v732_v58, %v731_v56  ;;  %3456 = vmatmul.mubr.msk.bf16.vlgmr.msra.gmra.mxu1 %vm851_vm2, %v796_v57  ;;  %v493_v63 = vadd.f32 %v4250_v45, %v492_v59  ;;  %v737_v14 = vmax.f32 %v501_v10, 0.0 }
  0xf2   :  { %v3714_v62 = vpop.f32.mrf.mxu0  ;;  %1000 = vmatprep.mubr.bf16.mxu1 %v6375_v1 }
  0xf3   :  { %3455 = vmatmul.mubr.msk.bf16.vlgmr.msra.gmra.mxu0 %vm851_vm2, %v795_v61  ;;  %v735_v4 = vmax.f32 %v493_v63, 0.0  ;;  %v504_v7 = vadd.f32 %v3714_v62, %v4250_v45 }
  0xf4   :  { %v495_v0 = vpop.f32.mrf.mxu0  ;;  %1316 = vmatpush1.bf16.msra.mxu0 %v3869_v60  ;;  %1333 = vmatprep.mubr.bf16.mxu0 %v6375_v1 }
  0xf5   :  { %v496_v2 = vadd.f32 %v4250_v45, %v495_v0  ;;  %v738_v12 = vmax.f32 %v504_v7, 0.0 }
  0xf6   :  { %v3717_v3 = vpop.f32.mrf.mxu0 }
  0xf7   :  { %v736_v5 = vmax.f32 %v496_v2, 0.0  ;;  %v798_v16 = vpack.c.bf16 %v738_v12, %v737_v14  ;;  %v517_v25 = vadd.f32 %v3717_v3, %v4250_v45 }
  0xf8   :  { %v508_v6 = vpop.f32.mrf.mxu0 }
  0xf9   :  { %v797_v8 = vpack.c.bf16 %v736_v5, %v735_v4  ;;  %v509_v17 = vadd.f32 %v4250_v45, %v508_v6  ;;  %v741_v29 = vmax.f32 %v517_v25, 0.0 }
  0xfa   :  { %v3718_v9 = vpop.f32.mrf.mxu0 }
  0xfb   :  { %3457 = vmatmul.mubr.msk.bf16.gmra.mxu1 %vm851_vm2, %v797_v8  ;;  %3487 = vmatmul.mubr.msk.bf16.vlgmr.msra.gmra.mxu0 %vm851_vm2, %v795_v61  ;;  %v739_v21 = vmax.f32 %v509_v17, 0.0  ;;  %v520_v26 = vadd.f32 %v3718_v9, %v4250_v45 }
  0xfc   :  { %v511_v11 = vpop.f32.mrf.mxu0  ;;  %1010 = vmatprep.mubr.bf16.mxu1 %v6375_v1  ;;  %1343 = vmatprep.mubr.bf16.mxu0 %v6375_v1 }
  0xfd   :  { %v512_v18 = vadd.f32 %v4250_v45, %v511_v11  ;;  %v742_v30 = vmax.f32 %v520_v26, 0.0 }
  0xfe   :  { %v3721_v13 = vpop.f32.mrf.mxu0 }
  0xff   :  { %v740_v22 = vmax.f32 %v512_v18, 0.0  ;;  %v800_v32 = vpack.c.bf16 %v742_v30, %v741_v29  ;;  %v533_v39 = vadd.f32 %v3721_v13, %v4250_v45 }
 0x100   :  { %v524_v15 = vpop.f32.mrf.mxu0 }
 0x101   :  { %v799_v27 = vpack.c.bf16 %v740_v22, %v739_v21  ;;  %v525_v33 = vadd.f32 %v4250_v45, %v524_v15  ;;  %v745_v43 = vmax.f32 %v533_v39, 0.0 }
 0x102   :  { %v3722_v19 = vpop.f32.mrf.mxu0 }
 0x103   :  { %3458 = vmatmul.mubr.msk.bf16.gmra.mxu1 %vm851_vm2, %v798_v16  ;;  %3488 = vmatmul.mubr.msk.bf16.gmra.mxu0 %vm851_vm2, %v796_v57  ;;  %v743_v36 = vmax.f32 %v525_v33, 0.0  ;;  %v536_v40 = vadd.f32 %v3722_v19, %v4250_v45 }
 0x104   :  { %1020 = vmatprep.mubr.bf16.mxu1 %v6375_v1  ;;  %1353 = vmatprep.mubr.bf16.mxu0 %v6375_v1  ;;  %v527_v20 = vpop.f32.mrf.mxu0 }
 0x105   :  { %v528_v34 = vadd.f32 %v4250_v45, %v527_v20  ;;  %v746_v44 = vmax.f32 %v536_v40, 0.0 }
 0x106   :  { %v3725_v23 = vpop.f32.mrf.mxu0 }
 0x107   :  { %v744_v37 = vmax.f32 %v528_v34, 0.0  ;;  %v802_v48 = vpack.c.bf16 %v746_v44, %v745_v43  ;;  %v549_v55 = vadd.f32 %v3725_v23, %v4250_v45 }
 0x108   :  { %v540_v24 = vpop.f32.mrf.mxu0 }
 0x109   :  { %v801_v41 = vpack.c.bf16 %v744_v37, %v743_v36  ;;  %v541_v49 = vadd.f32 %v4250_v45, %v540_v24  ;;  %v749_v59 = vmax.f32 %v549_v55, 0.0 }
 0x10a   :  { %v3726_v28 = vpop.f32.mrf.mxu0 }
 0x10b   :  { %3459 = vmatmul.mubr.msk.bf16.gmra.mxu1 %vm851_vm2, %v799_v27  ;;  %3489 = vmatmul.mubr.msk.bf16.gmra.mxu0 %vm851_vm2, %v797_v8  ;;  %v747_v52 = vmax.f32 %v541_v49, 0.0  ;;  %v552_v56 = vadd.f32 %v3726_v28, %v4250_v45 }
 0x10c   :  { %1030 = vmatprep.mubr.bf16.mxu1 %v6375_v1  ;;  %1363 = vmatprep.mubr.bf16.mxu0 %v6375_v1  ;;  %v543_v31 = vpop.f32.mrf.mxu0 }
 0x10d   :  { %v544_v50 = vadd.f32 %v4250_v45, %v543_v31  ;;  %v750_v60 = vmax.f32 %v552_v56, 0.0 }
 0x10e   :  { %v3729_v35 = vpop.f32.mrf.mxu0 }
 0x10f   :  { %v748_v53 = vmax.f32 %v544_v50, 0.0  ;;  %v804_v62 = vpack.c.bf16 %v750_v60, %v749_v59  ;;  %v565_v6 = vadd.f32 %v3729_v35, %v4250_v45 }
 0x110   :  { %v556_v38 = vpop.f32.mrf.mxu0 }
 0x111   :  { %v803_v57 = vpack.c.bf16 %v748_v53, %v747_v52  ;;  %v557_v63 = vadd.f32 %v4250_v45, %v556_v38  ;;  %v753_v11 = vmax.f32 %v565_v6, 0.0 }
 0x112   :  { %v3730_v42 = vpop.f32.mrf.mxu0 }
 0x113   :  { %3460 = vmatmul.mubr.msk.bf16.gmra.mxu1 %vm851_vm2, %v800_v32  ;;  %3490 = vmatmul.mubr.msk.bf16.gmra.mxu0 %vm851_vm2, %v798_v16  ;;  %v751_v3 = vmax.f32 %v557_v63, 0.0  ;;  %v568_v7 = vadd.f32 %v3730_v42, %v4250_v45 }
 0x114   :  { %1040 = vmatprep.mubr.bf16.mxu1 %v6375_v1  ;;  %1373 = vmatprep.mubr.bf16.mxu0 %v6375_v1  ;;  %v559_v46 = vpop.f32.mrf.mxu0 }
 0x115   :  { %v560_v0 = vadd.f32 %v4250_v45, %v559_v46  ;;  %v754_v12 = vmax.f32 %v568_v7, 0.0 }
 0x116   :  { %v3733_v47 = vpop.f32.mrf.mxu0 }
 0x117   :  { %v752_v4 = vmax.f32 %v560_v0, 0.0  ;;  %v806_v14 = vpack.c.bf16 %v754_v12, %v753_v11  ;;  %v581_v21 = vadd.f32 %v3733_v47, %v4250_v45 }
 0x118   :  { %v572_v51 = vpop.f32.mrf.mxu0 }
 0x119   :  { %v805_v8 = vpack.c.bf16 %v752_v4, %v751_v3  ;;  %v573_v15 = vadd.f32 %v4250_v45, %v572_v51  ;;  %v757_v25 = vmax.f32 %v581_v21, 0.0 }
 0x11a   :  { %v3734_v54 = vpop.f32.mrf.mxu0 }
 0x11b   :  { %3461 = vmatmul.mubr.msk.bf16.gmra.mxu1 %vm851_vm2, %v801_v41  ;;  %3491 = vmatmul.mubr.msk.bf16.gmra.mxu0 %vm851_vm2, %v799_v27  ;;  %v755_v18 = vmax.f32 %v573_v15, 0.0  ;;  %v584_v22 = vadd.f32 %v3734_v54, %v4250_v45 }
 0x11c   :  { %1050 = vmatprep.mubr.bf16.mxu1 %v6375_v1  ;;  %1383 = vmatprep.mubr.bf16.mxu0 %v6375_v1  ;;  %v575_v58 = vpop.f32.mrf.mxu0 }
 0x11d   :  { %v576_v16 = vadd.f32 %v4250_v45, %v575_v58  ;;  %v758_v26 = vmax.f32 %v584_v22, 0.0 }
 0x11e   :  { %v3737_v61 = vpop.f32.mrf.mxu0 }
 0x11f   :  { %v756_v19 = vmax.f32 %v576_v16, 0.0  ;;  %v808_v28 = vpack.c.bf16 %v758_v26, %v757_v25  ;;  %v597_v36 = vadd.f32 %v3737_v61, %v4250_v45 }
 0x120   :  { %v588_v2 = vpop.f32.mrf.mxu0 }
 0x121   :  { %v807_v23 = vpack.c.bf16 %v756_v19, %v755_v18  ;;  %v589_v29 = vadd.f32 %v4250_v45, %v588_v2  ;;  %v761_v40 = vmax.f32 %v597_v36, 0.0 }
 0x122   :  { %v3738_v5 = vpop.f32.mrf.mxu0 }
 0x123   :  { %3462 = vmatmul.mubr.msk.bf16.gmra.mxu1 %vm851_vm2, %v802_v48  ;;  %3492 = vmatmul.mubr.msk.bf16.gmra.mxu0 %vm851_vm2, %v800_v32  ;;  %v759_v32 = vmax.f32 %v589_v29, 0.0  ;;  %v600_v37 = vadd.f32 %v3738_v5, %v4250_v45 }
 0x124   :  { %1060 = vmatprep.mubr.bf16.mxu1 %v6375_v1  ;;  %1393 = vmatprep.mubr.bf16.mxu0 %v6375_v1  ;;  %v591_v9 = vpop.f32.mrf.mxu0 }
 0x125   :  { %v592_v30 = vadd.f32 %v4250_v45, %v591_v9 }
 0x126   :  { %v3741_v10 = vpop.f32.mrf.mxu0 }
 0x127   :  { %v760_v33 = vmax.f32 %v592_v30, 0.0  ;;  %v613_v51 = vadd.f32 %v3741_v10, %v4250_v45 }
 0x128   :  { %v604_v13 = vpop.f32.mrf.mxu0 }
 0x129   :  { %v809_v38 = vpack.c.bf16 %v760_v33, %v759_v32  ;;  %v605_v44 = vadd.f32 %v4250_v45, %v604_v13  ;;  %v765_v55 = vmax.f32 %v613_v51, 0.0 }
 0x12a   :  { %v3742_v17 = vpop.f32.mrf.mxu0 }
 0x12b   :  { %3463 = vmatmul.mubr.msk.bf16.gmra.mxu1 %vm851_vm2, %v803_v57  ;;  %3493 = vmatmul.mubr.msk.bf16.gmra.mxu0 %vm851_vm2, %v801_v41  ;;  %v762_v41 = vmax.f32 %v600_v37, 0.0  ;;  %v616_v52 = vadd.f32 %v3742_v17, %v4250_v45 }
 0x12c   :  { %1070 = vmatprep.mubr.bf16.mxu1 %v6375_v1  ;;  %1403 = vmatprep.mubr.bf16.mxu0 %v6375_v1  ;;  %v607_v20 = vpop.f32.mrf.mxu0 }
 0x12d   :  { %v810_v43 = vpack.c.bf16 %v762_v41, %v761_v40  ;;  %v608_v46 = vadd.f32 %v4250_v45, %v607_v20  ;;  %v766_v56 = vmax.f32 %v616_v52, 0.0 }
 0x12e   :  { %v4327_v24 = vpop.f32.mrf.mxu0 }
 0x12f   :  { %v764_v49 = vmax.f32 %v608_v46, 0.0  ;;  %v812_v58 = vpack.c.bf16 %v766_v56, %v765_v55  ;;  %v629_v3 = vadd.f32 %v4327_v24, %v4250_v45 }
 0x130   :  { %v620_v27 = vpop.f32.mrf.mxu0 }
 0x131   :  { %v621_v59 = vadd.f32 %v4250_v45, %v620_v27  ;;  %v769_v7 = vmax.f32 %v629_v3, 0.0 }
 0x132   :  { %v3746_v31 = vpop.f32.mrf.mxu0 }
 0x133   :  { %3464 = vmatmul.mubr.msk.bf16.gmra.mxu1 %vm851_vm2, %v804_v62  ;;  %3494 = vmatmul.mubr.msk.bf16.gmra.mxu0 %vm851_vm2, %v802_v48  ;;  %v763_v48 = vmax.f32 %v605_v44, 0.0  ;;  %v767_v63 = vmax.f32 %v621_v59, 0.0  ;;  %v632_v4 = vadd.f32 %v3746_v31, %v4250_v45 }
 0x134   :  { %1080 = vmatprep.mubr.bf16.mxu1 %v6375_v1  ;;  %1413 = vmatprep.mubr.bf16.mxu0 %v6375_v1  ;;  %v623_v34 = vpop.f32.mrf.mxu0 }
 0x135   :  { %v811_v53 = vpack.c.bf16 %v764_v49, %v763_v48  ;;  %v624_v60 = vadd.f32 %v4250_v45, %v623_v34 }
 0x136   :  { %v4339_v35 = vpop.f32.mrf.mxu0 }
 0x137   :  { %v768_v0 = vmax.f32 %v624_v60, 0.0  ;;  %v645_v17 = vadd.f32 %v4339_v35, %v4250_v45  ;;  %v1666_v60 = vld [vmem:[%s6356_s4 + $0x60] sm:$0xff] }
 0x138   :  { %v636_v39 = vpop.f32.mrf.mxu0 }
 0x139   :  { %v813_v5 = vpack.c.bf16 %v768_v0, %v767_v63  ;;  %v637_v11 = vadd.f32 %v4250_v45, %v636_v39  ;;  %v773_v21 = vmax.f32 %v645_v17, 0.0  ;;  %v1663_v0 = vld [vmem:[%s6356_s4 + $0x48] sm:$0xff] }
 0x13a   :  { %v3750_v42 = vpop.f32.mrf.mxu0 }
 0x13b   :  { %3465 = vmatmul.mubr.msk.bf16.gmra.mxu1 %vm851_vm2, %v805_v8  ;;  %3495 = vmatmul.mubr.msk.bf16.gmra.mxu0 %vm851_vm2, %v803_v57  ;;  %v648_v18 = vadd.f32 %v3750_v42, %v4250_v45 }
 0x13c   :  { %1090 = vmatprep.mubr.bf16.mxu1 %v6375_v1  ;;  %1423 = vmatprep.mubr.bf16.mxu0 %v6375_v1  ;;  %v639_v47 = vpop.f32.mrf.mxu0 }
 0x13d   :  { %v640_v12 = vadd.f32 %v4250_v45, %v639_v47  ;;  %v774_v22 = vmax.f32 %v648_v18, 0.0 }
 0x13e   :  { %v4353_v50 = vpop.f32.mrf.mxu0 }
 0x13f   :  { %v772_v15 = vmax.f32 %v640_v12, 0.0  ;;  %v816_v24 = vpack.c.bf16 %v774_v22, %v773_v21  ;;  %v661_v31 = vadd.f32 %v4353_v50, %v4250_v45  ;;  %v1659_v12 = vld [vmem:[%s6356_s4 + $0x28] sm:$0xff] }
 0x140   :  { %v652_v54 = vpop.f32.mrf.mxu0 }
 0x141   :  { %v653_v25 = vadd.f32 %v4250_v45, %v652_v54  ;;  %v777_v35 = vmax.f32 %v661_v31, 0.0 }
 0x142   :  { %v3754_v57 = vpop.f32.mrf.mxu0 }
 0x143   :  { %3466 = vmatmul.mubr.msk.bf16.gmra.mxu1 %vm851_vm2, %v806_v14  ;;  %3496 = vmatmul.mubr.msk.bf16.gmra.mxu0 %vm851_vm2, %v804_v62  ;;  %v664_v32 = vadd.f32 %v3754_v57, %v4250_v45  ;;  %v1662_v57 = vld [vmem:[%s6356_s4 + $0x40] sm:$0xff] }
 0x144   :  { %1100 = vmatprep.mubr.bf16.mxu1 %v6375_v1  ;;  %1433 = vmatprep.mubr.bf16.mxu0 %v6375_v1  ;;  %v655_v61 = vpop.f32.mrf.mxu0 }
 0x145   :  { %v656_v26 = vadd.f32 %v4250_v45, %v655_v61  ;;  %v778_v36 = vmax.f32 %v664_v32, 0.0  ;;  %v1654_v61 = vld [vmem:[%s6356_s4] sm:$0xff]  ;;  %v1656_v32 = vld [vmem:[%s6356_s4 + $0x10] sm:$0xff] }
 0x146   :  { %v4365_v62 = vpop.f32.mrf.mxu0 }
 0x147   :  { %v776_v29 = vmax.f32 %v656_v26, 0.0  ;;  %v677_v46 = vadd.f32 %v4365_v62, %v4250_v45 }
 0x148   :  { %v668_v2 = vpop.f32.mrf.mxu0 }
 0x149   :  { %v669_v39 = vadd.f32 %v4250_v45, %v668_v2  ;;  %v781_v50 = vmax.f32 %v677_v46, 0.0 }
 0x14a   :  { %v3758_v6 = vpop.f32.mrf.mxu0 }
 0x14b   :  { %3467 = vmatmul.mubr.msk.bf16.gmra.mxu1 %vm851_vm2, %v807_v23  ;;  %3497 = vmatmul.mubr.msk.bf16.gmra.mxu0 %vm851_vm2, %v805_v8  ;;  %v770_v8 = vmax.f32 %v632_v4, 0.0  ;;  %v779_v42 = vmax.f32 %v669_v39, 0.0  ;;  %v680_v47 = vadd.f32 %v3758_v6, %v4250_v45  ;;  %v1658_v4 = vld [vmem:[%s6356_s4 + $0x20] sm:$0xff] }
 0x14c   :  { %1110 = vmatprep.mubr.bf16.mxu1 %v6375_v1  ;;  %1443 = vmatprep.mubr.bf16.mxu0 %v6375_v1  ;;  %v671_v9 = vpop.f32.mrf.mxu0 }
 0x14d   :  { %v814_v10 = vpack.c.bf16 %v770_v8, %v769_v7  ;;  %v672_v40 = vadd.f32 %v4250_v45, %v671_v9  ;;  %v782_v51 = vmax.f32 %v680_v47, 0.0  ;;  %v1655_v9 = vld [vmem:[%s6356_s4 + $0x8] sm:$0xff] }
 0x14e   :  { %v4380_v13 = vpop.f32.mrf.mxu0 }
 0x14f   :  { %v693_v18 = vadd.f32 %v4380_v13, %v4250_v45 }
 0x150   :  { %v684_v16 = vpop.f32.mrf.mxu0 }
 0x151   :  { %v685_v54 = vadd.f32 %v4250_v45, %v684_v16 }
 0x152   :  { %v4389_v20 = vpop.f32.mrf.mxu0 }
 0x153   :  { %3468 = vmatmul.mubr.msk.bf16.gmra.mxu1 %vm851_vm2, %v808_v28  ;;  %3498 = vmatmul.mubr.msk.bf16.gmra.mxu0 %vm851_vm2, %v806_v14  ;;  %v771_v14 = vmax.f32 %v637_v11, 0.0  ;;  %v783_v62 = vmax.f32 %v685_v54, 0.0 }
 0x154   :  { %1120 = vmatprep.mubr.bf16.mxu1 %v6375_v1  ;;  %1453 = vmatprep.mubr.bf16.mxu0 %v6375_v1 }
 0x155   :  { %v815_v19 = vpack.c.bf16 %v772_v15, %v771_v14  ;;  %v1711_v15 = vld [vmem:[%s6356_s4 + $0x1c8] sm:$0xff] }
 0x15b   :  { %3469 = vmatmul.mubr.msk.bf16.gmra.mxu1 %vm851_vm2, %v809_v38  ;;  %3499 = vmatmul.mubr.msk.bf16.gmra.mxu0 %vm851_vm2, %v807_v23  ;;  %v687_v23 = vpop.f32.mrf.mxu0 }
 0x15c   :  { %1130 = vmatprep.mubr.bf16.mxu1 %v6375_v1  ;;  %1463 = vmatprep.mubr.bf16.mxu0 %v6375_v1  ;;  %v688_v55 = vadd.f32 %v4250_v45, %v687_v23 }
 0x15d   :  { %v4397_v27 = vpop.f32.mrf.mxu0 }
 0x15e   :  { %v784_v63 = vmax.f32 %v688_v55, 0.0 }
 0x15f   :  { %v4401_v30 = vpop.f32.mrf.mxu0 }
 0x160   :  { %v4486_v21 = vpack.c.bf16 %v784_v63, %v783_v62 }
 0x161   :  { %v4408_v34 = vpop.f32.mrf.mxu0 }
 0x163   :  { %3470 = vmatmul.mubr.msk.bf16.gmra.mxu1 %vm851_vm2, %v810_v43  ;;  %3500 = vmatmul.mubr.msk.bf16.gmra.mxu0 %vm851_vm2, %v808_v28  ;;  %v775_v28 = vmax.f32 %v653_v25, 0.0  ;;  %v4412_v37 = vpop.f32.mrf.mxu0 }
 0x164   :  { %1140 = vmatprep.mubr.bf16.mxu1 %v6375_v1  ;;  %1473 = vmatprep.mubr.bf16.mxu0 %v6375_v1 }
 0x165   :  { %v817_v33 = vpack.c.bf16 %v776_v29, %v775_v28  ;;  %v4418_v41 = vpop.f32.mrf.mxu0  ;;  %v785_v29 = vmax.f32 %v693_v18, 0.0 }
 0x167   :  { %v4422_v44 = vpop.f32.mrf.mxu0 }
 0x169   :  { %v4429_v49 = vpop.f32.mrf.mxu0 }
 0x16b   :  { %3471 = vmatmul.mubr.msk.bf16.gmra.mxu1 %vm851_vm2, %v811_v53  ;;  %3501 = vmatmul.mubr.msk.bf16.gmra.mxu0 %vm851_vm2, %v809_v38  ;;  %v818_v38 = vpack.c.bf16 %v778_v36, %v777_v35  ;;  %v4433_v52 = vpop.f32.mrf.mxu0  ;;  %v1660_v36 = vld [vmem:[%s6356_s4 + $0x30] sm:$0xff] }
 0x16c   :  { %1150 = vmatprep.mubr.bf16.mxu1 %v6375_v1  ;;  %1483 = vmatprep.mubr.bf16.mxu0 %v6375_v1 }
 0x173   :  { %3472 = vmatmul.mubr.msk.bf16.gmra.mxu1 %vm851_vm2, %v812_v58  ;;  %3502 = vmatmul.mubr.msk.bf16.gmra.mxu0 %vm851_vm2, %v810_v43  ;;  %v780_v43 = vmax.f32 %v672_v40, 0.0 }
 0x174   :  { %1160 = vmatprep.mubr.bf16.mxu1 %v6375_v1  ;;  %1493 = vmatprep.mubr.bf16.mxu0 %v6375_v1 }
 0x175   :  { %v819_v48 = vpack.c.bf16 %v780_v43, %v779_v42  ;;  %v1661_v42 = vld [vmem:[%s6356_s4 + $0x38] sm:$0xff] }
 0x17b   :  { %3473 = vmatmul.mubr.msk.bf16.gmra.mxu1 %vm851_vm2, %v813_v5  ;;  %3503 = vmatmul.mubr.msk.bf16.gmra.mxu0 %vm851_vm2, %v811_v53  ;;  %v4435_v53 = vpack.c.bf16 %v782_v51, %v781_v50  ;;  %v704_v50 = vadd.f32 %v4250_v45, %v4412_v37 }
 0x17c   :  { %1170 = vmatprep.mubr.bf16.mxu1 %v6375_v1  ;;  %1503 = vmatprep.mubr.bf16.mxu0 %v6375_v1 }
 0x183   :  { %3474 = vmatmul.mubr.msk.bf16.gmra.mxu1 %vm851_vm2, %v814_v10  ;;  %3504 = vmatmul.mubr.msk.bf16.gmra.mxu0 %vm851_vm2, %v812_v58 }
 0x184   :  { %1180 = vmatprep.mubr.bf16.mxu1 %v6375_v1  ;;  %1513 = vmatprep.mubr.bf16.mxu0 %v6375_v1 }
 0x18b   :  { %3475 = vmatmul.mubr.msk.bf16.gmra.mxu1 %vm851_vm2, %v815_v19  ;;  %3505 = vmatmul.mubr.msk.bf16.gmra.mxu0 %vm851_vm2, %v813_v5  ;;  %v1667_v5 = vld [vmem:[%s6356_s4 + $0x68] sm:$0xff] }
 0x18c   :  { %1190 = vmatprep.mubr.bf16.mxu1 %v6375_v1  ;;  %1523 = vmatprep.mubr.bf16.mxu0 %v6375_v1 }
 0x193   :  { %3476 = vmatmul.mubr.msk.bf16.gmra.mxu1 %vm851_vm2, %v816_v24  ;;  %3506 = vmatmul.mubr.msk.bf16.gmra.mxu0 %vm851_vm2, %v814_v10 }
 0x194   :  { %1200 = vmatprep.mubr.bf16.mxu1 %v6375_v1  ;;  %1533 = vmatprep.mubr.bf16.mxu0 %v6375_v1 }
 0x19b   :  { %3477 = vmatmul.mubr.msk.bf16.gmra.mxu1 %vm851_vm2, %v817_v33  ;;  %3507 = vmatmul.mubr.msk.bf16.gmra.mxu0 %vm851_vm2, %v815_v19  ;;  %v696_v19 = vadd.f32 %v4389_v20, %v4250_v45  ;;  %v1707_v20 = vld [vmem:[%s6356_s4 + $0x1a8] sm:$0xff] }
 0x19c   :  { %1210 = vmatprep.mubr.bf16.mxu1 %v6375_v1  ;;  %1543 = vmatprep.mubr.bf16.mxu0 %v6375_v1 }
 0x19d   :  { %v786_v31 = vmax.f32 %v696_v19, 0.0 }
 0x19f   :  { %v4525_v47 = vpack.c.bf16 %v786_v31, %v785_v29 }
 0x1a3   :  { %3478 = vmatmul.mubr.msk.bf16.gmra.mxu1 %vm851_vm2, %v818_v38  ;;  %3508 = vmatmul.mubr.msk.bf16.gmra.mxu0 %vm851_vm2, %v816_v24 }
 0x1a4   :  { %1220 = vmatprep.mubr.bf16.mxu1 %v6375_v1  ;;  %1553 = vmatprep.mubr.bf16.mxu0 %v6375_v1 }
 0x1ab   :  { %3479 = vmatmul.mubr.msk.bf16.gmra.mxu1 %vm851_vm2, %v819_v48  ;;  %3509 = vmatmul.mubr.msk.bf16.gmra.mxu0 %vm851_vm2, %v817_v33 }
 0x1ac   :  { %1230 = vmatprep.mubr.bf16.mxu1 %v6375_v1  ;;  %1563 = vmatprep.mubr.bf16.mxu0 %v6375_v1 }
 0x1b1   :  { %v992_v56 = vpop.f32.mrf.mxu1 }
 0x1b2   :  { %v4462_v6 = vmul.f32 %v1662_v57, %v992_v56 }
 0x1b3   :  { %v982_v58 = vpop.f32.mrf.mxu0  ;;  %v994_v59 = vpop.f32.mrf.mxu1  ;;  %3480 = vmatmul.mubr.msk.bf16.gmra.mxu1 %vm851_vm2, %v4435_v53  ;;  %3510 = vmatmul.mubr.msk.bf16.gmra.mxu0 %vm851_vm2, %v818_v38  ;;  %v1657_v38 = vld [vmem:[%s6356_s4 + $0x18] sm:$0xff] }
 0x1b4   :  { %1240 = vmatprep.mubr.bf16.mxu1 %v6375_v1  ;;  %1573 = vmatprep.mubr.bf16.mxu0 %v6375_v1  ;;  %v4466_v8 = vmul.f32 %v1654_v61, %v982_v58  ;;  %v4474_v14 = vmul.f32 %v1663_v0, %v994_v59  ;;  %v1664_v61 = vld [vmem:[%s6356_s4 + $0x50] sm:$0xff] }
 0x1b5   :  { %v984_v2 = vpop.f32.mrf.mxu0  ;;  %v996_v3 = vpop.f32.mrf.mxu1  ;;  %v1668_v0 = vld [vmem:[%s6356_s4 + $0x70] sm:$0xff] }
 0x1b6   :  { %v4464_v7 = vmul.f32 %v1666_v60, %v996_v3  ;;  %v4488_v23 = vmul.f32 %v1655_v9, %v984_v2  ;;  %v788_v60 = vmax.f32 %v704_v50, 0.0 }
 0x1b7   :  { %v986_v10 = vpop.f32.mrf.mxu0  ;;  %v998_v11 = vpop.f32.mrf.mxu1 }
 0x1b8   :  { %v4478_v16 = vmul.f32 %v1658_v4, %v986_v10  ;;  %v4480_v17 = vmul.f32 %v1667_v5, %v998_v11  ;;  %v1669_v4 = vld [vmem:[%s6356_s4 + $0x78] sm:$0xff]  ;;  %v709_v10 = vadd.f32 %v4397_v27, %v4250_v45  ;;  %v712_v11 = vadd.f32 %v4408_v34, %v4250_v45 }
 0x1b9   :  { %v988_v22 = vpop.f32.mrf.mxu0 }
 0x1ba   :  { %v4494_v26 = vmul.f32 %v1659_v12, %v988_v22 }
 0x1bb   :  { %v4496_v28 = vpop.f32.mrf.mxu1  ;;  %3481 = vmatmul.mubr.msk.bf16.gmra.mxu1 %vm851_vm2, %v4486_v21  ;;  %v1335_v13 = vpop.f32.mrf.mxu0  ;;  %3511 = vmatmul.mubr.msk.bf16.gmra.mxu0 %vm851_vm2, %v819_v48  ;;  %v701_v48 = vadd.f32 %v4250_v45, %v4401_v30 }
 0x1bc   :  { %1250 = vmatprep.mubr.bf16.mxu1 %v6375_v1  ;;  %1583 = vmatprep.mubr.bf16.mxu0 %v6375_v1  ;;  %v4521_v43 = vmul.f32 %v1656_v32, %v1335_v13  ;;  %v789_v32 = vmax.f32 %v709_v10, 0.0 }
 0x1bd   :  { %v4508_v33 = vpop.f32.mrf.mxu1  ;;  %v1337_v35 = vpop.f32.mrf.mxu0  ;;  %v787_v37 = vmax.f32 %v701_v48, 0.0 }
 0x1be   :  { %6464 = vst [vmem:[#allocation8_spill] sm:$0xff] %v4521_v43  ;;  %v4533_v55 = vmul.f32 %v1657_v38, %v1337_v35  ;;  %v790_v35 = vmax.f32 %v712_v11, 0.0  ;;  %v1715_v43 = vld [vmem:[%s6356_s4 + $0x1e8] sm:$0xff] }
 0x1bf   :  { %v4516_v39 = vpop.f32.mrf.mxu1  ;;  %v1339_v40 = vpop.f32.mrf.mxu0  ;;  %v4573_v12 = vpack.c.bf16 %v788_v60, %v787_v37 }
 0x1c0   :  { %v4523_v46 = vmul.f32 %v1660_v36, %v1339_v40  ;;  %6466 = vst [vmem:[#allocation10_spill] sm:$0xff] %v4533_v55  ;;  %v1672_v36 = vld [vmem:[%s6356_s4 + $0x90] sm:$0xff]  ;;  %v824_v60 = vpack.c.bf16 %v790_v35, %v789_v32 }
 0x1c1   :  { %v4531_v51 = vpop.f32.mrf.mxu1  ;;  %v1341_v54 = vpop.f32.mrf.mxu0  ;;  %v1680_v32 = vld [vmem:[%s6356_s4 + $0xd0] sm:$0xff] }
 0x1c2   :  { %6465 = vst [vmem:[#allocation9_spill] sm:$0xff] %v4523_v46  ;;  %v4537_v57 = vmul.f32 %v1661_v42, %v1341_v54  ;;  %v1676_v42 = vld [vmem:[%s6356_s4 + $0xb0] sm:$0xff]  ;;  %v1677_v54 = vld [vmem:[%s6356_s4 + $0xb8] sm:$0xff]  ;;  %v1710_v46 = vld [vmem:[%s6356_s4 + $0x1c0] sm:$0xff] }
 0x1c3   :  { %v4539_v58 = vpop.f32.mrf.mxu1  ;;  %3482 = vmatmul.mubr.msk.bf16.gmra.mxu1 %vm851_vm2, %v4525_v47  ;;  %v1345_v59 = vpop.f32.mrf.mxu0  ;;  %3512 = vmatmul.mubr.msk.bf16.gmra.mxu0 %vm851_vm2, %v4435_v53  ;;  %v1665_v53 = vld [vmem:[%s6356_s4 + $0x58] sm:$0xff] }
 0x1c4   :  { %6467 = vst [vmem:[#allocation11_spill] sm:$0xff] %v4537_v57  ;;  %1260 = vmatprep.mubr.bf16.mxu1 %v6375_v1  ;;  %1593 = vmatprep.mubr.bf16.mxu0 %v6375_v1  ;;  %v4565_v5 = vmul.f32 %v1664_v61, %v1345_v59  ;;  %v717_v61 = vadd.f32 %v4250_v45, %v4422_v44 }
 0x1c5   :  { %v4551_v62 = vpop.f32.mrf.mxu1  ;;  %v1347_v63 = vpop.f32.mrf.mxu0 }
 0x1c6   :  { %6468 = vst [vmem:[#allocation12_spill] sm:$0xff] %v4565_v5  ;;  %v4577_v22 = vmul.f32 %v1665_v53, %v1347_v63  ;;  %v720_v63 = vadd.f32 %v4250_v45, %v4433_v52  ;;  %v791_v52 = vmax.f32 %v717_v61, 0.0 }
 0x1c7   :  { %v4560_v2 = vpop.f32.mrf.mxu1  ;;  %v1349_v3 = vpop.f32.mrf.mxu0 }
 0x1c8   :  { %v4567_v9 = vmul.f32 %v1668_v0, %v1349_v3  ;;  %6470 = vst [vmem:[#allocation14_spill] sm:$0xff] %v4577_v22 }
 0x1c9   :  { %v4575_v18 = vpop.f32.mrf.mxu1  ;;  %v1351_v19 = vpop.f32.mrf.mxu0 }
 0x1ca   :  { %6469 = vst [vmem:[#allocation13_spill] sm:$0xff] %v4567_v9  ;;  %v4581_v29 = vmul.f32 %v1669_v4, %v1351_v19  ;;  %v1703_v9 = vld [vmem:[%s6356_s4 + $0x188] sm:$0xff] }
 0x1cb   :  { %v4583_v31 = vpop.f32.mrf.mxu1  ;;  %3483 = vmatmul.mubr.msk.bf16.gmra.mxu1 %vm851_vm2, %v4573_v12  ;;  %v1355_v27 = vpop.f32.mrf.mxu0  ;;  %3513 = vmatmul.mubr.msk.bf16.gmra.mxu0 %vm851_vm2, %v4486_v21  ;;  %v1673_v21 = vld [vmem:[%s6356_s4 + $0x98] sm:$0xff] }
 0x1cc   :  { %6471 = vst [vmem:[#allocation15_spill] sm:$0xff] %v4581_v29  ;;  %1270 = vmatprep.mubr.bf16.mxu1 %v6375_v1  ;;  %1603 = vmatprep.mubr.bf16.mxu0 %v6375_v1  ;;  %v4609_v59 = vmul.f32 %v1672_v36, %v1355_v27  ;;  %v792_v27 = vmax.f32 %v720_v63, 0.0  ;;  %v725_v63 = vadd.f32 %v4418_v41, %v4250_v45 }
 0x1cd   :  { %v4595_v38 = vpop.f32.mrf.mxu1  ;;  %v1357_v40 = vpop.f32.mrf.mxu0 }
 0x1ce   :  { %6472 = vst [vmem:[#allocation16_spill] sm:$0xff] %v4609_v59  ;;  %v4619_v3 = vmul.f32 %v1673_v21, %v1357_v40  ;;  %v1684_v40 = vld [vmem:[%s6356_s4 + $0xf0] sm:$0xff]  ;;  %v4658_v56 = vpack.c.bf16 %v792_v27, %v791_v52 }
 0x1cf   :  { %v4604_v48 = vpop.f32.mrf.mxu1  ;;  %v1359_v50 = vpop.f32.mrf.mxu0 }
 0x1d0   :  { %v4611_v37 = vmul.f32 %v1676_v42, %v1359_v50  ;;  %6474 = vst [vmem:[#allocation18_spill] sm:$0xff] %v4619_v3  ;;  %v1685_v50 = vld [vmem:[%s6356_s4 + $0xf8] sm:$0xff] }
 0x1d1   :  { %v4617_v0 = vpop.f32.mrf.mxu1  ;;  %v1361_v53 = vpop.f32.mrf.mxu0 }
 0x1d2   :  { %6473 = vst [vmem:[#allocation17_spill] sm:$0xff] %v4611_v37  ;;  %v4623_v10 = vmul.f32 %v1677_v54, %v1361_v53  ;;  %v728_v53 = vadd.f32 %v4429_v49, %v4250_v45  ;;  %v793_v49 = vmax.f32 %v725_v63, 0.0  ;;  %v3519_v37 = vld.sshfl [vmem:[%s6357_s5] sm:$0x33 pattern:$0x75316420] }
 0x1d3   :  { %v4625_v11 = vpop.f32.mrf.mxu1  ;;  %3484 = vmatmul.mubr.msk.bf16.gmra.mxu1 %vm851_vm2, %v824_v60  ;;  %v1365_v19 = vpop.f32.mrf.mxu0  ;;  %3514 = vmatmul.mubr.msk.bf16.gmra.mxu0 %vm851_vm2, %v4525_v47  ;;  %v1681_v47 = vld [vmem:[%s6356_s4 + $0xd8] sm:$0xff] }
 0x1d4   :  { %6475 = vst [vmem:[#allocation19_spill] sm:$0xff] %v4623_v10  ;;  %1280 = vmatprep.mubr.bf16.mxu1 %v6375_v1  ;;  %1613 = vmatprep.mubr.bf16.mxu0 %v6375_v1  ;;  %v4650_v54 = vmul.f32 %v1680_v32, %v1365_v19  ;;  %v794_v52 = vmax.f32 %v728_v53, 0.0  ;;  %v2303_v10 = vcombine.high %v3519_v37, %v3519_v37 }
 0x1d5   :  { %v4636_v35 = vpop.f32.mrf.mxu1  ;;  %v1367_v36 = vpop.f32.mrf.mxu0 }
 0x1d6   :  { %6476 = vst [vmem:[#allocation20_spill] sm:$0xff] %v4650_v54  ;;  %v4662_v34 = vmul.f32 %v1681_v47, %v1367_v36  ;;  %v4690_v63 = vpack.c.bf16 %v794_v52, %v793_v49 }
 0x1d7   :  { %v4645_v42 = vpop.f32.mrf.mxu1  ;;  %v1369_v21 = vpop.f32.mrf.mxu0 }
 0x1d8   :  { %v4652_v61 = vmul.f32 %v1684_v40, %v1369_v21  ;;  %6478 = vst [vmem:[#allocation22_spill] sm:$0xff] %v4662_v34  ;;  %v1692_v40 = vld [vmem:[%s6356_s4 + $0x130] sm:$0xff] }
 0x1d9   :  { %v4660_v30 = vpop.f32.mrf.mxu1  ;;  %v1371_v13 = vpop.f32.mrf.mxu0 }
 0x1da   :  { %6477 = vst [vmem:[#allocation21_spill] sm:$0xff] %v4652_v61  ;;  %v4666_v19 = vmul.f32 %v1685_v50, %v1371_v13  ;;  %v1688_v13 = vld [vmem:[%s6356_s4 + $0x110] sm:$0xff] }
 0x1db   :  { %v4668_v32 = vpop.f32.mrf.mxu1  ;;  %3485 = vmatmul.mubr.msk.bf16.gmra.mxu1 %vm851_vm2, %v4658_v56  ;;  %v1375_v41 = vpop.f32.mrf.mxu0  ;;  %3515 = vmatmul.mubr.msk.bf16.gmra.mxu0 %vm851_vm2, %v4573_v12 }
 0x1dc   :  { %6479 = vst [vmem:[#allocation23_spill] sm:$0xff] %v4666_v19  ;;  %1290 = vmatprep.mubr.bf16.mxu1 %v6375_v1  ;;  %1623 = vmatprep.mubr.bf16.mxu0 %v6375_v1  ;;  %v4686_v21 = vmul.f32 %v1688_v13, %v1375_v41  ;;  %v1696_v41 = vld [vmem:[%s6356_s4 + $0x150] sm:$0xff]  ;;  %v1767_v19 = vld [vmem:[%s6356_s4 + $0x388] sm:$0xff] }
 0x1dd   :  { %v1044_v27 = vpop.f32.mrf.mxu1  ;;  %v4680_v36 = vpop.f32.mrf.mxu0  ;;  %v1700_v13 = vld [vmem:[%s6356_s4 + $0x170] sm:$0xff] }
 0x1de   :  { %6480 = vst [vmem:[#allocation24_spill] sm:$0xff] %v4680_v36  ;;  %6481 = vst [vmem:[#allocation25_spill] sm:$0xff] %v4686_v21 }
 0x1df   :  { %v1046_v12 = vpop.f32.mrf.mxu1  ;;  %v1379_v47 = vpop.f32.mrf.mxu0 }
 0x1e0   :  { %v4688_v50 = vmul.f32 %v1692_v40, %v1379_v47  ;;  %v1714_v40 = vld [vmem:[%s6356_s4 + $0x1e0] sm:$0xff]  ;;  %v3983_v47 = vmov 1966171168  }
 0x1e1   :  { %v1048_v53 = vpop.f32.mrf.mxu1  ;;  %v4692_v44 = vpop.f32.mrf.mxu0  ;;  %v2305_v4 = vunpack.c.l.s4 %v3983_v47 }
 0x1e2   :  { %6482 = vst [vmem:[#allocation26_spill] sm:$0xff] %v4688_v50  ;;  %6483 = vst [vmem:[#allocation27_spill] sm:$0xff] %v4692_v44  ;;  %v1835_v44 = vld [vmem:[%s6356_s4 + $0x5a8] sm:$0xff] }
 0x1e3   :  { %v1052_v45 = vpop.f32.mrf.mxu1  ;;  %3486 = vmatmul.mubr.msk.bf16.gmra.mxu1 %vm851_vm2, %v4690_v63  ;;  %v1385_v24 = vpop.f32.mrf.mxu0  ;;  %3516 = vmatmul.mubr.msk.bf16.gmra.mxu0 %vm851_vm2, %v824_v60  ;;  %v2307_v60 = vlaneseq  ;;  %v2306_v57 = vunpack.c.0.s8 %v2305_v4 }
 0x1e4   :  { %1633 = vmatprep.mubr.bf16.mxu0 %v6375_v1  ;;  %v4723_v47 = vmul.f32 %v1696_v41, %v1385_v24  ;;  %v1963_v24 = vmul.f32 %v1707_v20, %v1048_v53  ;;  %v1702_v20 = vld [vmem:[%s6356_s4 + $0x180] sm:$0xff] }
 0x1e5   :  { %v1054_v49 = vpop.f32.mrf.mxu1  ;;  %v4703_v52 = vpop.f32.mrf.mxu0  ;;  %v4727_v5 = vshrl.u32 %v2307_v60, 7  ;;  %v1958_v61 = vmul.f32 %v1702_v20, %v4668_v32 }
 0x1e6   :  { %6484 = vst [vmem:[#allocation28_spill] sm:$0xff] %v4703_v52  ;;  %6485 = vst [vmem:[#allocation29_spill] sm:$0xff] %v4723_v47  ;;  %v1967_v4 = vmul.f32 %v1711_v15, %v1054_v49  ;;  %v1695_v15 = vld [vmem:[%s6356_s4 + $0x148] sm:$0xff] }
 0x1e7   :  { %v1056_v25 = vpop.f32.mrf.mxu1  ;;  %v1389_v1 = vpop.f32.mrf.mxu0  ;;  %6487 = vst [vmem:[#allocation31_spill] sm:$0xff] %v4727_v5  ;;  %v2309_v54 = vsub.s32 %v2306_v57, %v4727_v5  ;;  %v1704_v57 = vld [vmem:[%s6356_s4 + $0x190] sm:$0xff]  ;;  %v1951_v5 = vmul.f32 %v1695_v15, %v4636_v35  ;;  %v1687_v35 = vld [vmem:[%s6356_s4 + $0x108] sm:$0xff] }
 0x1e8   :  { %v4725_v55 = vmul.f32 %v1700_v13, %v1389_v1  ;;  %v1970_v22 = vmul.f32 %v1714_v40, %v1056_v25  ;;  %v1706_v1 = vld [vmem:[%s6356_s4 + $0x1a0] sm:$0xff]  ;;  %v1699_v25 = vld [vmem:[%s6356_s4 + $0x168] sm:$0xff]  ;;  %v1966_v40 = vmul.f32 %v1710_v46, %v1052_v45  ;;  %v6489_v45 = vmov 0  }
 0x1e9   :  { %v1058_v29 = vpop.f32.mrf.mxu1  ;;  %v4732_v59 = vpop.f32.mrf.mxu0  ;;  %v1718_v46 = vld [vmem:[%s6356_s4 + $0x200] sm:$0xff] }
 0x1ea   :  { %6486 = vst [vmem:[#allocation30_spill] sm:$0xff] %v4725_v55  ;;  %6488 = vst [vmem:[#allocation32_spill] sm:$0xff] %v4732_v59  ;;  %v1971_v13 = vmul.f32 %v1715_v43, %v1058_v29  ;;  %v1959_v43 = vmul.f32 %v1703_v9, %v1044_v27  ;;  %v2194_v53 = vpack.c.bf16 %v1970_v22, %v1966_v40  ;;  %v1722_v9 = vld [vmem:[%s6356_s4 + $0x220] sm:$0xff]  ;;  %v1708_v27 = vld [vmem:[%s6356_s4 + $0x1b0] sm:$0xff] }
 0x1eb   :  { %v1062_v60 = vpop.f32.mrf.mxu1  ;;  %v1395_v3 = vpop.f32.mrf.mxu0  ;;  %3517 = vmatmul.mubr.msk.bf16.gmra.mxu0 %vm851_vm2, %v4658_v56  ;;  %v1962_v56 = vmul.f32 %v1706_v1, %v1046_v12  ;;  %v4773_v12 = vrot.slane %v2303_v10, %v2309_v54  ;;  %v1698_v22 = vld [vmem:[%s6356_s4 + $0x160] sm:$0xff]  ;;  %v1955_v1 = vmul.f32 %v1699_v25, %v4660_v30  ;;  %v1691_v40 = vld [vmem:[%s6356_s4 + $0x128] sm:$0xff] }
 0x1ec   :  { %v2195_v29 = vpack.c.bf16 %v1971_v13, %v1967_v4  ;;  %1643 = vmatprep.mubr.bf16.mxu0 %v6489_v45  ;;  %v4771_v4 = vrot.slane %v3519_v37, %v2309_v54  ;;  %v2191_v13 = vpack.c.bf16 %v1963_v24, %v1959_v43  ;;  %v1694_v10 = vld [vmem:[%s6356_s4 + $0x140] sm:$0xff]  ;;  %v4788_v30 = vmul.f32 %v1718_v46, %v1062_v60 }
 0x1ed   :  { %v4761_v49 = vpop.f32.mrf.mxu1  ;;  %v4763_v41 = vpop.f32.mrf.mxu0  ;;  %6492 = vst [vmem:[#allocation35_spill] sm:$0xff] %v4773_v12  ;;  %2356 = vmatprep.mubr.bf16.mxu1 %v4773_v12  ;;  %v4790_v54 = vmul.f32 %v1704_v57, %v1395_v3  ;;  %v1954_v32 = vmul.f32 %v1698_v22, %v4645_v42  ;;  %v2190_v15 = vpack.c.bf16 %v1962_v56, %v1958_v61  ;;  %v1683_v3 = vld [vmem:[%s6356_s4 + $0xe8] sm:$0xff]  ;;  %v1690_v60 = vld [vmem:[%s6356_s4 + $0x120] sm:$0xff]  ;;  %v1712_v22 = vld [vmem:[%s6356_s4 + $0x1d0] sm:$0xff] }
 0x1ee   :  { %6490 = vst [vmem:[#allocation33_spill] sm:$0xff] %v4763_v41  ;;  %6491 = vst [vmem:[#allocation34_spill] sm:$0xff] %v4771_v4  ;;  %2324 = vmatprep.subr.bf16.mxu1 %v2195_v29  ;;  %v1947_v29 = vmul.f32 %v1691_v40, %v4617_v0  ;;  %v2187_v46 = vpack.c.bf16 %v1955_v1, %v1951_v5  ;;  %v1950_v61 = vmul.f32 %v1694_v10, %v4625_v11  ;;  %v1679_v57 = vld [vmem:[%s6356_s4 + $0xc8] sm:$0xff]  ;;  %v1686_v5 = vld [vmem:[%s6356_s4 + $0x100] sm:$0xff] }
 0x1ef   :  { %v1066_v37 = vpop.f32.mrf.mxu1  ;;  %v1399_v45 = vpop.f32.mrf.mxu0  ;;  %2325 = vmatpush1.bf16.msra.mxu1 %v2194_v53  ;;  %6493 = vst [vmem:[#allocation36_spill] sm:$0xff] %v4790_v54  ;;  %v1943_v0 = vmul.f32 %v1687_v35, %v4595_v38  ;;  %v1726_v11 = vld [vmem:[%s6356_s4 + $0x240] sm:$0xff]  ;;  %v1716_v40 = vld [vmem:[%s6356_s4 + $0x1f0] sm:$0xff]  ;;  %v1935_v10 = vmul.f32 %v1679_v57, %v4551_v62  ;;  %v1942_v35 = vmul.f32 %v1686_v5, %v4583_v31  ;;  %v1671_v57 = vld [vmem:[%s6356_s4 + $0x88] sm:$0xff] }
 0x1f0   :  { %v4792_v24 = vmul.f32 %v1722_v9, %v1066_v37  ;;  %v4794_v25 = vmul.f32 %v1708_v27, %v1399_v45  ;;  %2326 = vmatprep.subr.bf16.mxu1 %v2191_v13  ;;  %v1939_v9 = vmul.f32 %v1683_v3, %v4575_v18  ;;  %v2186_v27 = vpack.c.bf16 %v1954_v32, %v1950_v61  ;;  %v1730_v38 = vld [vmem:[%s6356_s4 + $0x260] sm:$0xff]  ;;  %v1675_v18 = vld [vmem:[%s6356_s4 + $0xa8] sm:$0xff]  ;;  %v1713_v32 = vld [vmem:[%s6356_s4 + $0x1d8] sm:$0xff] }
 0x1f1   :  { %v4800_v20 = vpop.f32.mrf.mxu1  ;;  %v4802_v43 = vpop.f32.mrf.mxu0  ;;  %v2183_v37 = vpack.c.bf16 %v1947_v29, %v1943_v0  ;;  %v1931_v5 = vmul.f32 %v1675_v18, %v4531_v51  ;;  %v1763_v54 = vld [vmem:[%s6356_s4 + $0x368] sm:$0xff]  ;;  %v1838_v59 = vld [vmem:[%s6356_s4 + $0x5c0] sm:$0xff] }
 0x1f2   :  { %6494 = vst [vmem:[#allocation37_spill] sm:$0xff] %v4794_v25  ;;  %6495 = vst [vmem:[#allocation38_spill] sm:$0xff] %v4802_v43  ;;  %v1834_v43 = vld [vmem:[%s6356_s4 + $0x5a0] sm:$0xff] }
 0x1f3   :  { %v1072_v56 = vpop.f32.mrf.mxu1  ;;  %v1405_v53 = vpop.f32.mrf.mxu0  ;;  %3518 = vmatmul.mubr.msk.bf16.gmra.mxu0 %vm851_vm2, %v4690_v63  ;;  %2327 = vmatpush1.bf16.msra.mxu1 %v2190_v15  ;;  %v1946_v63 = vmul.f32 %v1690_v60, %v4604_v48  ;;  %v1682_v48 = vld [vmem:[%s6356_s4 + $0xe0] sm:$0xff]  ;;  %v1717_v60 = vld [vmem:[%s6356_s4 + $0x1f8] sm:$0xff] }
 0x1f4   :  { %2328 = vmatprep.subr.bf16.mxu1 %v2187_v46  ;;  %v1678_v46 = vld [vmem:[%s6356_s4 + $0xc0] sm:$0xff]  ;;  %v4858_v29 = vmul.f32 %v1726_v11, %v1072_v56  ;;  %v4860_v62 = vmul.f32 %v1712_v22, %v1405_v53  ;;  %v1938_v0 = vmul.f32 %v1682_v48, %v4560_v2 }
 0x1f5   :  { %v4833_v1 = vpop.f32.mrf.mxu1  ;;  %v1407_v13 = vpop.f32.mrf.mxu0  ;;  %v2182_v42 = vpack.c.bf16 %v1946_v63, %v1942_v35  ;;  %v1674_v53 = vld [vmem:[%s6356_s4 + $0xa0] sm:$0xff]  ;;  %v1934_v2 = vmul.f32 %v1678_v46, %v4539_v58  ;;  %v1720_v58 = vld [vmem:[%s6356_s4 + $0x210] sm:$0xff] }
 0x1f6   :  { %6496 = vst [vmem:[#allocation39_spill] sm:$0xff] %v4860_v62  ;;  %v4876_v11 = vmul.f32 %v1713_v32, %v1407_v13  ;;  %v1927_v13 = vmul.f32 %v1671_v57, %v4508_v33  ;;  %v1930_v48 = vmul.f32 %v1674_v53, %v4516_v39  ;;  %v1724_v35 = vld [vmem:[%s6356_s4 + $0x230] sm:$0xff] }
 0x1f7   :  { %v1076_v15 = vpop.f32.mrf.mxu1  ;;  %v1409_v3 = vpop.f32.mrf.mxu0  ;;  %2329 = vmatpush1.bf16.msra.mxu1 %v2186_v27  ;;  %v2179_v27 = vpack.c.bf16 %v1939_v9, %v1935_v10 }
 0x1f8   :  { %v4862_v31 = vmul.f32 %v1730_v38, %v1076_v15  ;;  %v4864_v61 = vmul.f32 %v1716_v40, %v1409_v3  ;;  %2330 = vmatprep.subr.bf16.mxu1 %v2183_v37  ;;  %6498 = vst [vmem:[#allocation41_spill] sm:$0xff] %v4876_v11  ;;  %v1670_v40 = vld [vmem:[%s6356_s4 + $0x80] sm:$0xff]  ;;  %v2178_v37 = vpack.c.bf16 %v1938_v0, %v1934_v2  ;;  %v1721_v15 = vld [vmem:[%s6356_s4 + $0x218] sm:$0xff]  ;;  %v1831_v11 = vld [vmem:[%s6356_s4 + $0x588] sm:$0xff] }
 0x1f9   :  { %v4871_v45 = vpop.f32.mrf.mxu1  ;;  %v1411_v56 = vpop.f32.mrf.mxu0  ;;  %v2175_v32 = vpack.c.bf16 %v1931_v5, %v1927_v13  ;;  %v1926_v33 = vmul.f32 %v1670_v40, %v4496_v28  ;;  %v6504_v13 = vpack.c.bf16 %v4480_v17, %v4474_v14  ;;  %v6505_v14 = vpack.c.bf16 %v4464_v7, %v4462_v6  ;;  %v1733_v17 = vld [vmem:[%s6356_s4 + $0x278] sm:$0xff] }
 0x1fa   :  { %6497 = vst [vmem:[#allocation40_spill] sm:$0xff] %v4864_v61  ;;  %v4882_v51 = vmul.f32 %v1717_v60, %v1411_v56  ;;  %v1725_v60 = vld [vmem:[%s6356_s4 + $0x238] sm:$0xff]  ;;  %v1843_v61 = vld [vmem:[%s6356_s4 + $0x5e8] sm:$0xff] }
 0x1fb   :  { %v4885_v9 = vpop.f32.mrf.mxu1  ;;  %v1415_v63 = vpop.f32.mrf.mxu0  ;;  %2331 = vmatpush1.bf16.msra.mxu1 %v2182_v42  ;;  %v2174_v5 = vpack.c.bf16 %v1930_v48, %v1926_v33  ;;  %v1728_v48 = vld [vmem:[%s6356_s4 + $0x250] sm:$0xff] }
 0x1fc   :  { %6499 = vst [vmem:[#allocation42_spill] sm:$0xff] %v4882_v51  ;;  %2332 = vmatprep.subr.bf16.mxu1 %v2179_v27  ;;  %v4911_v46 = vmul.f32 %v1720_v58, %v1415_v63 }
 0x1fd   :  { %v4897_v10 = vpop.f32.mrf.mxu1  ;;  %v1417_v42 = vpop.f32.mrf.mxu0 }
 0x1fe   :  { %6500 = vst [vmem:[#allocation43_spill] sm:$0xff] %v4911_v46  ;;  %v4917_v27 = vmul.f32 %v1721_v15, %v1417_v42  ;;  %v1732_v42 = vld [vmem:[%s6356_s4 + $0x270] sm:$0xff] }
 0x1ff   :  { %v4906_v39 = vpop.f32.mrf.mxu1  ;;  %v1419_v3 = vpop.f32.mrf.mxu0  ;;  %2333 = vmatpush1.bf16.msra.mxu1 %v2178_v37 }
 0x200   :  { %v4913_v57 = vmul.f32 %v1724_v35, %v1419_v3  ;;  %2334 = vmatprep.subr.bf16.mxu1 %v2175_v32  ;;  %6502 = vst [vmem:[#allocation45_spill] sm:$0xff] %v4917_v27  ;;  %v1729_v35 = vld [vmem:[%s6356_s4 + $0x258] sm:$0xff] }
 0x201   :  { %v4915_v0 = vpop.f32.mrf.mxu1  ;;  %v1421_v28 = vpop.f32.mrf.mxu0 }
 0x202   :  { %6501 = vst [vmem:[#allocation44_spill] sm:$0xff] %v4913_v57  ;;  %v4921_v53 = vmul.f32 %v1725_v60, %v1421_v28  ;;  %v6508_v60 = vpack.c.bf16 %v4494_v26, %v4488_v23  ;;  %v1736_v26 = vld [vmem:[%s6356_s4 + $0x290] sm:$0xff] }
 0x203   :  { %v4923_v2 = vpop.f32.mrf.mxu1  ;;  %v1425_v40 = vpop.f32.mrf.mxu0  ;;  %2335 = vmatpush1.bf16.msra.mxu1 %v2174_v5 }
 0x204   :  { %6503 = vst [vmem:[#allocation46_spill] sm:$0xff] %v4921_v53  ;;  %2336 = vmatprep.subr.bf16.mxu1 %v6504_v13  ;;  %v4949_v15 = vmul.f32 %v1728_v48, %v1425_v40  ;;  %v6511_v48 = vpack.c.bf16 %v4478_v16, %v4466_v8 }
 0x205   :  { %v4933_v37 = vpop.f32.mrf.mxu1  ;;  %v1427_v58 = vpop.f32.mrf.mxu0 }
 0x206   :  { %6506 = vst [vmem:[#allocation47_spill] sm:$0xff] %v4949_v15  ;;  %v4958_v13 = vmul.f32 %v1729_v35, %v1427_v58  ;;  %v1740_v35 = vld [vmem:[%s6356_s4 + $0x2b0] sm:$0xff] }
 0x207   :  { %v4941_v32 = vpop.f32.mrf.mxu1  ;;  %v1429_v33 = vpop.f32.mrf.mxu0  ;;  %2337 = vmatpush1.bf16.msra.mxu1 %v6505_v14 }
 0x208   :  { %v4951_v3 = vmul.f32 %v1732_v42, %v1429_v33  ;;  %2338 = vmatprep.subr.bf16.mxu1 %v6508_v60  ;;  %6509 = vst [vmem:[#allocation49_spill] sm:$0xff] %v4958_v13  ;;  %v1737_v33 = vld [vmem:[%s6356_s4 + $0x298] sm:$0xff] }
 0x209   :  { %v4956_v5 = vpop.f32.mrf.mxu1  ;;  %v1431_v28 = vpop.f32.mrf.mxu0 }
 0x20a   :  { %6507 = vst [vmem:[#allocation48_spill] sm:$0xff] %v4951_v3  ;;  %v4962_v7 = vmul.f32 %v1733_v17, %v1431_v28  ;;  %v1741_v17 = vld [vmem:[%s6356_s4 + $0x2b8] sm:$0xff] }
 0x20b   :  { %v4964_v14 = vpop.f32.mrf.mxu1  ;;  %v1435_v40 = vpop.f32.mrf.mxu0  ;;  %2339 = vmatpush1.bf16.msra.mxu1 %v6511_v48 }
 0x20c   :  { %6510 = vst [vmem:[#allocation50_spill] sm:$0xff] %v4962_v7  ;;  %v4987_v60 = vmul.f32 %v1736_v26, %v1435_v40  ;;  %v1744_v40 = vld [vmem:[%s6356_s4 + $0x2d0] sm:$0xff] }
 0x20d   :  { %v4974_v58 = vpop.f32.mrf.mxu1  ;;  %v1437_v42 = vpop.f32.mrf.mxu0 }
 0x20e   :  { %6512 = vst [vmem:[#allocation51_spill] sm:$0xff] %v4987_v60  ;;  %v4993_v63 = vmul.f32 %v1737_v33, %v1437_v42  ;;  %v1748_v42 = vld [vmem:[%s6356_s4 + $0x2f0] sm:$0xff] }
 0x20f   :  { %v4982_v8 = vpop.f32.mrf.mxu1  ;;  %v1439_v16 = vpop.f32.mrf.mxu0 }
 0x210   :  { %v4989_v28 = vmul.f32 %v1740_v35, %v1439_v16  ;;  %6514 = vst [vmem:[#allocation53_spill] sm:$0xff] %v4993_v63 }
 0x211   :  { %v4991_v48 = vpop.f32.mrf.mxu1  ;;  %v1441_v56 = vpop.f32.mrf.mxu0 }
 0x212   :  { %6513 = vst [vmem:[#allocation52_spill] sm:$0xff] %v4989_v28  ;;  %v4997_v23 = vmul.f32 %v1741_v17, %v1441_v56  ;;  %v1745_v56 = vld [vmem:[%s6356_s4 + $0x2d8] sm:$0xff] }
 0x213   :  { %v4999_v38 = vpop.f32.mrf.mxu1  ;;  %v1445_v18 = vpop.f32.mrf.mxu0  ;;  %v1749_v17 = vld [vmem:[%s6356_s4 + $0x2f8] sm:$0xff] }
 0x214   :  { %6515 = vst [vmem:[#allocation54_spill] sm:$0xff] %v4997_v23  ;;  %v5019_v6 = vmul.f32 %v1744_v40, %v1445_v18  ;;  %v1752_v18 = vld [vmem:[%s6356_s4 + $0x310] sm:$0xff] }
 0x215   :  { %v5006_v26 = vpop.f32.mrf.mxu1  ;;  %v1447_v35 = vpop.f32.mrf.mxu0 }
 0x216   :  { %6516 = vst [vmem:[#allocation55_spill] sm:$0xff] %v5019_v6  ;;  %v5025_v27 = vmul.f32 %v1745_v56, %v1447_v35  ;;  %v1756_v35 = vld [vmem:[%s6356_s4 + $0x330] sm:$0xff] }
 0x217   :  { %v5014_v33 = vpop.f32.mrf.mxu1  ;;  %v1449_v16 = vpop.f32.mrf.mxu0 }
 0x218   :  { %v5021_v22 = vmul.f32 %v1748_v42, %v1449_v16  ;;  %6518 = vst [vmem:[#allocation57_spill] sm:$0xff] %v5025_v27 }
 0x219   :  { %v5023_v46 = vpop.f32.mrf.mxu1  ;;  %v1451_v57 = vpop.f32.mrf.mxu0 }
 0x21a   :  { %6517 = vst [vmem:[#allocation56_spill] sm:$0xff] %v5021_v22  ;;  %v5029_v15 = vmul.f32 %v1749_v17, %v1451_v57  ;;  %v1753_v57 = vld [vmem:[%s6356_s4 + $0x318] sm:$0xff] }
 0x21b   :  { %v5031_v3 = vpop.f32.mrf.mxu1  ;;  %v1455_v13 = vpop.f32.mrf.mxu0  ;;  %v1757_v17 = vld [vmem:[%s6356_s4 + $0x338] sm:$0xff] }
 0x21c   :  { %6519 = vst [vmem:[#allocation58_spill] sm:$0xff] %v5029_v15  ;;  %v5047_v53 = vmul.f32 %v1752_v18, %v1455_v13  ;;  %v1760_v13 = vld [vmem:[%s6356_s4 + $0x350] sm:$0xff] }
 0x21d   :  { %v1124_v40 = vpop.f32.mrf.mxu1  ;;  %v1457_v42 = vpop.f32.mrf.mxu0 }
 0x21e   :  { %6520 = vst [vmem:[#allocation59_spill] sm:$0xff] %v5047_v53  ;;  %v5051_v63 = vmul.f32 %v1753_v57, %v1457_v42  ;;  %v1764_v42 = vld [vmem:[%s6356_s4 + $0x370] sm:$0xff]  ;;  %v1775_v57 = vld [vmem:[%s6356_s4 + $0x3c8] sm:$0xff] }
 0x21f   :  { %v1126_v56 = vpop.f32.mrf.mxu1  ;;  %v1459_v16 = vpop.f32.mrf.mxu0  ;;  %v1779_v53 = vld [vmem:[%s6356_s4 + $0x3e8] sm:$0xff] }
 0x220   :  { %v5049_v7 = vmul.f32 %v1756_v35, %v1459_v16  ;;  %6522 = vst [vmem:[#allocation61_spill] sm:$0xff] %v5051_v63  ;;  %v1778_v16 = vld [vmem:[%s6356_s4 + $0x3e0] sm:$0xff] }
 0x221   :  { %v1128_v60 = vpop.f32.mrf.mxu1  ;;  %v1461_v28 = vpop.f32.mrf.mxu0  ;;  %v1774_v63 = vld [vmem:[%s6356_s4 + $0x3c0] sm:$0xff] }
 0x222   :  { %6521 = vst [vmem:[#allocation60_spill] sm:$0xff] %v5049_v7  ;;  %v5055_v6 = vmul.f32 %v1757_v17, %v1461_v28  ;;  %v1771_v28 = vld [vmem:[%s6356_s4 + $0x3a8] sm:$0xff]  ;;  %v1761_v17 = vld [vmem:[%s6356_s4 + $0x358] sm:$0xff] }
 0x223   :  { %v1132_v22 = vpop.f32.mrf.mxu1  ;;  %v1465_v27 = vpop.f32.mrf.mxu0  ;;  %v1765_v7 = vld [vmem:[%s6356_s4 + $0x378] sm:$0xff]  ;;  %v2027_v21 = vmul.f32 %v1771_v28, %v1128_v60  ;;  %v1759_v60 = vld [vmem:[%s6356_s4 + $0x348] sm:$0xff] }
 0x224   :  { %6523 = vst [vmem:[#allocation62_spill] sm:$0xff] %v5055_v6  ;;  %v5086_v6 = vmul.f32 %v1760_v13, %v1465_v27  ;;  %v1770_v27 = vld [vmem:[%s6356_s4 + $0x3a0] sm:$0xff] }
 0x225   :  { %v1134_v18 = vpop.f32.mrf.mxu1  ;;  %v1467_v35 = vpop.f32.mrf.mxu0 }
 0x226   :  { %6524 = vst [vmem:[#allocation63_spill] sm:$0xff] %v5086_v6  ;;  %v2031_v50 = vmul.f32 %v1775_v57, %v1134_v18  ;;  %v5099_v13 = vmul.f32 %v1761_v17, %v1467_v35  ;;  %v2030_v18 = vmul.f32 %v1774_v63, %v1132_v22  ;;  %v1762_v35 = vld [vmem:[%s6356_s4 + $0x360] sm:$0xff]  ;;  %v2019_v22 = vmul.f32 %v1763_v54, %v5023_v46  ;;  %v1783_v54 = vld [vmem:[%s6356_s4 + $0x408] sm:$0xff] }
 0x227   :  { %v1136_v23 = vpop.f32.mrf.mxu1  ;;  %v1469_v15 = vpop.f32.mrf.mxu0  ;;  %v2026_v63 = vmul.f32 %v1770_v27, %v1126_v56  ;;  %v2015_v56 = vmul.f32 %v1759_v60, %v5006_v26  ;;  %v2018_v27 = vmul.f32 %v1762_v35, %v5014_v33  ;;  %v1751_v60 = vld [vmem:[%s6356_s4 + $0x308] sm:$0xff] }
 0x228   :  { %v5088_v34 = vmul.f32 %v1764_v42, %v1469_v15  ;;  %v2034_v47 = vmul.f32 %v1778_v16, %v1136_v23  ;;  %6526 = vst [vmem:[#allocation65_spill] sm:$0xff] %v5099_v13  ;;  %v1755_v23 = vld [vmem:[%s6356_s4 + $0x328] sm:$0xff]  ;;  %v1782_v16 = vld [vmem:[%s6356_s4 + $0x400] sm:$0xff]  ;;  %v1768_v15 = vld [vmem:[%s6356_s4 + $0x390] sm:$0xff] }
 0x229   :  { %v1138_v55 = vpop.f32.mrf.mxu1  ;;  %v1471_v36 = vpop.f32.mrf.mxu0  ;;  %v5139_v46 = vmul.f32 %v1755_v23, %v4991_v48  ;;  %v1758_v48 = vld [vmem:[%s6356_s4 + $0x340] sm:$0xff]  ;;  %v2219_v35 = vpack.c.bf16 %v2019_v22, %v2015_v56  ;;  %v2007_v56 = vmul.f32 %v1751_v60, %v4974_v58  ;;  %v1776_v58 = vld [vmem:[%s6356_s4 + $0x3d0] sm:$0xff] }
 0x22a   :  { %6525 = vst [vmem:[#allocation64_spill] sm:$0xff] %v5088_v34  ;;  %v2035_v42 = vmul.f32 %v1779_v53, %v1138_v55  ;;  %v5103_v25 = vmul.f32 %v1765_v7, %v1471_v36  ;;  %v1766_v55 = vld [vmem:[%s6356_s4 + $0x380] sm:$0xff]  ;;  %v2023_v36 = vmul.f32 %v1767_v19, %v1124_v40  ;;  %v2226_v17 = vpack.c.bf16 %v2034_v47, %v2030_v18  ;;  %v1769_v47 = vld [vmem:[%s6356_s4 + $0x398] sm:$0xff] }
 0x22b   :  { %v1142_v28 = vpop.f32.mrf.mxu1  ;;  %v1475_v57 = vpop.f32.mrf.mxu0  ;;  %v1786_v19 = vld [vmem:[%s6356_s4 + $0x420] sm:$0xff] }
 0x22c   :  { %6527 = vst [vmem:[#allocation66_spill] sm:$0xff] %v5103_v25  ;;  %v2227_v53 = vpack.c.bf16 %v2035_v42, %v2031_v50  ;;  %v1772_v50 = vld [vmem:[%s6356_s4 + $0x3b0] sm:$0xff]  ;;  %v2223_v40 = vpack.c.bf16 %v2027_v21, %v2023_v36  ;;  %v2022_v42 = vmul.f32 %v1766_v55, %v5031_v3  ;;  %v1787_v36 = vld [vmem:[%s6356_s4 + $0x428] sm:$0xff]  ;;  %v5153_v26 = vmul.f32 %v1782_v16, %v1142_v28 }
 0x22d   :  { %v1144_v6 = vpop.f32.mrf.mxu1  ;;  %v1477_v34 = vpop.f32.mrf.mxu0  ;;  %v5155_v33 = vmul.f32 %v1768_v15, %v1475_v57  ;;  %v1747_v15 = vld [vmem:[%s6356_s4 + $0x2e8] sm:$0xff]  ;;  %v1754_v57 = vld [vmem:[%s6356_s4 + $0x320] sm:$0xff] }
 0x22e   :  { %2340 = vmatprep.subr.bf16.mxu1 %v2227_v53  ;;  %v1773_v53 = vld [vmem:[%s6356_s4 + $0x3b8] sm:$0xff]  ;;  %v2222_v55 = vpack.c.bf16 %v2026_v63, %v2022_v42  ;;  %v5166_v7 = vmul.f32 %v1769_v47, %v1477_v34  ;;  %v1739_v63 = vld [vmem:[%s6356_s4 + $0x2a8] sm:$0xff]  ;;  %v1750_v47 = vld [vmem:[%s6356_s4 + $0x300] sm:$0xff] }
 0x22f   :  { %v1146_v18 = vpop.f32.mrf.mxu1  ;;  %v1479_v21 = vpop.f32.mrf.mxu0  ;;  %2341 = vmatpush2.bf16.msra.mxu1 %v2226_v17  ;;  %6528 = vst [vmem:[#allocation67_spill] sm:$0xff] %v5155_v33  ;;  %v5164_v17 = vmul.f32 %v1783_v54, %v1144_v6 }
 0x230   :  { %v5157_v3 = vmul.f32 %v1786_v19, %v1146_v18  ;;  %v5159_v23 = vmul.f32 %v1772_v50, %v1479_v21  ;;  %2342 = vmatprep.subr.bf16.mxu1 %v2223_v40  ;;  %6530 = vst [vmem:[#allocation69_spill] sm:$0xff] %v5166_v7  ;;  %v1743_v19 = vld [vmem:[%s6356_s4 + $0x2c8] sm:$0xff]  ;;  %v2014_v50 = vmul.f32 %v1758_v48, %v4999_v38  ;;  %v1790_v38 = vld [vmem:[%s6356_s4 + $0x440] sm:$0xff] }
 0x231   :  { %v1148_v13 = vpop.f32.mrf.mxu1  ;;  %v1481_v28 = vpop.f32.mrf.mxu0  ;;  %v2003_v21 = vmul.f32 %v1747_v15, %v4956_v5  ;;  %v1791_v5 = vld [vmem:[%s6356_s4 + $0x448] sm:$0xff]  ;;  %v1999_v15 = vmul.f32 %v1743_v19, %v4933_v37 }
 0x232   :  { %6529 = vst [vmem:[#allocation68_spill] sm:$0xff] %v5159_v23  ;;  %v5178_v6 = vmul.f32 %v1787_v36, %v1148_v13  ;;  %v5180_v34 = vmul.f32 %v1773_v53, %v1481_v28  ;;  %v1746_v13 = vld [vmem:[%s6356_s4 + $0x2e0] sm:$0xff]  ;;  %v2010_v36 = vmul.f32 %v1754_v57, %v4982_v8  ;;  %v2218_v53 = vpack.c.bf16 %v2018_v27, %v2014_v50  ;;  %v1780_v28 = vld [vmem:[%s6356_s4 + $0x3f0] sm:$0xff]  ;;  %v1777_v8 = vld [vmem:[%s6356_s4 + $0x3d8] sm:$0xff] }
 0x233   :  { %v1152_v40 = vpop.f32.mrf.mxu1  ;;  %v1485_v54 = vpop.f32.mrf.mxu0  ;;  %2343 = vmatpush2.bf16.msra.mxu1 %v2222_v55  ;;  %v1794_v55 = vld [vmem:[%s6356_s4 + $0x460] sm:$0xff]  ;;  %v1995_v27 = vmul.f32 %v1739_v63, %v4915_v0  ;;  %v2002_v57 = vmul.f32 %v1746_v13, %v4941_v32  ;;  %v2006_v50 = vmul.f32 %v1750_v47, %v4964_v14  ;;  %v1735_v19 = vld [vmem:[%s6356_s4 + $0x288] sm:$0xff]  ;;  %v2211_v13 = vpack.c.bf16 %v2003_v21, %v1999_v15  ;;  %v1784_v15 = vld [vmem:[%s6356_s4 + $0x410] sm:$0xff] }
 0x234   :  { %6531 = vst [vmem:[#allocation70_spill] sm:$0xff] %v5180_v34  ;;  %2344 = vmatprep.subr.bf16.mxu1 %v2219_v35  ;;  %v2215_v35 = vpack.c.bf16 %v5139_v46, %v2007_v56  ;;  %v1795_v46 = vld [vmem:[%s6356_s4 + $0x468] sm:$0xff]  ;;  %v1781_v56 = vld [vmem:[%s6356_s4 + $0x3f8] sm:$0xff]  ;;  %v1742_v0 = vld [vmem:[%s6356_s4 + $0x2c0] sm:$0xff]  ;;  %v5234_v37 = vmul.f32 %v1790_v38, %v1152_v40  ;;  %v5236_v32 = vmul.f32 %v1776_v58, %v1485_v54 }
 0x235   :  { %v1154_v48 = vpop.f32.mrf.mxu1  ;;  %v1487_v60 = vpop.f32.mrf.mxu0  ;;  %v2214_v47 = vpack.c.bf16 %v2010_v36, %v2006_v50  ;;  %v1731_v36 = vld [vmem:[%s6356_s4 + $0x268] sm:$0xff]  ;;  %v1998_v58 = vmul.f32 %v1742_v0, %v4923_v2 }
 0x236   :  { %6532 = vst [vmem:[#allocation71_spill] sm:$0xff] %v5236_v32  ;;  %v5247_v16 = vmul.f32 %v1777_v8, %v1487_v60  ;;  %v1727_v2 = vld [vmem:[%s6356_s4 + $0x248] sm:$0xff]  ;;  %v1987_v0 = vmul.f32 %v1731_v36, %v4871_v45 }
 0x237   :  { %v1156_v22 = vpop.f32.mrf.mxu1  ;;  %v1489_v18 = vpop.f32.mrf.mxu0  ;;  %2345 = vmatpush2.bf16.msra.mxu1 %v2218_v53  ;;  %v5245_v53 = vmul.f32 %v1791_v5, %v1154_v48  ;;  %v2210_v8 = vpack.c.bf16 %v2002_v57, %v1998_v58  ;;  %v1785_v57 = vld [vmem:[%s6356_s4 + $0x418] sm:$0xff] }
 0x238   :  { %v5238_v14 = vmul.f32 %v1794_v55, %v1156_v22  ;;  %v5240_v63 = vmul.f32 %v1780_v28, %v1489_v18  ;;  %2346 = vmatprep.subr.bf16.mxu1 %v2215_v35  ;;  %6534 = vst [vmem:[#allocation73_spill] sm:$0xff] %v5247_v16  ;;  %v1738_v22 = vld [vmem:[%s6356_s4 + $0x2a0] sm:$0xff]  ;;  %v1991_v28 = vmul.f32 %v1735_v19, %v4897_v10 }
 0x239   :  { %v1158_v42 = vpop.f32.mrf.mxu1  ;;  %v1491_v40 = vpop.f32.mrf.mxu0  ;;  %v1734_v55 = vld [vmem:[%s6356_s4 + $0x280] sm:$0xff]  ;;  %v1994_v5 = vmul.f32 %v1738_v22, %v4906_v39  ;;  %v1983_v22 = vmul.f32 %v1727_v2, %v4833_v1 }
 0x23a   :  { %6533 = vst [vmem:[#allocation72_spill] sm:$0xff] %v5240_v63  ;;  %v5256_v38 = vmul.f32 %v1795_v46, %v1158_v42  ;;  %v5258_v21 = vmul.f32 %v1781_v56, %v1491_v40  ;;  %v1788_v46 = vld [vmem:[%s6356_s4 + $0x430] sm:$0xff]  ;;  %v1723_v56 = vld [vmem:[%s6356_s4 + $0x228] sm:$0xff]  ;;  %v2207_v19 = vpack.c.bf16 %v1995_v27, %v1991_v28  ;;  %v1990_v39 = vmul.f32 %v1734_v55, %v4885_v9  ;;  %v1789_v40 = vld [vmem:[%s6356_s4 + $0x438] sm:$0xff] }
 0x23b   :  { %v5264_v48 = vpop.f32.mrf.mxu1  ;;  %v1495_v60 = vpop.f32.mrf.mxu0  ;;  %2347 = vmatpush2.bf16.msra.mxu1 %v2214_v47  ;;  %v1719_v9 = vld [vmem:[%s6356_s4 + $0x208] sm:$0xff]  ;;  %v1979_v27 = vmul.f32 %v1723_v56, %v4800_v20 }
 0x23c   :  { %6535 = vst [vmem:[#allocation74_spill] sm:$0xff] %v5258_v21  ;;  %2348 = vmatprep.subr.bf16.mxu1 %v2211_v13  ;;  %v5300_v58 = vmul.f32 %v1784_v15, %v1495_v60  ;;  %v2206_v36 = vpack.c.bf16 %v1994_v5, %v1990_v39  ;;  %v1792_v5 = vld [vmem:[%s6356_s4 + $0x450] sm:$0xff]  ;;  %v1842_v21 = vld [vmem:[%s6356_s4 + $0x5e0] sm:$0xff] }
 0x23d   :  { %v5281_v50 = vpop.f32.mrf.mxu1  ;;  %v1497_v10 = vpop.f32.mrf.mxu0 }
 0x23e   :  { %6536 = vst [vmem:[#allocation75_spill] sm:$0xff] %v5300_v58  ;;  %v5310_v18 = vmul.f32 %v1785_v57, %v1497_v10 }
 0x23f   :  { %v5294_v13 = vpop.f32.mrf.mxu1  ;;  %v1499_v47 = vpop.f32.mrf.mxu0  ;;  %2349 = vmatpush2.bf16.msra.mxu1 %v2210_v8  ;;  %v2203_v8 = vpack.c.bf16 %v1987_v0, %v1983_v22  ;;  %v1796_v0 = vld [vmem:[%s6356_s4 + $0x470] sm:$0xff] }
 0x240   :  { %v5302_v45 = vmul.f32 %v1788_v46, %v1499_v47  ;;  %2350 = vmatprep.subr.bf16.mxu1 %v2207_v19  ;;  %6538 = vst [vmem:[#allocation77_spill] sm:$0xff] %v5310_v18  ;;  %v1975_v46 = vmul.f32 %v1719_v9, %v4761_v49  ;;  %v1793_v49 = vld [vmem:[%s6356_s4 + $0x458] sm:$0xff]  ;;  %v6540_v47 = vpack.c.bf16 %v4862_v31, %v4858_v29 }
 0x241   :  { %v5308_v55 = vpop.f32.mrf.mxu1  ;;  %v1501_v28 = vpop.f32.mrf.mxu0 }
 0x242   :  { %6537 = vst [vmem:[#allocation76_spill] sm:$0xff] %v5302_v45  ;;  %v5314_v60 = vmul.f32 %v1789_v40, %v1501_v28  ;;  %v2199_v19 = vpack.c.bf16 %v1979_v27, %v1975_v46  ;;  %v1797_v40 = vld [vmem:[%s6356_s4 + $0x478] sm:$0xff] }
 0x243   :  { %v5316_v2 = vpop.f32.mrf.mxu1  ;;  %v1505_v15 = vpop.f32.mrf.mxu0  ;;  %2351 = vmatpush2.bf16.msra.mxu1 %v2206_v36 }
 0x244   :  { %6539 = vst [vmem:[#allocation78_spill] sm:$0xff] %v5314_v60  ;;  %2352 = vmatprep.subr.bf16.mxu1 %v2203_v8  ;;  %v5340_v22 = vmul.f32 %v1792_v5, %v1505_v15  ;;  %v6546_v15 = vpack.c.bf16 %v4792_v24, %v4788_v30  ;;  %v1827_v60 = vld [vmem:[%s6356_s4 + $0x568] sm:$0xff] }
 0x245   :  { %v5324_v10 = vpop.f32.mrf.mxu1  ;;  %v1507_v56 = vpop.f32.mrf.mxu0 }
 0x246   :  { %6541 = vst [vmem:[#allocation79_spill] sm:$0xff] %v5340_v22  ;;  %v5346_v28 = vmul.f32 %v1793_v49, %v1507_v56 }
 0x247   :  { %v5332_v39 = vpop.f32.mrf.mxu1  ;;  %v1509_v57 = vpop.f32.mrf.mxu0  ;;  %2353 = vmatpush2.bf16.msra.mxu1 %v6540_v47 }
 0x248   :  { %v5342_v9 = vmul.f32 %v1796_v0, %v1509_v57  ;;  %2354 = vmatprep.subr.bf16.mxu1 %v2199_v19  ;;  %6543 = vst [vmem:[#allocation81_spill] sm:$0xff] %v5346_v28  ;;  %v2319_v19 = vcombine.high %v4773_v12, %v4773_v12  ;;  %v1839_v12 = vld [vmem:[%s6356_s4 + $0x5c8] sm:$0xff] }
 0x249   :  { %v5344_v27 = vpop.f32.mrf.mxu1  ;;  %v1511_v36 = vpop.f32.mrf.mxu0 }
 0x24a   :  { %6542 = vst [vmem:[#allocation80_spill] sm:$0xff] %v5342_v9  ;;  %v5350_v46 = vmul.f32 %v1797_v40, %v1511_v36  ;;  %2479 = vmatprep.mubr.bf16.mxu0 %v2319_v19 }
 0x24b   :  { %v5352_v29 = vpop.f32.mrf.mxu1  ;;  %v5354_v31 = vpop.f32.mrf.mxu0  ;;  %2355 = vmatpush2.bf16.msra.mxu1 %v6546_v15 }
 0x24c   :  { %6544 = vst [vmem:[#allocation82_spill] sm:$0xff] %v5350_v46  ;;  %6545 = vst [vmem:[#allocation83_spill] sm:$0xff] %v5354_v31  ;;  %v1822_v31 = vld [vmem:[%s6356_s4 + $0x540] sm:$0xff] }
 0x24d   :  { %v5361_v0 = vpop.f32.mrf.mxu1  ;;  %v5363_v56 = vpop.f32.mrf.mxu0 }
 0x24e   :  { %2357 = vmatmul.mubr.bf16.vlgmr.msra.gmra.mxu1 %v4771_v4 }
 0x24f   :  { %v5368_v49 = vpop.f32.mrf.mxu1  ;;  %v5370_v57 = vpop.f32.mrf.mxu0  ;;  %2397 = vmatprep.mubr.bf16.mxu1 %v2319_v19 }
 0x250   :  { %6547 = vst [vmem:[#allocation84_spill] sm:$0xff] %v5370_v57 }
 0x251   :  { %v5372_v30 = vpop.f32.mrf.mxu1  ;;  %v5374_v24 = vpop.f32.mrf.mxu0 }
 0x253   :  { %v5376_v47 = vpop.f32.mrf.mxu1  ;;  %v5378_v40 = vpop.f32.mrf.mxu0 }
 0x255   :  { %v1194_v36 = vpop.f32.mrf.mxu1  ;;  %v5380_v15 = vpop.f32.mrf.mxu0 }
 0x257   :  { %v5382_v35 = vpop.f32.mrf.mxu1  ;;  %v5384_v1 = vpop.f32.mrf.mxu0 }
 0x259   :  { %v1198_v20 = vpop.f32.mrf.mxu1  ;;  %v5386_v8 = vpop.f32.mrf.mxu0 }
 0x25b   :  { %v1202_v5 = vpop.f32.mrf.mxu1  ;;  %v5388_v19 = vpop.f32.mrf.mxu0 }
 0x25d   :  { %v1204_v54 = vpop.f32.mrf.mxu1  ;;  %v5390_v42 = vpop.f32.mrf.mxu0 }
 0x25f   :  { %v1206_v25 = vpop.f32.mrf.mxu1  ;;  %v5392_v33 = vpop.f32.mrf.mxu0 }
 0x261   :  { %v1208_v23 = vpop.f32.mrf.mxu1  ;;  %v5394_v7 = vpop.f32.mrf.mxu0 }
 0x262   :  { %v2091_v58 = vmul.f32 %v1835_v44, %v1208_v23  ;;  %v1823_v44 = vld [vmem:[%s6356_s4 + $0x548] sm:$0xff] }
 0x263   :  { %v1212_v34 = vpop.f32.mrf.mxu1  ;;  %v5396_v32 = vpop.f32.mrf.mxu0 }
 0x264   :  { %v2094_v22 = vmul.f32 %v1838_v59, %v1212_v34  ;;  %v1850_v34 = vld [vmem:[%s6356_s4 + $0x620] sm:$0xff] }
 0x265   :  { %v1214_v63 = vpop.f32.mrf.mxu1  ;;  %v5398_v16 = vpop.f32.mrf.mxu0 }
 0x266   :  { %v2095_v45 = vmul.f32 %v1839_v12, %v1214_v63  ;;  %v2090_v12 = vmul.f32 %v1834_v43, %v1206_v25  ;;  %v1826_v25 = vld [vmem:[%s6356_s4 + $0x560] sm:$0xff]  ;;  %v2083_v43 = vmul.f32 %v1827_v60, %v1198_v20  ;;  %v2079_v60 = vmul.f32 %v1823_v44, %v1194_v36 }
 0x267   :  { %v1216_v52 = vpop.f32.mrf.mxu1  ;;  %v5409_v62 = vpop.f32.mrf.mxu0 }
 0x268   :  { %v2098_v51 = vmul.f32 %v1842_v21, %v1216_v52  ;;  %v1830_v52 = vld [vmem:[%s6356_s4 + $0x580] sm:$0xff]  ;;  %v2087_v21 = vmul.f32 %v1831_v11, %v1204_v54  ;;  %v1819_v11 = vld [vmem:[%s6356_s4 + $0x528] sm:$0xff]  ;;  %v2251_v44 = vpack.c.bf16 %v2083_v43, %v2079_v60 }
 0x269   :  { %v1218_v41 = vpop.f32.mrf.mxu1  ;;  %v5420_v4 = vpop.f32.mrf.mxu0  ;;  %v2086_v63 = vmul.f32 %v1830_v52, %v1202_v5  ;;  %v1847_v54 = vld [vmem:[%s6356_s4 + $0x608] sm:$0xff]  ;;  %v2075_v52 = vmul.f32 %v1819_v11, %v5372_v30 }
 0x26a   :  { %v2099_v18 = vmul.f32 %v1843_v61, %v1218_v41  ;;  %v2258_v41 = vpack.c.bf16 %v2098_v51, %v2094_v22  ;;  %v1846_v61 = vld [vmem:[%s6356_s4 + $0x600] sm:$0xff]  ;;  %v2255_v51 = vpack.c.bf16 %v2091_v58, %v2087_v21  ;;  %v1851_v22 = vld [vmem:[%s6356_s4 + $0x628] sm:$0xff]  ;;  %v2082_v21 = vmul.f32 %v1826_v25, %v5382_v35 }
 0x26b   :  { %v1222_v9 = vpop.f32.mrf.mxu1  ;;  %v5428_v28 = vpop.f32.mrf.mxu0  ;;  %v1815_v5 = vld [vmem:[%s6356_s4 + $0x508] sm:$0xff]  ;;  %v2078_v35 = vmul.f32 %v1822_v31, %v5376_v47  ;;  %v1810_v31 = vld [vmem:[%s6356_s4 + $0x4e0] sm:$0xff] }
 0x26c   :  { %v2259_v46 = vpack.c.bf16 %v2099_v18, %v2095_v45  ;;  %v5461_v58 = vmul.f32 %v1846_v61, %v1222_v9  ;;  %v1818_v9 = vld [vmem:[%s6356_s4 + $0x520] sm:$0xff]  ;;  %v1807_v30 = vld [vmem:[%s6356_s4 + $0x4c8] sm:$0xff]  ;;  %v2071_v43 = vmul.f32 %v1815_v5, %v5361_v0  ;;  %v1837_v5 = vld [vmem:[%s6356_s4 + $0x5b8] sm:$0xff] }
 0x26d   :  { %v1224_v59 = vpop.f32.mrf.mxu1  ;;  %v5439_v23 = vpop.f32.mrf.mxu0  ;;  %v1803_v25 = vld [vmem:[%s6356_s4 + $0x4a8] sm:$0xff]  ;;  %v2074_v47 = vmul.f32 %v1818_v9, %v5368_v49  ;;  %v1858_v0 = vld [vmem:[%s6356_s4 + $0x660] sm:$0xff]  ;;  %v2063_v60 = vmul.f32 %v1807_v30, %v5324_v10  ;;  %v1841_v10 = vld [vmem:[%s6356_s4 + $0x5d8] sm:$0xff] }
 0x26e   :  { %2365 = vmatprep.subr.bf16.mxu1 %v2259_v46  ;;  %6548 = vst [vmem:[#allocation85_spill] sm:$0xff] %v5461_v58  ;;  %v1811_v46 = vld [vmem:[%s6356_s4 + $0x4e8] sm:$0xff]  ;;  %v5476_v61 = vmul.f32 %v1847_v54, %v1224_v59  ;;  %v2250_v54 = vpack.c.bf16 %v2082_v21, %v2078_v35  ;;  %v1844_v21 = vld [vmem:[%s6356_s4 + $0x5f0] sm:$0xff]  ;;  %v1845_v35 = vld [vmem:[%s6356_s4 + $0x5f8] sm:$0xff] }
 0x26f   :  { %v1226_v18 = vpop.f32.mrf.mxu1  ;;  %v5453_v45 = vpop.f32.mrf.mxu0  ;;  %2366 = vmatpush1.bf16.msra.mxu1 %v2258_v41  ;;  %v2254_v41 = vpack.c.bf16 %v2090_v12, %v2086_v63  ;;  %v2067_v59 = vmul.f32 %v1811_v46, %v5344_v27  ;;  %v1854_v27 = vld [vmem:[%s6356_s4 + $0x640] sm:$0xff]  ;;  %v2247_v46 = vpack.c.bf16 %v2075_v52, %v2071_v43  ;;  %v1855_v49 = vld [vmem:[%s6356_s4 + $0x648] sm:$0xff]  ;;  %v1840_v43 = vld [vmem:[%s6356_s4 + $0x5d0] sm:$0xff] }
 0x270   :  { %v5463_v20 = vmul.f32 %v1850_v34, %v1226_v18  ;;  %2367 = vmatprep.subr.bf16.mxu1 %v2255_v51  ;;  %v1859_v30 = vld [vmem:[%s6356_s4 + $0x668] sm:$0xff]  ;;  %v1833_v58 = vld [vmem:[%s6356_s4 + $0x598] sm:$0xff] }
 0x271   :  { %v1228_v57 = vpop.f32.mrf.mxu1  ;;  %v1561_v36 = vpop.f32.mrf.mxu0  ;;  %v1799_v34 = vld [vmem:[%s6356_s4 + $0x488] sm:$0xff] }
 0x272   :  { %v5480_v51 = vmul.f32 %v1851_v22, %v1228_v57  ;;  %v1814_v57 = vld [vmem:[%s6356_s4 + $0x500] sm:$0xff] }
 0x273   :  { %v1232_v12 = vpop.f32.mrf.mxu1  ;;  %v1565_v11 = vpop.f32.mrf.mxu0  ;;  %2368 = vmatpush1.bf16.msra.mxu1 %v2254_v41  ;;  %v5517_v41 = vmul.f32 %v1803_v25, %v5308_v55  ;;  %v2070_v9 = vmul.f32 %v1814_v57, %v5352_v29  ;;  %v1806_v55 = vld [vmem:[%s6356_s4 + $0x4c0] sm:$0xff]  ;;  %v2066_v29 = vmul.f32 %v1810_v31, %v5332_v39  ;;  %v2243_v25 = vpack.c.bf16 %v2067_v59, %v2063_v60  ;;  %v1836_v60 = vld [vmem:[%s6356_s4 + $0x5b0] sm:$0xff] }
 0x274   :  { %2369 = vmatprep.subr.bf16.mxu1 %v2251_v44  ;;  %v5533_v57 = vmul.f32 %v1854_v27, %v1232_v12  ;;  %v2093_v39 = vmul.f32 %v1837_v5, %v1561_v36  ;;  %v2096_v5 = vmul.f32 %v1840_v43, %v1565_v11 }
 0x275   :  { %v1234_v18 = vpop.f32.mrf.mxu1  ;;  %v1567_v22 = vpop.f32.mrf.mxu0  ;;  %v2246_v63 = vpack.c.bf16 %v2074_v47, %v2070_v9  ;;  %v1898_v47 = vld [vmem:[%s6356_s4 + $0x7a0] sm:$0xff] }
 0x276   :  { %v5546_v59 = vmul.f32 %v1855_v49, %v1234_v18  ;;  %v2062_v18 = vmul.f32 %v1806_v55, %v5316_v2  ;;  %v2089_v2 = vmul.f32 %v1833_v58, %v5439_v23  ;;  %v1848_v55 = vld [vmem:[%s6356_s4 + $0x610] sm:$0xff] }
 0x277   :  { %v1236_v52 = vpop.f32.mrf.mxu1  ;;  %v1569_v44 = vpop.f32.mrf.mxu0  ;;  %2370 = vmatpush1.bf16.msra.mxu1 %v2250_v54  ;;  %v1852_v23 = vld [vmem:[%s6356_s4 + $0x630] sm:$0xff] }
 0x278   :  { %v5538_v54 = vmul.f32 %v1858_v0, %v1236_v52  ;;  %2371 = vmatprep.subr.bf16.mxu1 %v2247_v46  ;;  %v2100_v12 = vmul.f32 %v1844_v21, %v1569_v44  ;;  %v1802_v0 = vld [vmem:[%s6356_s4 + $0x4a0] sm:$0xff]  ;;  %v2097_v46 = vmul.f32 %v1841_v10, %v1567_v22  ;;  %v2055_v44 = vmul.f32 %v1799_v34, %v5281_v50  ;;  %v1829_v22 = vld [vmem:[%s6356_s4 + $0x578] sm:$0xff]  ;;  %v1832_v10 = vld [vmem:[%s6356_s4 + $0x590] sm:$0xff] }
 0x279   :  { %v1238_v31 = vpop.f32.mrf.mxu1  ;;  %v1571_v27 = vpop.f32.mrf.mxu0  ;;  %v1798_v52 = vld [vmem:[%s6356_s4 + $0x480] sm:$0xff]  ;;  %v2092_v50 = vmul.f32 %v1836_v60, %v5453_v45  ;;  %v1828_v45 = vld [vmem:[%s6356_s4 + $0x570] sm:$0xff] }
 0x27a   :  { %v5556_v9 = vmul.f32 %v1859_v30, %v1238_v31  ;;  %v2101_v36 = vmul.f32 %v1845_v35, %v1571_v27  ;;  %v2058_v30 = vmul.f32 %v1802_v0, %v5294_v13  ;;  %v2242_v35 = vpack.c.bf16 %v2066_v29, %v2062_v18  ;;  %v1825_v13 = vld [vmem:[%s6356_s4 + $0x558] sm:$0xff] }
 0x27b   :  { %v5559_v49 = vpop.f32.mrf.mxu1  ;;  %v1575_v21 = vpop.f32.mrf.mxu0  ;;  %2372 = vmatpush1.bf16.msra.mxu1 %v2246_v63  ;;  %v2260_v34 = vpack.c.bf16 %v2100_v12, %v2096_v5  ;;  %v2239_v58 = vpack.c.bf16 %v5517_v41, %v2055_v44  ;;  %v2257_v29 = vpack.c.bf16 %v2093_v39, %v2089_v2  ;;  %v1821_v12 = vld [vmem:[%s6356_s4 + $0x538] sm:$0xff]  ;;  %v2085_v27 = vmul.f32 %v1829_v22, %v5420_v4  ;;  %v1824_v39 = vld [vmem:[%s6356_s4 + $0x550] sm:$0xff] }
 0x27c   :  { %v2261_v63 = vpack.c.bf16 %v2101_v36, %v2097_v46  ;;  %2373 = vmatprep.subr.bf16.mxu1 %v2243_v25  ;;  %v2054_v25 = vmul.f32 %v1798_v52, %v5264_v48  ;;  %v2088_v41 = vmul.f32 %v1832_v10, %v5428_v28  ;;  %v1849_v0 = vld [vmem:[%s6356_s4 + $0x618] sm:$0xff]  ;;  %v5608_v4 = vmul.f32 %v1848_v55, %v1575_v21  ;;  %v1820_v21 = vld [vmem:[%s6356_s4 + $0x530] sm:$0xff] }
 0x27d   :  { %v5579_v43 = vpop.f32.mrf.mxu1  ;;  %v1577_v31 = vpop.f32.mrf.mxu0  ;;  %v1853_v48 = vld [vmem:[%s6356_s4 + $0x638] sm:$0xff]  ;;  %v2081_v5 = vmul.f32 %v1825_v13, %v5398_v16  ;;  %v2084_v52 = vmul.f32 %v1828_v45, %v5409_v62  ;;  %v2077_v2 = vmul.f32 %v1821_v12, %v5394_v7  ;;  %v2080_v16 = vmul.f32 %v1824_v39, %v5396_v32  ;;  %v1816_v7 = vld [vmem:[%s6356_s4 + $0x510] sm:$0xff] }
 0x27e   :  { %2447 = vmatprep.subr.bf16.mxu0 %v2261_v63  ;;  %6549 = vst [vmem:[#allocation86_spill] sm:$0xff] %v5608_v4  ;;  %v2238_v36 = vpack.c.bf16 %v2058_v30, %v2054_v25  ;;  %v1817_v18 = vld [vmem:[%s6356_s4 + $0x518] sm:$0xff]  ;;  %v2256_v44 = vpack.c.bf16 %v2092_v50, %v2088_v41  ;;  %v5623_v63 = vmul.f32 %v1849_v0, %v1577_v31  ;;  %v1895_v30 = vld [vmem:[%s6356_s4 + $0x788] sm:$0xff] }
 0x27f   :  { %v5600_v60 = vpop.f32.mrf.mxu1  ;;  %v1579_v46 = vpop.f32.mrf.mxu0  ;;  %2374 = vmatpush1.bf16.msra.mxu1 %v2242_v35  ;;  %2448 = vmatpush1.bf16.msra.mxu0 %v2260_v34  ;;  %v1813_v62 = vld [vmem:[%s6356_s4 + $0x4f8] sm:$0xff]  ;;  %v2253_v50 = vpack.c.bf16 %v2085_v27, %v2081_v5  ;;  %v2073_v31 = vmul.f32 %v1817_v18, %v5390_v42  ;;  %v2076_v13 = vmul.f32 %v1820_v21, %v5392_v33  ;;  %v1812_v33 = vld [vmem:[%s6356_s4 + $0x4f0] sm:$0xff] }
 0x280   :  { %v5610_v28 = vmul.f32 %v1852_v23, %v1579_v46  ;;  %2375 = vmatprep.subr.bf16.mxu1 %v2239_v58  ;;  %2449 = vmatprep.subr.bf16.mxu0 %v2257_v29  ;;  %6551 = vst [vmem:[#allocation88_spill] sm:$0xff] %v5623_v63  ;;  %v6553_v58 = vpack.c.bf16 %v5256_v38, %v5245_v53  ;;  %v1809_v32 = vld [vmem:[%s6356_s4 + $0x4d8] sm:$0xff]  ;;  %v1856_v29 = vld [vmem:[%s6356_s4 + $0x650] sm:$0xff]  ;;  %v1891_v63 = vld [vmem:[%s6356_s4 + $0x768] sm:$0xff] }
 0x281   :  { %v5617_v22 = vpop.f32.mrf.mxu1  ;;  %v1581_v10 = vpop.f32.mrf.mxu0  ;;  %v2252_v45 = vpack.c.bf16 %v2084_v52, %v2080_v16  ;;  %v1860_v53 = vld [vmem:[%s6356_s4 + $0x670] sm:$0xff]  ;;  %v1805_v38 = vld [vmem:[%s6356_s4 + $0x4b8] sm:$0xff]  ;;  %v2069_v12 = vmul.f32 %v1813_v62, %v5386_v8  ;;  %v2249_v27 = vpack.c.bf16 %v2077_v2, %v2073_v31  ;;  %v2072_v41 = vmul.f32 %v1816_v7, %v5388_v19 }
 0x282   :  { %6550 = vst [vmem:[#allocation87_spill] sm:$0xff] %v5610_v28  ;;  %v5627_v35 = vmul.f32 %v1853_v48, %v1581_v10  ;;  %v1857_v0 = vld [vmem:[%s6356_s4 + $0x658] sm:$0xff]  ;;  %v6554_v39 = vpack.c.bf16 %v5238_v14, %v5234_v37  ;;  %v1808_v8 = vld [vmem:[%s6356_s4 + $0x4d0] sm:$0xff]  ;;  %v2065_v19 = vmul.f32 %v1809_v32, %v5380_v15  ;;  %v6557_v52 = vpack.c.bf16 %v5178_v6, %v5164_v17 }
 0x283   :  { %v5633_v34 = vpop.f32.mrf.mxu1  ;;  %v1585_v55 = vpop.f32.mrf.mxu0  ;;  %2376 = vmatpush1.bf16.msra.mxu1 %v2238_v36  ;;  %2450 = vmatpush1.bf16.msra.mxu0 %v2256_v44  ;;  %v1861_v36 = vld [vmem:[%s6356_s4 + $0x678] sm:$0xff]  ;;  %v2061_v14 = vmul.f32 %v1805_v38, %v5374_v24  ;;  %v2068_v44 = vmul.f32 %v1812_v33, %v5384_v1  ;;  %v2248_v10 = vpack.c.bf16 %v2076_v13, %v2072_v41  ;;  %v1804_v2 = vld [vmem:[%s6356_s4 + $0x4b0] sm:$0xff] }
 0x284   :  { %6552 = vst [vmem:[#allocation89_spill] sm:$0xff] %v5627_v35  ;;  %2377 = vmatprep.subr.bf16.mxu1 %v6553_v58  ;;  %2451 = vmatprep.subr.bf16.mxu0 %v2253_v50  ;;  %v5679_v18 = vmul.f32 %v1856_v29, %v1585_v55  ;;  %v1801_v37 = vld [vmem:[%s6356_s4 + $0x498] sm:$0xff]  ;;  %v2245_v62 = vpack.c.bf16 %v2069_v12, %v2065_v19  ;;  %v1800_v7 = vld [vmem:[%s6356_s4 + $0x490] sm:$0xff] }
 0x285   :  { %v5651_v25 = vpop.f32.mrf.mxu1  ;;  %v1587_v42 = vpop.f32.mrf.mxu0  ;;  %v2064_v24 = vmul.f32 %v1808_v8, %v5378_v40  ;;  %v6559_v55 = vpack.c.bf16 %v5157_v3, %v5153_v26  ;;  %v2057_v31 = vmul.f32 %v1801_v37, %v5363_v56  ;;  %v6560_v40 = vld [vmem:[#allocation84_spill] sm:$0xff]  ;;  %v6561_v3 = vld [vmem:[#allocation83_spill] sm:$0xff] }
 0x286   :  { %6555 = vst [vmem:[#allocation90_spill] sm:$0xff] %v5679_v18  ;;  %v5696_v17 = vmul.f32 %v1857_v0, %v1587_v42  ;;  %v2060_v32 = vmul.f32 %v1804_v2, %v6560_v40  ;;  %v2056_v42 = vmul.f32 %v1800_v7, %v6561_v3  ;;  %v6562_v0 = vld [vmem:[#allocation82_spill] sm:$0xff]  ;;  %v6565_v37 = vld [vmem:[#allocation80_spill] sm:$0xff]  ;;  %v6572_v40 = vld [vmem:[#allocation75_spill] sm:$0xff] }
 0x287   :  { %v5667_v46 = vpop.f32.mrf.mxu1  ;;  %v1589_v48 = vpop.f32.mrf.mxu0  ;;  %2378 = vmatpush1.bf16.msra.mxu1 %v6554_v39  ;;  %2452 = vmatpush1.bf16.msra.mxu0 %v2252_v45  ;;  %v2244_v13 = vpack.c.bf16 %v2068_v44, %v2064_v24  ;;  %v2241_v26 = vpack.c.bf16 %v2061_v14, %v2057_v31  ;;  %v6566_v14 = vld [vmem:[#allocation79_spill] sm:$0xff]  ;;  %v6571_v31 = vld [vmem:[#allocation76_spill] sm:$0xff] }
 0x288   :  { %v5681_v5 = vmul.f32 %v1860_v53, %v1589_v48  ;;  %2379 = vmatprep.subr.bf16.mxu1 %v6557_v52  ;;  %2453 = vmatprep.subr.bf16.mxu0 %v2249_v27  ;;  %6558 = vst [vmem:[#allocation92_spill] sm:$0xff] %v5696_v17  ;;  %v2240_v56 = vpack.c.bf16 %v2060_v32, %v2056_v42  ;;  %v6563_v48 = vld [vmem:[#allocation81_spill] sm:$0xff] }
 0x289   :  { %v5691_v21 = vpop.f32.mrf.mxu1  ;;  %v1591_v15 = vpop.f32.mrf.mxu0  ;;  %v6564_v39 = vpack.c.bf16 %v6562_v0, %v6563_v48  ;;  %v6567_v44 = vpack.c.bf16 %v6565_v37, %v6566_v14  ;;  %v6573_v32 = vpack.c.bf16 %v6571_v31, %v6572_v40  ;;  %v1907_v40 = vld [vmem:[%s6356_s4 + $0x7e8] sm:$0xff] }
 0x28a   :  { %6556 = vst [vmem:[#allocation91_spill] sm:$0xff] %v5681_v5  ;;  %v5700_v16 = vmul.f32 %v1861_v36, %v1591_v15  ;;  %v6569_v15 = vld [vmem:[#allocation77_spill] sm:$0xff] }
 0x28b   :  { %v5703_v50 = vpop.f32.mrf.mxu1  ;;  %v5705_v1 = vpop.f32.mrf.mxu0  ;;  %2380 = vmatpush1.bf16.msra.mxu1 %v6559_v55  ;;  %2454 = vmatpush1.bf16.msra.mxu0 %v2248_v10  ;;  %v6568_v10 = vld [vmem:[#allocation78_spill] sm:$0xff]  ;;  %v1887_v17 = vld [vmem:[%s6356_s4 + $0x748] sm:$0xff] }
 0x28c   :  { %2455 = vmatprep.subr.bf16.mxu0 %v2245_v62  ;;  %v6570_v2 = vpack.c.bf16 %v6568_v10, %v6569_v15  ;;  %v1899_v10 = vld [vmem:[%s6356_s4 + $0x7a8] sm:$0xff] }
 0x28d   :  { %v5717_v45 = vpop.f32.mrf.mxu1  ;;  %v5719_v29 = vpop.f32.mrf.mxu0  ;;  %v1903_v15 = vld [vmem:[%s6356_s4 + $0x7c8] sm:$0xff] }
 0x28f   :  { %v5722_v53 = vpop.f32.mrf.mxu1  ;;  %v5724_v38 = vpop.f32.mrf.mxu0  ;;  %2456 = vmatpush1.bf16.msra.mxu0 %v2244_v13 }
 0x290   :  { %2457 = vmatprep.subr.bf16.mxu0 %v2241_v26 }
 0x291   :  { %v5726_v33 = vpop.f32.mrf.mxu1  ;;  %v5728_v12 = vpop.f32.mrf.mxu0 }
 0x293   :  { %v5730_v27 = vpop.f32.mrf.mxu1  ;;  %v5732_v41 = vpop.f32.mrf.mxu0  ;;  %2458 = vmatpush1.bf16.msra.mxu0 %v2240_v56 }
 0x294   :  { %2459 = vmatprep.subr.bf16.mxu0 %v6564_v39 }
 0x295   :  { %v1274_v36 = vpop.f32.mrf.mxu1  ;;  %v5737_v8 = vpop.f32.mrf.mxu0 }
 0x297   :  { %v1276_v19 = vpop.f32.mrf.mxu1  ;;  %v5739_v52 = vpop.f32.mrf.mxu0  ;;  %2460 = vmatpush1.bf16.msra.mxu0 %v6567_v44  ;;  %v1906_v44 = vld [vmem:[%s6356_s4 + $0x7e0] sm:$0xff] }
 0x298   :  { %2461 = vmatprep.subr.bf16.mxu0 %v6570_v2 }
 0x299   :  { %v1278_v62 = vpop.f32.mrf.mxu1  ;;  %v5747_v24 = vpop.f32.mrf.mxu0 }
 0x29b   :  { %v1282_v55 = vpop.f32.mrf.mxu1  ;;  %v5749_v7 = vpop.f32.mrf.mxu0  ;;  %2462 = vmatpush1.bf16.msra.mxu0 %v6573_v32  ;;  %v1902_v32 = vld [vmem:[%s6356_s4 + $0x7c0] sm:$0xff] }
 0x29d   :  { %v1284_v13 = vpop.f32.mrf.mxu1  ;;  %v5754_v26 = vpop.f32.mrf.mxu0 }
 0x29f   :  { %v1286_v3 = vpop.f32.mrf.mxu1  ;;  %v5756_v42 = vpop.f32.mrf.mxu0 }
 0x2a1   :  { %v1288_v56 = vpop.f32.mrf.mxu1  ;;  %v5758_v0 = vpop.f32.mrf.mxu0 }
 0x2a2   :  { %v2155_v11 = vmul.f32 %v1899_v10, %v1288_v56  ;;  %v2154_v56 = vmul.f32 %v1898_v47, %v1286_v3  ;;  %v2147_v10 = vmul.f32 %v1891_v63, %v1278_v62  ;;  %v1886_v47 = vld [vmem:[%s6356_s4 + $0x740] sm:$0xff]  ;;  %v1879_v63 = vld [vmem:[%s6356_s4 + $0x708] sm:$0xff] }
 0x2a3   :  { %v1292_v48 = vpop.f32.mrf.mxu1  ;;  %v5760_v39 = vpop.f32.mrf.mxu0  ;;  %v1882_v62 = vld [vmem:[%s6356_s4 + $0x720] sm:$0xff]  ;;  %v1875_v3 = vld [vmem:[%s6356_s4 + $0x6e8] sm:$0xff] }
 0x2a4   :  { %v2158_v35 = vmul.f32 %v1902_v32, %v1292_v48  ;;  %v1890_v48 = vld [vmem:[%s6356_s4 + $0x760] sm:$0xff]  ;;  %v2138_v32 = vmul.f32 %v1882_v62, %v5722_v53  ;;  %v1901_v53 = vld [vmem:[%s6356_s4 + $0x7b8] sm:$0xff] }
 0x2a5   :  { %v1294_v37 = vpop.f32.mrf.mxu1  ;;  %v5762_v14 = vpop.f32.mrf.mxu0  ;;  %v1897_v62 = vld [vmem:[%s6356_s4 + $0x798] sm:$0xff] }
 0x2a6   :  { %v2159_v4 = vmul.f32 %v1903_v15, %v1294_v37 }
 0x2a7   :  { %v1296_v2 = vpop.f32.mrf.mxu1  ;;  %v5773_v31 = vpop.f32.mrf.mxu0 }
 0x2a8   :  { %v2162_v23 = vmul.f32 %v1906_v44, %v1296_v2  ;;  %v1894_v44 = vld [vmem:[%s6356_s4 + $0x780] sm:$0xff]  ;;  %v2151_v2 = vmul.f32 %v1895_v30, %v1284_v13  ;;  %v1883_v30 = vld [vmem:[%s6356_s4 + $0x728] sm:$0xff] }
 0x2a9   :  { %v1298_v6 = vpop.f32.mrf.mxu1  ;;  %v5784_v58 = vpop.f32.mrf.mxu0 }
 0x2aa   :  { %v2163_v28 = vmul.f32 %v1907_v40, %v1298_v6  ;;  %v2290_v37 = vpack.c.bf16 %v2162_v23, %v2158_v35  ;;  %v2287_v15 = vpack.c.bf16 %v2155_v11, %v2151_v2  ;;  %v2143_v35 = vmul.f32 %v1887_v17, %v1274_v36 }
 0x2ab   :  { %v5792_v18 = vpop.f32.mrf.mxu0  ;;  %v2146_v11 = vmul.f32 %v1890_v48, %v1276_v19  ;;  %v2142_v17 = vmul.f32 %v1886_v47, %v5730_v27  ;;  %v1878_v19 = vld [vmem:[%s6356_s4 + $0x700] sm:$0xff]  ;;  %v2135_v40 = vmul.f32 %v1879_v63, %v5717_v45  ;;  %v1867_v27 = vld [vmem:[%s6356_s4 + $0x6a8] sm:$0xff]  ;;  %v1908_v48 = vld [vmem:[%s6356_s4 + $0x7f0] sm:$0xff] }
 0x2ac   :  { %v2291_v5 = vpack.c.bf16 %v2163_v28, %v2159_v4  ;;  %v2150_v4 = vmul.f32 %v1894_v44, %v1282_v55  ;;  %v2139_v55 = vmul.f32 %v1883_v30, %v5726_v33  ;;  %v2283_v13 = vpack.c.bf16 %v2147_v10, %v2143_v35  ;;  %v1871_v33 = vld [vmem:[%s6356_s4 + $0x6c8] sm:$0xff]  ;;  %v1904_v47 = vld [vmem:[%s6356_s4 + $0x7d0] sm:$0xff] }
 0x2ad   :  { %v5800_v6 = vpop.f32.mrf.mxu0  ;;  %v2282_v44 = vpack.c.bf16 %v2146_v11, %v2142_v17  ;;  %v2134_v10 = vmul.f32 %v1878_v19, %v5703_v50  ;;  %v2127_v50 = vmul.f32 %v1871_v33, %v5651_v25  ;;  %v1863_v35 = vld [vmem:[%s6356_s4 + $0x688] sm:$0xff]  ;;  %v2123_v63 = vmul.f32 %v1867_v27, %v5617_v22  ;;  %v1900_v17 = vld [vmem:[%s6356_s4 + $0x7b0] sm:$0xff]  ;;  %v1893_v33 = vld [vmem:[%s6356_s4 + $0x778] sm:$0xff] }
 0x2ae   :  { %2381 = vmatprep.subr.bf16.mxu1 %v2291_v5  ;;  %v2286_v23 = vpack.c.bf16 %v2154_v56, %v2150_v4  ;;  %v1874_v56 = vld [vmem:[%s6356_s4 + $0x6e0] sm:$0xff]  ;;  %v2279_v45 = vpack.c.bf16 %v2139_v55, %v2135_v40  ;;  %v2119_v27 = vmul.f32 %v1863_v35, %v5579_v43  ;;  %v1892_v43 = vld [vmem:[%s6356_s4 + $0x770] sm:$0xff] }
 0x2af   :  { %v5808_v28 = vpop.f32.mrf.mxu0  ;;  %2382 = vmatpush2.bf16.msra.mxu1 %v2290_v37  ;;  %v2131_v37 = vmul.f32 %v1875_v3, %v5691_v21  ;;  %v1909_v21 = vld [vmem:[%s6356_s4 + $0x7f8] sm:$0xff]  ;;  %v1870_v4 = vld [vmem:[%s6356_s4 + $0x6c0] sm:$0xff]  ;;  %v2130_v11 = vmul.f32 %v1874_v56, %v5667_v46 }
 0x2b0   :  { %2383 = vmatprep.subr.bf16.mxu1 %v2287_v15  ;;  %v1905_v15 = vld [vmem:[%s6356_s4 + $0x7d8] sm:$0xff]  ;;  %v2126_v46 = vmul.f32 %v1870_v4, %v5633_v34  ;;  %v2148_v4 = vmul.f32 %v1892_v43, %v5773_v31  ;;  %v1880_v31 = vld [vmem:[%s6356_s4 + $0x710] sm:$0xff] }
 0x2b1   :  { %v1641_v5 = vpop.f32.mrf.mxu0  ;;  %v2275_v3 = vpack.c.bf16 %v2131_v37, %v2127_v50 }
 0x2b2   :  { %v2157_v19 = vmul.f32 %v1901_v53, %v1641_v5  ;;  %v1896_v5 = vld [vmem:[%s6356_s4 + $0x790] sm:$0xff]  ;;  %v2274_v37 = vpack.c.bf16 %v2130_v11, %v2126_v46  ;;  %v2149_v53 = vmul.f32 %v1893_v33, %v5784_v58 }
 0x2b3   :  { %v1645_v36 = vpop.f32.mrf.mxu0  ;;  %2384 = vmatpush2.bf16.msra.mxu1 %v2286_v23  ;;  %v2278_v23 = vpack.c.bf16 %v2138_v32, %v2134_v10  ;;  %v2271_v10 = vpack.c.bf16 %v2123_v63, %v2119_v27  ;;  %v6578_v46 = vld [vmem:[#allocation34_spill] sm:$0xff] }
 0x2b4   :  { %2385 = vmatprep.subr.bf16.mxu1 %v2283_v13  ;;  %v1866_v13 = vld [vmem:[%s6356_s4 + $0x6a0] sm:$0xff]  ;;  %v2160_v32 = vmul.f32 %v1904_v47, %v1645_v36  ;;  %v1889_v36 = vld [vmem:[%s6356_s4 + $0x758] sm:$0xff]  ;;  %v2318_v33 = vcombine.high %v6578_v46, %v6578_v46 }
 0x2b5   :  { %v1647_v2 = vpop.f32.mrf.mxu0  ;;  %v2122_v34 = vmul.f32 %v1866_v13, %v5600_v60  ;;  %v1885_v60 = vld [vmem:[%s6356_s4 + $0x738] sm:$0xff] }
 0x2b6   :  { %v2161_v22 = vmul.f32 %v1905_v15, %v1647_v2  ;;  %v2153_v2 = vmul.f32 %v1897_v62, %v5800_v6  ;;  %v2141_v47 = vmul.f32 %v1885_v60, %v5758_v0  ;;  %v1873_v0 = vld [vmem:[%s6356_s4 + $0x6d8] sm:$0xff] }
 0x2b7   :  { %v1649_v30 = vpop.f32.mrf.mxu0  ;;  %2386 = vmatpush2.bf16.msra.mxu1 %v2282_v44  ;;  %v1862_v44 = vld [vmem:[%s6356_s4 + $0x680] sm:$0xff] }
 0x2b8   :  { %2387 = vmatprep.subr.bf16.mxu1 %v2279_v45  ;;  %v2164_v55 = vmul.f32 %v1908_v48, %v1649_v30  ;;  %v2156_v45 = vmul.f32 %v1900_v17, %v5808_v28  ;;  %v2289_v6 = vpack.c.bf16 %v2157_v19, %v2153_v2  ;;  %v2118_v15 = vmul.f32 %v1862_v44, %v5559_v49  ;;  %v1888_v28 = vld [vmem:[%s6356_s4 + $0x750] sm:$0xff]  ;;  %v1881_v49 = vld [vmem:[%s6356_s4 + $0x718] sm:$0xff] }
 0x2b9   :  { %v1651_v25 = vpop.f32.mrf.mxu0  ;;  %v2152_v30 = vmul.f32 %v1896_v5, %v5792_v18  ;;  %v1884_v18 = vld [vmem:[%s6356_s4 + $0x730] sm:$0xff]  ;;  %v2144_v63 = vmul.f32 %v1888_v28, %v5760_v39  ;;  %v2137_v11 = vmul.f32 %v1881_v49, %v5754_v26  ;;  %v2136_v26 = vmul.f32 %v1880_v31, %v5749_v7  ;;  %v1705_v7 = vld [vmem:[%s6356_s4 + $0x198] sm:$0xff]  ;;  %v6589_v28 = vld [vmem:[#allocation28_spill] sm:$0xff] }
 0x2ba   :  { %v2165_v40 = vmul.f32 %v1909_v21, %v1651_v25  ;;  %v2292_v48 = vpack.c.bf16 %v2164_v55, %v2160_v32  ;;  %v2145_v21 = vmul.f32 %v1889_v36, %v5762_v14  ;;  %v2270_v58 = vpack.c.bf16 %v2122_v34, %v2118_v15  ;;  %v1877_v14 = vld [vmem:[%s6356_s4 + $0x6f8] sm:$0xff]  ;;  %v1876_v55 = vld [vmem:[%s6356_s4 + $0x6f0] sm:$0xff]  ;;  %v6586_v15 = vld [vmem:[#allocation40_spill] sm:$0xff] }
 0x2bb   :  { %2388 = vmatpush2.bf16.msra.mxu1 %v2278_v23  ;;  %v2288_v50 = vpack.c.bf16 %v2156_v45, %v2152_v30  ;;  %v6574_v23 = vpack.c.bf16 %v5556_v9, %v5546_v59  ;;  %v2140_v62 = vmul.f32 %v1884_v18, %v5756_v42  ;;  %v2284_v39 = vpack.c.bf16 %v2148_v4, %v2144_v63  ;;  %v1709_v59 = vld [vmem:[%s6356_s4 + $0x1b8] sm:$0xff]  ;;  %v6581_v5 = vld [vmem:[#allocation33_spill] sm:$0xff]  ;;  %v6596_v31 = vld [vmem:[#allocation92_spill] sm:$0xff] }
 0x2bc   :  { %v2293_v56 = vpack.c.bf16 %v2165_v40, %v2161_v22  ;;  %2389 = vmatprep.subr.bf16.mxu1 %v2275_v3  ;;  %v2285_v35 = vpack.c.bf16 %v2149_v53, %v2145_v21  ;;  %v2133_v25 = vmul.f32 %v1877_v14, %v5747_v24  ;;  %v2281_v13 = vpack.c.bf16 %v2141_v47, %v2137_v11  ;;  %v1869_v9 = vld [vmem:[%s6356_s4 + $0x6b8] sm:$0xff]  ;;  %v1872_v24 = vld [vmem:[%s6356_s4 + $0x6d0] sm:$0xff]  ;;  %v6593_v47 = vld [vmem:[#allocation36_spill] sm:$0xff] }
 0x2bd   :  { %v6575_v42 = vpack.c.bf16 %v5538_v54, %v5533_v57  ;;  %v2129_v3 = vmul.f32 %v1873_v0, %v5737_v8  ;;  %v6576_v17 = vpack.c.bf16 %v5480_v51, %v5476_v61  ;;  %v1865_v57 = vld [vmem:[%s6356_s4 + $0x698] sm:$0xff]  ;;  %v2132_v54 = vmul.f32 %v1876_v55, %v5739_v52  ;;  %v1868_v8 = vld [vmem:[%s6356_s4 + $0x6b0] sm:$0xff]  ;;  %v6595_v14 = vld [vmem:[#allocation24_spill] sm:$0xff] }
 0x2be   :  { %2463 = vmatprep.subr.bf16.mxu0 %v2293_v56  ;;  %v2280_v19 = vpack.c.bf16 %v2140_v62, %v2136_v26  ;;  %v6577_v22 = vld [vmem:[#allocation38_spill] sm:$0xff]  ;;  %v2125_v61 = vmul.f32 %v1869_v9, %v5728_v12  ;;  %v2128_v44 = vmul.f32 %v1872_v24, %v5732_v41  ;;  %v6579_v52 = vld [vmem:[#allocation85_spill] sm:$0xff]  ;;  %v1961_v2 = vmul.f32 %v1705_v7, %v6581_v5  ;;  %v6587_v60 = vld [vmem:[#allocation39_spill] sm:$0xff] }
 0x2bf   :  { %2390 = vmatpush2.bf16.msra.mxu1 %v2274_v37  ;;  %2464 = vmatpush2.bf16.msra.mxu0 %v2292_v48  ;;  %v1965_v40 = vmul.f32 %v1709_v59, %v6577_v22  ;;  %v2277_v51 = vpack.c.bf16 %v2133_v25, %v2129_v3  ;;  %v1701_v32 = vld [vmem:[%s6356_s4 + $0x178] sm:$0xff]  ;;  %v6580_v27 = vpack.c.bf16 %v5463_v20, %v6579_v52  ;;  %v1864_v12 = vld [vmem:[%s6356_s4 + $0x690] sm:$0xff]  ;;  %v6585_v48 = vld [vmem:[#allocation32_spill] sm:$0xff]  ;;  %v6616_v22 = vmov 0  }
 0x2c0   :  { %2391 = vmatprep.subr.bf16.mxu1 %v2271_v10  ;;  %2465 = vmatprep.subr.bf16.mxu0 %v2289_v6  ;;  %v2121_v56 = vmul.f32 %v1865_v57, %v5719_v29  ;;  %v6582_v34 = vld [vmem:[#allocation42_spill] sm:$0xff]  ;;  %v6583_v37 = vld [vmem:[#allocation41_spill] sm:$0xff]  ;;  %v2124_v20 = vmul.f32 %v1868_v8, %v5724_v38  ;;  %v2276_v45 = vpack.c.bf16 %v2132_v54, %v2128_v44  ;;  %v6590_v49 = vld [vmem:[#allocation35_spill] sm:$0xff] }
 0x2c1   :  { %v6584_v36 = vpack.c.bf16 %v6582_v34, %v6583_v37  ;;  %v1697_v41 = vld [vmem:[%s6356_s4 + $0x158] sm:$0xff]  ;;  %v1957_v10 = vmul.f32 %v1701_v32, %v6585_v48  ;;  %v2193_v43 = vpack.c.bf16 %v1965_v40, %v1961_v2  ;;  %v2120_v6 = vmul.f32 %v1864_v12, %v5705_v1  ;;  %v6592_v1 = vld [vmem:[#allocation37_spill] sm:$0xff]  ;;  %v6605_v9 = vld [vmem:[#allocation88_spill] sm:$0xff] }
 0x2c2   :  { %v2273_v53 = vpack.c.bf16 %v2125_v61, %v2121_v56  ;;  %v1693_v29 = vld [vmem:[%s6356_s4 + $0x138] sm:$0xff]  ;;  %v6588_v30 = vpack.c.bf16 %v6586_v15, %v6587_v60  ;;  %v1953_v21 = vmul.f32 %v1697_v41, %v6589_v28  ;;  %v6597_v11 = vpack.c.bf16 %v5700_v16, %v6596_v31  ;;  %v6599_v62 = vld [vmem:[#allocation29_spill] sm:$0xff]  ;;  %v6618_v8 = vld [vmem:[#allocation20_spill] sm:$0xff] }
 0x2c3   :  { %2392 = vmatpush2.bf16.msra.mxu1 %v2270_v58  ;;  %2466 = vmatpush2.bf16.msra.mxu0 %v2288_v50  ;;  %v1689_v38 = vld [vmem:[%s6356_s4 + $0x118] sm:$0xff]  ;;  %v2272_v58 = vpack.c.bf16 %v2124_v20, %v2120_v6  ;;  %v6604_v59 = vld [vmem:[#allocation89_spill] sm:$0xff]  ;;  %v6630_v37 = vld [vmem:[#allocation12_spill] sm:$0xff] }
 0x2c4   :  { %2393 = vmatprep.subr.bf16.mxu1 %v6574_v23  ;;  %2467 = vmatprep.subr.bf16.mxu0 %v2285_v35  ;;  %v6591_v4 = vld [vmem:[#allocation27_spill] sm:$0xff]  ;;  %v2189_v18 = vpack.c.bf16 %v1957_v10, %v1953_v21  ;;  %v6594_v35 = vpack.c.bf16 %v6592_v1, %v6593_v47  ;;  %v1945_v63 = vmul.f32 %v1689_v38, %v6595_v14  ;;  %v6598_v0 = vld [vmem:[#allocation30_spill] sm:$0xff]  ;;  %v6608_v24 = vld [vmem:[#allocation25_spill] sm:$0xff] }
 0x2c5   :  { %v1949_v50 = vmul.f32 %v1693_v29, %v6591_v4  ;;  %v6601_v55 = vld [vmem:[#allocation91_spill] sm:$0xff]  ;;  %v6602_v25 = vld [vmem:[#allocation90_spill] sm:$0xff]  ;;  %v6606_v26 = vpack.c.bf16 %v6604_v59, %v6605_v9  ;;  %v6617_v40 = vld [vmem:[#allocation21_spill] sm:$0xff] }
 0x2c6   :  { %v6610_v16 = vld [vmem:[#allocation87_spill] sm:$0xff]  ;;  %v6614_v54 = vld [vmem:[#allocation22_spill] sm:$0xff]  ;;  %v6619_v61 = vpack.c.bf16 %v6617_v40, %v6618_v8  ;;  %v6623_v52 = vld [vmem:[#allocation17_spill] sm:$0xff] }
 0x2c7   :  { %2394 = vmatpush2.bf16.msra.mxu1 %v6575_v42  ;;  %2468 = vmatpush2.bf16.msra.mxu0 %v2284_v39  ;;  %v2185_v23 = vpack.c.bf16 %v1949_v50, %v1945_v63  ;;  %v6600_v39 = vpack.c.bf16 %v6598_v0, %v6599_v62  ;;  %v6607_v42 = vld [vmem:[#allocation26_spill] sm:$0xff]  ;;  %v6613_v57 = vld [vmem:[#allocation23_spill] sm:$0xff]  ;;  %v6629_v34 = vld [vmem:[#allocation13_spill] sm:$0xff] }
 0x2c8   :  { %2395 = vmatprep.subr.bf16.mxu1 %v6576_v17  ;;  %2469 = vmatprep.subr.bf16.mxu0 %v2281_v13  ;;  %v6603_v13 = vpack.c.bf16 %v6601_v55, %v6602_v25  ;;  %v6609_v3 = vpack.c.bf16 %v6607_v42, %v6608_v24  ;;  %v6611_v17 = vld [vmem:[#allocation86_spill] sm:$0xff]  ;;  %v6626_v2 = vld [vmem:[#allocation15_spill] sm:$0xff]  ;;  %v6636_v48 = vld [vmem:[#allocation8_spill] sm:$0xff] }
 0x2c9   :  { %v6612_v7 = vpack.c.bf16 %v6610_v16, %v6611_v17  ;;  %v6621_v32 = vld [vmem:[#allocation18_spill] sm:$0xff]  ;;  %v6641_v6 = vld [vmem:[#allocation72_spill] sm:$0xff]  ;;  %v6642_v15 = vld [vmem:[#allocation71_spill] sm:$0xff] }
 0x2ca   :  { %v6627_v12 = vld [vmem:[#allocation14_spill] sm:$0xff]  ;;  %v6643_v60 = vpack.c.bf16 %v6641_v6, %v6642_v15  ;;  %v6645_v28 = vld [vmem:[#allocation69_spill] sm:$0xff]  ;;  %v6647_v38 = vld [vmem:[#allocation68_spill] sm:$0xff] }
 0x2cb   :  { %2396 = vmatpush2.bf16.msra.mxu1 %v6580_v27  ;;  %2470 = vmatpush2.bf16.msra.mxu0 %v2280_v19  ;;  %v6615_v19 = vpack.c.bf16 %v6613_v57, %v6614_v54  ;;  %v6624_v27 = vld [vmem:[#allocation16_spill] sm:$0xff]  ;;  %v6628_v56 = vpack.c.bf16 %v6626_v2, %v6627_v12  ;;  %v6633_v41 = vld [vmem:[#allocation10_spill] sm:$0xff]  ;;  %v6651_v50 = vld [vmem:[#allocation65_spill] sm:$0xff] }
 0x2cc   :  { %2406 = vmatprep.subr.bf16.mxu1 %v6584_v36  ;;  %2471 = vmatprep.subr.bf16.mxu0 %v2277_v51  ;;  %v6620_v51 = vld [vmem:[#allocation19_spill] sm:$0xff]  ;;  %v6625_v5 = vpack.c.bf16 %v6623_v52, %v6624_v27  ;;  %v6631_v36 = vpack.c.bf16 %v6629_v34, %v6630_v37  ;;  %v6650_v4 = vld [vmem:[#allocation66_spill] sm:$0xff]  ;;  %v6653_v1 = vld [vmem:[#allocation64_spill] sm:$0xff] }
 0x2cd   :  { %v6622_v44 = vpack.c.bf16 %v6620_v51, %v6621_v32  ;;  %v6654_v47 = vld [vmem:[#allocation63_spill] sm:$0xff]  ;;  %v6656_v14 = vld [vmem:[#allocation62_spill] sm:$0xff]  ;;  %v6657_v63 = vld [vmem:[#allocation61_spill] sm:$0xff] }
 0x2ce   :  { %2398 = vmatmul.mubr.bf16.vlgmr.msra.gmra.mxu1 %v2318_v33  ;;  %v6658_v31 = vpack.c.bf16 %v6656_v14, %v6657_v63  ;;  %v6662_v62 = vld [vmem:[#allocation58_spill] sm:$0xff]  ;;  %v6665_v25 = vld [vmem:[#allocation56_spill] sm:$0xff]  ;;  %v6684_v52 = vld [vmem:[#allocation43_spill] sm:$0xff] }
 0x2cf   :  { %2407 = vmatpush1.bf16.msra.mxu1 %v6588_v30  ;;  %2472 = vmatpush2.bf16.msra.mxu0 %v2276_v45  ;;  %v6635_v45 = vld [vmem:[#allocation9_spill] sm:$0xff]  ;;  %v6644_v30 = vld [vmem:[#allocation70_spill] sm:$0xff]  ;;  %v6671_v24 = vld [vmem:[#allocation52_spill] sm:$0xff] }
 0x2d0   :  { %2408 = vmatprep.subr.bf16.mxu1 %v2193_v43  ;;  %2473 = vmatprep.subr.bf16.mxu0 %v2273_v53  ;;  %v6637_v10 = vpack.c.bf16 %v6635_v45, %v6636_v48  ;;  %v6638_v43 = vld [vmem:[#allocation74_spill] sm:$0xff]  ;;  %v6639_v53 = vld [vmem:[#allocation73_spill] sm:$0xff]  ;;  %v6646_v21 = vpack.c.bf16 %v6644_v30, %v6645_v28  ;;  %v6677_v54 = vld [vmem:[#allocation48_spill] sm:$0xff] }
 0x2d1   :  { %2438 = vmatprep.mubr.bf16.mxu1 %v6590_v49  ;;  %v6640_v29 = vpack.c.bf16 %v6638_v43, %v6639_v53  ;;  %v6668_v9 = vld [vmem:[#allocation54_spill] sm:$0xff]  ;;  %v3876_v34 = vld [vmem:[%s6358_s6 + $0x68] sm:$0xff]   ;;  %v3878_v45 = vld [vmem:[%s6358_s6 + $0x60] sm:$0xff]  }
 0x2d2   :  { %v6674_v17 = vld [vmem:[#allocation50_spill] sm:$0xff]  ;;  %v3899_v63 = vld [vmem:[%s6358_s6 + $0x88] sm:$0xff]  }
 0x2d3   :  { %2409 = vmatpush1.bf16.msra.mxu1 %v6594_v35  ;;  %2474 = vmatpush2.bf16.msra.mxu0 %v2272_v58  ;;  %v6648_v58 = vld [vmem:[#allocation67_spill] sm:$0xff]  ;;  %v6655_v35 = vpack.c.bf16 %v6653_v1, %v6654_v47  ;;  %v6680_v8 = vld [vmem:[#allocation46_spill] sm:$0xff] }
 0x2d4   :  { %2410 = vmatprep.subr.bf16.mxu1 %v2189_v18  ;;  %2475 = vmatprep.subr.bf16.mxu0 %v6597_v11  ;;  %v6649_v49 = vpack.c.bf16 %v6647_v38, %v6648_v58  ;;  %v6652_v18 = vpack.c.bf16 %v6650_v4, %v6651_v50  ;;  %v6659_v11 = vld [vmem:[#allocation60_spill] sm:$0xff]  ;;  %v3872_v32 = vld [vmem:[%s6358_s6 + $0x78] sm:$0xff]   ;;  %v3874_v2 = vld [vmem:[%s6358_s6 + $0x70] sm:$0xff]  }
 0x2d5   :  { %v3880_v6 = vld [vmem:[%s6358_s6 + $0x58] sm:$0xff]   ;;  %v3883_v28 = vld [vmem:[%s6358_s6 + $0x10] sm:$0xff]   ;;  %v3885_v58 = vld [vmem:[%s6358_s6 + $0x8] sm:$0xff]  }
 0x2d6   :  { %v3881_v15 = vld [vmem:[%s6358_s6 + $0x18] sm:$0xff]   ;;  %v3894_v38 = vld [vmem:[%s6358_s6 + $0xb0] sm:$0xff]   ;;  %v3895_v50 = vld [vmem:[%s6358_s6 + $0xa8] sm:$0xff]  }
 0x2d7   :  { %2411 = vmatpush1.bf16.msra.mxu1 %v6600_v39  ;;  %2476 = vmatpush2.bf16.msra.mxu0 %v6603_v13  ;;  %v6663_v39 = vld [vmem:[#allocation57_spill] sm:$0xff]  ;;  %v6666_v13 = vld [vmem:[#allocation55_spill] sm:$0xff] }
 0x2d8   :  { %2412 = vmatprep.subr.bf16.mxu1 %v2185_v23  ;;  %2477 = vmatprep.subr.bf16.mxu0 %v6606_v26  ;;  %v6660_v23 = vld [vmem:[#allocation59_spill] sm:$0xff]  ;;  %v6664_v55 = vpack.c.bf16 %v6662_v62, %v6663_v39  ;;  %v6667_v59 = vpack.c.bf16 %v6665_v25, %v6666_v13  ;;  %v6669_v26 = vld [vmem:[#allocation53_spill] sm:$0xff] }
 0x2d9   :  { %v6661_v0 = vpack.c.bf16 %v6659_v11, %v6660_v23  ;;  %v6670_v42 = vpack.c.bf16 %v6668_v9, %v6669_v26  ;;  %v3893_v30 = vld [vmem:[%s6358_s6 + $0xb8] sm:$0xff]   ;;  %v3896_v47 = vld [vmem:[%s6358_s6 + $0xa0] sm:$0xff]   ;;  %v3898_v14 = vld [vmem:[%s6358_s6 + $0x90] sm:$0xff]  }
 0x2da   :  { %v3901_v11 = vld [vmem:[%s6358_s6 + $0xd0] sm:$0xff]   ;;  %v3902_v23 = vld [vmem:[%s6358_s6 + $0xc8] sm:$0xff]  }
 0x2db   :  { %2413 = vmatpush1.bf16.msra.mxu1 %v6609_v3  ;;  %2478 = vmatpush2.bf16.msra.mxu0 %v6612_v7  ;;  %v6672_v3 = vld [vmem:[#allocation51_spill] sm:$0xff]  ;;  %v6675_v7 = vld [vmem:[#allocation49_spill] sm:$0xff] }
 0x2dc   :  { %2414 = vmatprep.subr.bf16.mxu1 %v6615_v19  ;;  %2759 = vmatprep.subr.bf16.mxu0 %v6616_v22  ;;  %v6673_v16 = vpack.c.bf16 %v6671_v24, %v6672_v3  ;;  %v6676_v57 = vpack.c.bf16 %v6674_v17, %v6675_v7  ;;  %v6678_v19 = vld [vmem:[#allocation47_spill] sm:$0xff]  ;;  %v3892_v26 = vld [vmem:[%s6361_s9 + $0x4] ss:$8 sps:$4 sm:$0xff]  }
 0x2dd   :  { %v6679_v40 = vpack.c.bf16 %v6677_v54, %v6678_v19  ;;  %v3890_v24 = vld [vmem:[%s6361_s9] ss:$8 sps:$4 sm:$0xff]   ;;  %v3904_v3 = vld [vmem:[%s6363_s11 + $0x78] sm:$0xff]  }
 0x2de   :  { %2480 = vmatmul.mubr.bf16.vlgmr.msra.gmra.mxu0 %v2318_v33  ;;  %v6632_v33 = vld [vmem:[#allocation11_spill] sm:$0xff]  ;;  %v3908_v19 = vld [vmem:[%s6363_s11 + $0x68] sm:$0xff]  }
 0x2df   :  { %2415 = vmatpush1.bf16.msra.mxu1 %v6619_v61  ;;  %v6634_v20 = vpack.c.bf16 %v6632_v33, %v6633_v41  ;;  %v6681_v61 = vld [vmem:[#allocation45_spill] sm:$0xff]  ;;  %v3984_v41 = vmov 65535   ;;  %2760 = vmatpush1.bf16.msra.mxu0 %v3893_v30  ;;  %v3905_v17 = vld [vmem:[%s6363_s11 + $0x38] sm:$0xff]  }
 0x2e0   :  { %2416 = vmatprep.subr.bf16.mxu1 %v6622_v44  ;;  %v6682_v51 = vpack.c.bf16 %v6680_v8, %v6681_v61  ;;  %v6683_v44 = vld [vmem:[#allocation44_spill] sm:$0xff]  ;;  %v2802_v33 = vld [vmem:[%s6361_s9 + $0x10] sm:$0x77]  ;;  %2761 = vmatprep.subr.bf16.mxu0 %v6616_v22 }
 0x2e1   :  { %v6685_v27 = vpack.c.bf16 %v6683_v44, %v6684_v52  ;;  %v3552_v4 = vcombine.high %v2802_v33, %v2802_v33  ;;  %v3909_v8 = vld [vmem:[%s6363_s11 + $0x28] sm:$0xff]   ;;  %v3910_v61 = vld [vmem:[%s6363_s11 + $0x60] sm:$0xff]  }
 0x2e3   :  { %2417 = vmatpush1.bf16.msra.mxu1 %v6625_v5  ;;  %v3873_v5 = vld [vmem:[%s6358_s6 + $0x38] sm:$0xff]   ;;  %2762 = vmatpush1.bf16.msra.mxu0 %v3894_v38 }
 0x2e4   :  { %2418 = vmatprep.subr.bf16.mxu1 %v6628_v56  ;;  %v3875_v56 = vld [vmem:[%s6358_s6 + $0x30] sm:$0xff]   ;;  %2763 = vmatprep.subr.bf16.mxu0 %v6616_v22 }
 0x2e7   :  { %2419 = vmatpush1.bf16.msra.mxu1 %v6631_v36  ;;  %2764 = vmatpush1.bf16.msra.mxu0 %v3895_v50 }
 0x2e8   :  { %2420 = vmatprep.subr.bf16.mxu1 %v6634_v20  ;;  %v2836_v20 = vsel %vm2834_vm3, 4294967295, %v3984_v41  ;;  %2765 = vmatprep.subr.bf16.mxu0 %v6616_v22  ;;  %v3916_v41 = vld [vmem:[%s6363_s11 + $0x48] sm:$0xff]  }
 0x2e9   :  { %v2837_v43 = vsel %vm2835_vm4, %v2836_v20, 0  ;;  %v3917_v20 = vld [vmem:[%s6363_s11 + $0x8] sm:$0xff]  }
 0x2ea   :  { %v2842_v1 = vand.u32 %v3552_v4, %v2837_v43 }
 0x2eb   :  { %2421 = vmatpush1.bf16.msra.mxu1 %v6637_v10  ;;  %v3551_v10 = vcombine.low %v2802_v33, %v2802_v33  ;;  %2766 = vmatpush1.bf16.msra.mxu0 %v3896_v47  ;;  %v3914_v33 = vld [vmem:[%s6363_s11 + $0x50] sm:$0xff]  }
 0x2ec   :  { %2422 = vmatprep.subr.bf16.mxu1 %v6640_v29  ;;  %v3879_v29 = vld [vmem:[%s6358_s6 + $0x20] sm:$0xff]   ;;  %2767 = vmatprep.subr.bf16.mxu0 %v6616_v22 }
 0x2ed   :  { %v6118_v53 = vand.u32 %v3551_v10, %v2837_v43  ;;  %v3985_v10 = vmov 0.0   ;;  %v3922_v43 = vld [vmem:[%s6366_s14 + $0x38] sm:$0xff]  }
 0x2ef   :  { %2423 = vmatpush2.bf16.msra.mxu1 %v6643_v60  ;;  %v3882_v60 = vld [vmem:[%s6358_s6 + $0x50] sm:$0xff]  }
 0x2f0   :  { %2424 = vmatprep.subr.bf16.mxu1 %v6646_v21  ;;  %v3884_v21 = vld [vmem:[%s6358_s6 + $0x48] sm:$0xff]  }
 0x2f3   :  { %2425 = vmatpush2.bf16.msra.mxu1 %v6649_v49  ;;  %v3886_v49 = vld [vmem:[%s6358_s6 + $0x40] sm:$0xff]  }
 0x2f4   :  { %2426 = vmatprep.subr.bf16.mxu1 %v6652_v18  ;;  %v3887_v18 = vld [vmem:[%s6358_s6] sm:$0xff]  }
 0x2f7   :  { %2427 = vmatpush2.bf16.msra.mxu1 %v6655_v35  ;;  %v3897_v35 = vld [vmem:[%s6358_s6 + $0x98] sm:$0xff]  }
 0x2f8   :  { %2428 = vmatprep.subr.bf16.mxu1 %v6658_v31  ;;  %2768 = vmatpush1.bf16.msra.mxu0 %v3897_v35  ;;  %v3900_v31 = vld [vmem:[%s6358_s6 + $0x80] sm:$0xff]  }
 0x2f9   :  { %2769 = vmatprep.subr.bf16.mxu0 %v6616_v22 }
 0x2fb   :  { %2429 = vmatpush2.bf16.msra.mxu1 %v6661_v0  ;;  %v3903_v0 = vld [vmem:[%s6358_s6 + $0xc0] sm:$0xff]  }
 0x2fc   :  { %2430 = vmatprep.subr.bf16.mxu1 %v6664_v55  ;;  %2770 = vmatpush1.bf16.msra.mxu0 %v3898_v14 }
 0x2fd   :  { %2771 = vmatprep.subr.bf16.mxu0 %v6616_v22 }
 0x2ff   :  { %2431 = vmatpush2.bf16.msra.mxu1 %v6667_v59 }
 0x300   :  { %2432 = vmatprep.subr.bf16.mxu1 %v6670_v42  ;;  %2772 = vmatpush1.bf16.msra.mxu0 %v3899_v63 }
 0x301   :  { %2773 = vmatprep.subr.bf16.mxu0 %v6616_v22 }
 0x303   :  { %2433 = vmatpush2.bf16.msra.mxu1 %v6673_v16  ;;  %v2799_v16 = vld [vmem:[%s6360_s8] sm:$0x1]  ;;  %s3987_s8 = smov [#allocation2]  }
 0x304   :  { %2434 = vmatprep.subr.bf16.mxu1 %v6676_v57  ;;  %2774 = vmatpush1.bf16.msra.mxu0 %v3900_v31  ;;  %v3907_v57 = vld [vmem:[%s6363_s11 + $0x30] sm:$0xff]   ;;  %s3358_s4 = sshll.u32 %s3987_s8, 4  ;;  %s3359_s4 = int_to_ptr.vmem [resolvable:$true] %s3358_s4 }
 0x305   :  { %2785 = vmatprep.subr.bf16.mxu0 %v6616_v22  ;;  %p3943_p1 = scmp.lt.s32.totalorder %s3359_s4, %s3359_s4 }
 0x307   :  { %2435 = vmatpush2.bf16.msra.mxu1 %v6679_v40 }
 0x308   :  { %2436 = vmatprep.subr.bf16.mxu1 %v6682_v51  ;;  %2786 = vmatpush2.bf16.msra.mxu0 %v3901_v11 }
 0x309   :  { %2787 = vmatprep.subr.bf16.mxu0 %v6616_v22 }
 0x30b   :  { %2437 = vmatpush2.bf16.msra.mxu1 %v6685_v27 }
 0x30c   :  { %3630 = vmatprep.subr.bf16.mxu1 %v3872_v32  ;;  %2788 = vmatpush2.bf16.msra.mxu0 %v3902_v23  ;;  %v3911_v32 = vld [vmem:[%s6363_s11 + $0x20] sm:$0xff]  }
 0x30d   :  { %2789 = vmatprep.subr.bf16.mxu0 %v6616_v22 }
 0x30e   :  { %2439 = vmatmul.mubr.bf16.vlgmr.msra.gmra.mxu1 %v6578_v46  ;;  %v6099_v12 = vpop.f32.mrf.mxu1  ;;  %v3877_v46 = vld [vmem:[%s6358_s6 + $0x28] sm:$0xff]  }
 0x30f   :  { %3631 = vmatpush3.bf16.msra.mxu1 %v3873_v5 }
 0x310   :  { %3632 = vmatprep.subr.bf16.mxu1 %v3874_v2  ;;  %v6107_v37 = vpop.f32.mrf.mxu1  ;;  %2790 = vmatpush2.bf16.msra.mxu0 %v3903_v0 }
 0x311   :  { %3771 = vmatprep.subr.bf16.mxu0 %v3985_v10 }
 0x312   :  { %v2362_v36 = vpop.f32.mrf.mxu1 }
 0x313   :  { %3633 = vmatpush3.bf16.msra.mxu1 %v3875_v56  ;;  %v3913_v36 = vld [vmem:[%s6363_s11 + $0x18] sm:$0xff]  }
 0x314   :  { %3634 = vmatprep.subr.bf16.mxu1 %v3876_v34  ;;  %v2363_v48 = vpop.f32.mrf.mxu1 }
 0x315   :  { %v3919_v48 = vld [vmem:[%s6363_s11] sm:$0xff]  }
 0x317   :  { %3635 = vmatpush3.bf16.msra.mxu1 %v3877_v46  ;;  %v3915_v46 = vld [vmem:[%s6363_s11 + $0x10] sm:$0xff]  }
 0x318   :  { %3636 = vmatprep.subr.bf16.mxu1 %v3878_v45  ;;  %v3918_v45 = vld [vmem:[%s6363_s11 + $0x40] sm:$0xff]  }
 0x31b   :  { %3637 = vmatpush3.bf16.msra.mxu1 %v3879_v29  ;;  %v3924_v29 = vld [vmem:[%s6366_s14 + $0x28] sm:$0xff]  }
 0x31c   :  { %3638 = vmatprep.subr.bf16.mxu1 %v3880_v6  ;;  %v3925_v6 = vld [vmem:[%s6366_s14 + $0x20] sm:$0xff]  }
 0x31f   :  { %3639 = vmatpush3.bf16.msra.mxu1 %v3881_v15  ;;  %v3926_v15 = vld [vmem:[%s6366_s14 + $0x18] sm:$0xff]  }
 0x320   :  { %3640 = vmatprep.subr.bf16.mxu1 %v3882_v60  ;;  %v3927_v60 = vld [vmem:[%s6366_s14 + $0x10] sm:$0xff]  }
 0x323   :  { %3641 = vmatpush3.bf16.msra.mxu1 %v3883_v28  ;;  %v6686_v28 = vld [vmem:[#allocation31_spill] sm:$0xff] }
 0x324   :  { %3642 = vmatprep.subr.bf16.mxu1 %v3884_v21  ;;  %v2807_v21 = vsub.s32 0, %v6686_v28 }
 0x327   :  { %3643 = vmatpush3.bf16.msra.mxu1 %v3885_v58  ;;  %v2803_v58 = vld [vmem:[%s6362_s10] sm:$0x3] }
 0x328   :  { %3644 = vmatprep.subr.bf16.mxu1 %v3886_v49  ;;  %v2811_v49 = vsub.s32 1, %v6686_v28  ;;  %v2808_v50 = vrot.slane %v2803_v58, %v2807_v21 }
 0x32b   :  { %3645 = vmatpush3.bf16.msra.mxu1 %v3887_v18 }
 0x32c   :  { %2856 = vmatprep.subr.bf16.mxu1 %v2842_v1  ;;  %v2812_v1 = vrot.slane %v2803_v58, %v2811_v49 }
 0x38e   :  { %v2399_v62 = vpop.f32.mrf.mxu1 }
 0x38f   :  { %v2400_v39 = vadd.f32 %v2399_v62, %v6099_v12 }
 0x390   :  { %v2401_v55 = vpop.f32.mrf.mxu1 }
 0x391   :  { %v2402_v25 = vadd.f32 %v2401_v55, %v6107_v37  ;;  %v2488_v9 = vpack.c.bf16 %v2400_v39, %v2400_v39  ;;  %v3912_v37 = vld [vmem:[%s6363_s11 + $0x58] sm:$0xff]   ;;  %v3920_v39 = vld [vmem:[%s6365_s13 + $0x8] sm:$0xff]  }
 0x392   :  { %v2403_v13 = vpop.f32.mrf.mxu1 }
 0x393   :  { %v2489_v59 = vpack.c.bf16 %v2402_v25, %v2402_v25  ;;  %v3921_v25 = vld [vmem:[%s6365_s13] sm:$0xff]   ;;  %s3938_s13 = scalar_lea.vmem %s3359_s4, 32 }
 0x394   :  { %v2404_v42 = vpop.f32.mrf.mxu1  ;;  %p3939_p0 = scmp.ne.s32.totalorder %s3359_s4, %s3938_s13  ;;  %p3944_p2 = scmp.lt.s32.totalorder %s3938_s13, %s3938_s13 }
 0x395   :  { %2751 = vmatprep.mubr.bf16.mxu1 %v2489_v59  ;;  %v3520_v59 = vld [vmem:[%s6359_s7] ss:$0 sm:$0xff] }
 0x396   :  { %2752 = vmatmul.mubr.bf16.vlgmr.msra.gmra.mxu1 %v2488_v9  ;;  %p3945_p3 = por %p3944_p2, %p3943_p1 }
 0x397   :  { %2857 = vmatpush1.bf16.msra.mxu1 %v6118_v53  ;;  %2876 = vmatprep.mubr.bf16.mxu1 %v6616_v22  ;;  %v3906_v22 = vld [vmem:[%s6363_s11 + $0x70] sm:$0xff]  }
 0x398   :  { %2858 = vmatprep.subr.bf16.mxu1 %v3892_v26  ;;  %v3923_v53 = vld [vmem:[%s6366_s14 + $0x30] sm:$0xff]   ;;  %p3946_p4 = pnand %p3945_p3, %p3939_p0 }
 0x39b   :  { %2859 = vmatpush1.bf16.msra.mxu1 %v3890_v24 }
 0x39c   :  { %3652 = vmatprep.subr.bf16.mxu1 %v3904_v3 }
 0x39e   :  { %3553 = vmatmul.mubr.msk.bf16.vlgmr.msra.gmra.mxu1 %vm2830_vm5, %v2799_v16  ;;  %v2481_v7 = vpop.f32.mrf.mxu0 }
 0x39f   :  { %3653 = vmatpush3.bf16.msra.mxu1 %v3905_v17 }
 0x3a0   :  { %v2483_v54 = vpop.f32.mrf.mxu0  ;;  %3654 = vmatprep.subr.bf16.mxu1 %v3906_v22  ;;  %v3928_v22 = vld [vmem:[%s6366_s14 + $0x8] sm:$0xff]  }
 0x3a2   :  { %v2485_v40 = vpop.f32.mrf.mxu0 }
 0x3a3   :  { %3655 = vmatpush3.bf16.msra.mxu1 %v3907_v57  ;;  %v3930_v57 = vld [vmem:[%s6368_s16 + $0x38] sm:$0xff]   ;;  %v3933_v40 = vld [vmem:[%s6368_s16 + $0x20] sm:$0xff]  }
 0x3a4   :  { %3656 = vmatprep.subr.bf16.mxu1 %v3908_v19  ;;  %v2486_v51 = vpop.f32.mrf.mxu0  ;;  %v3932_v19 = vld [vmem:[%s6368_s16 + $0x28] sm:$0xff]  }
 0x3a7   :  { %3657 = vmatpush3.bf16.msra.mxu1 %v3909_v8  ;;  %v3934_v8 = vld [vmem:[%s6368_s16 + $0x18] sm:$0xff]  }
 0x3a8   :  { %3658 = vmatprep.subr.bf16.mxu1 %v3910_v61  ;;  %v3935_v61 = vld [vmem:[%s6368_s16 + $0x10] sm:$0xff]  }
 0x3ab   :  { %3659 = vmatpush3.bf16.msra.mxu1 %v3911_v32  ;;  %v3554_v32 = vld [vmem:[%s6364_s12] ss:$0 sm:$0xff] }
 0x3ac   :  { %3660 = vmatprep.subr.bf16.mxu1 %v3912_v37 }
 0x3af   :  { %3661 = vmatpush3.bf16.msra.mxu1 %v3913_v36 }
 0x3b0   :  { %3662 = vmatprep.subr.bf16.mxu1 %v3914_v33  ;;  %v3936_v33 = vld [vmem:[%s6368_s16 + $0x8] sm:$0xff]  }
 0x3b3   :  { %3663 = vmatpush3.bf16.msra.mxu1 %v3915_v46  ;;  %v3937_v46 = vld [vmem:[%s6368_s16] sm:$0xff]  }
 0x3b4   :  { %3664 = vmatprep.subr.bf16.mxu1 %v3916_v41 }
 0x3b7   :  { %3665 = vmatpush3.bf16.msra.mxu1 %v3917_v20  ;;  %v3582_v20 = vld [vmem:[%s6367_s15] ss:$0 sm:$0xff] }
 0x3b8   :  { %3666 = vmatprep.subr.bf16.mxu1 %v3918_v45 }
 0x3bb   :  { %3667 = vmatpush3.bf16.msra.mxu1 %v3919_v48 }
 0x3bc   :  { %3791 = vmatprep.subr.bf16.mxu1 %v3985_v10 }
 0x3ce   :  { %v2440_v44 = vpop.f32.mrf.mxu1 }
 0x3cf   :  { %v2482_v52 = vadd.f32 %v2481_v7, %v2440_v44  ;;  %v3929_v7 = vld [vmem:[%s6366_s14] sm:$0xff]  }
 0x3d0   :  { %v2442_v27 = vpop.f32.mrf.mxu1 }
 0x3d1   :  { %v2484_v5 = vadd.f32 %v2483_v54, %v2442_v27  ;;  %v2490_v2 = vpack.c.bf16 %v2482_v52, %v2482_v52  ;;  %v3931_v54 = vld [vmem:[%s6368_s16 + $0x30] sm:$0xff]  }
 0x3d2   :  { %v2444_v12 = vpop.f32.mrf.mxu1 }
 0x3d3   :  { %v2491_v56 = vpack.c.bf16 %v2484_v5, %v2484_v5 }
 0x3d4   :  { %v2445_v34 = vpop.f32.mrf.mxu1 }
 0x3d5   :  { %3548 = vmatprep.mubr.msk.bf16.mxu0 %vm2715_vm6, %v2491_v56 }
 0x3d6   :  { %2792 = vmatmul.mubr.bf16.vlgmr.msra.gmra.mxu0 %v2490_v2 }
 0x3d7   :  { %3787 = vmatprep.mubr.msk.bf16.mxu0 %vm3986_vm7, %v3985_v10  ;;  %3772 = vmatpush3.bf16.msra.mxu0 %v3922_v43 }
 0x3d8   :  { %3773 = vmatprep.subr.bf16.mxu0 %v3985_v10 }
 0x3db   :  { %3774 = vmatpush3.bf16.msra.mxu0 %v3923_v53 }
 0x3dc   :  { %3775 = vmatprep.subr.bf16.mxu0 %v3985_v10 }
 0x3df   :  { %3776 = vmatpush3.bf16.msra.mxu0 %v3924_v29 }
 0x3e0   :  { %3777 = vmatprep.subr.bf16.mxu0 %v3985_v10 }
 0x3e3   :  { %3778 = vmatpush3.bf16.msra.mxu0 %v3925_v6 }
 0x3e4   :  { %3779 = vmatprep.subr.bf16.mxu0 %v3985_v10 }
 0x3e7   :  { %3780 = vmatpush3.bf16.msra.mxu0 %v3926_v15 }
 0x3e8   :  { %3781 = vmatprep.subr.bf16.mxu0 %v3985_v10 }
 0x3eb   :  { %3782 = vmatpush3.bf16.msra.mxu0 %v3927_v60 }
 0x3ec   :  { %3783 = vmatprep.subr.bf16.mxu0 %v3985_v10 }
 0x3ef   :  { %3784 = vmatpush3.bf16.msra.mxu0 %v3928_v22 }
 0x3f0   :  { %3785 = vmatprep.subr.bf16.mxu0 %v3985_v10 }
 0x3f3   :  { %3786 = vmatpush3.bf16.msra.mxu0 %v3929_v7 }
 0x456   :  { %v3646_v30 = vpop.f32.mrf.mxu1 }
 0x458   :  { %v3647_v38 = vpop.f32.mrf.mxu1 }
 0x459   :  { %v3648_v13 = vadd.f32 %v3647_v38, %v3646_v30 }
 0x45a   :  { %v3649_v4 = vpop.f32.mrf.mxu1 }
 0x45b   :  { %v2754_v9 = vadd.f32 %v3648_v13, %v3520_v59 }
 0x45c   :  { %v3650_v18 = vpop.f32.mrf.mxu1 }
 0x45e   :  { %v2878_v47 = vpop.f32.mrf.mxu1 }
 0x45f   :  { %v2879_v35 = vadd.f32 %v2878_v47, %v2808_v50 }
 0x460   :  { %v2880_v14 = vpop.f32.mrf.mxu1 }
 0x461   :  { %v2881_v63 = vadd.f32 %v2880_v14, %v2812_v1  ;;  %v2885_v31 = vmax.f32 %v2879_v35, 0.0 }
 0x462   :  { %v2882_v11 = vpop.f32.mrf.mxu1 }
 0x463   :  { %v2886_v23 = vmax.f32 %v2881_v63, 0.0  ;;  %v2887_v55 = vpack.c.bf16 %v2885_v31, %v2885_v31 }
 0x464   :  { %v2883_v0 = vpop.f32.mrf.mxu1 }
 0x465   :  { %v2888_v62 = vpack.c.bf16 %v2886_v23, %v2886_v23 }
 0x467   :  { %3056 = vmatprep.mubr.bf16.mxu1 %v2888_v62 }
 0x468   :  { %3057 = vmatmul.mubr.bf16.vlgmr.msra.gmra.mxu1 %v2887_v55 }
 0x469   :  { %3792 = vmatpush3.bf16.msra.mxu1 %v3920_v39  ;;  %3795 = vmatprep.mubr.msk.bf16.mxu1 %vm3986_vm7, %v3985_v10 }
 0x46a   :  { %3793 = vmatprep.subr.bf16.mxu1 %v3985_v10 }
 0x46d   :  { %3794 = vmatpush3.bf16.msra.mxu1 %v3921_v25 }
 0x46e   :  { %3799 = vmatprep.subr.bf16.mxu1 %v3985_v10 }
 0x496   :  { %v2793_v26 = vpop.f32.mrf.mxu0 }
 0x497   :  { %v2794_v42 = vadd.f32 %v2793_v26, %v2754_v9 }
 0x498   :  { %v2795_v24 = vpop.f32.mrf.mxu0 }
 0x499   :  { %v3064_v3 = vpack.c.bf16 %v2794_v42, %v2794_v42 }
 0x49a   :  { %v2796_v16 = vpop.f32.mrf.mxu0 }
 0x49b   :  { %3796 = vmatmul.mubr.msk.bf16.vlgmr.msra.gmra.mxu1 %vm3186_vm8, %v3064_v3 }
 0x49c   :  { %v2797_v17 = vpop.f32.mrf.mxu0  ;;  %3815 = vmatprep.mubr.msk.bf16.mxu1 %vm3986_vm7, %v3985_v10  ;;  %3800 = vmatpush3.bf16.msra.mxu1 %v3930_v57 }
 0x49d   :  { %3801 = vmatprep.subr.bf16.mxu1 %v3985_v10 }
 0x4a0   :  { %3802 = vmatpush3.bf16.msra.mxu1 %v3931_v54 }
 0x4a1   :  { %3803 = vmatprep.subr.bf16.mxu1 %v3985_v10 }
 0x4a4   :  { %3804 = vmatpush3.bf16.msra.mxu1 %v3932_v19 }
 0x4a5   :  { %3805 = vmatprep.subr.bf16.mxu1 %v3985_v10 }
 0x4a8   :  { %3806 = vmatpush3.bf16.msra.mxu1 %v3933_v40 }
 0x4a9   :  { %3807 = vmatprep.subr.bf16.mxu1 %v3985_v10 }
 0x4ac   :  { %3808 = vmatpush3.bf16.msra.mxu1 %v3934_v8 }
 0x4ad   :  { %3809 = vmatprep.subr.bf16.mxu1 %v3985_v10 }
 0x4b0   :  { %3810 = vmatpush3.bf16.msra.mxu1 %v3935_v61 }
 0x4b1   :  { %3811 = vmatprep.subr.bf16.mxu1 %v3985_v10 }
 0x4b4   :  { %3812 = vmatpush3.bf16.msra.mxu1 %v3936_v33 }
 0x4b5   :  { %3813 = vmatprep.subr.bf16.mxu1 %v3985_v10 }
 0x4b8   :  { %3814 = vmatpush3.bf16.msra.mxu1 %v3937_v46 }
 0x528   :  { %v3668_v51 = vpop.f32.mrf.mxu1 }
 0x52a   :  { %v3669_v44 = vpop.f32.mrf.mxu1 }
 0x52b   :  { %v3670_v52 = vadd.f32 %v3669_v44, %v3668_v51 }
 0x52c   :  { %v3671_v27 = vpop.f32.mrf.mxu1 }
 0x52d   :  { %v3059_v5 = vadd.f32 %v3670_v52, %v3554_v32 }
 0x52e   :  { %v3672_v2 = vpop.f32.mrf.mxu1 }
 0x52f   :  { %v3069_v12 = vpack.c.bf16 %v3059_v5, %v3059_v5 }
 0x531   :  { %3788 = vmatmul.mubr.bf16.vlgmr.msra.gmra.mxu0 %v3069_v12 }
 0x55b   :  { %v3224_v56 = vpop.f32.mrf.mxu1 }
 0x55d   :  { %v3797_v34 = vpop.f32.mrf.mxu1 }
 0x55f   :  { %v3227_v37 = vpop.f32.mrf.mxu1 }
 0x561   :  { %v3798_v36 = vpop.f32.mrf.mxu1 }
 0x5f1   :  { %v3168_v41 = vpop.f32.mrf.mxu0 }
 0x5f2   :  { %v3225_v45 = vadd.f32 %v3224_v56, %v3168_v41 }
 0x5f3   :  { %v3789_v48 = vpop.f32.mrf.mxu0 }
 0x5f4   :  { %v3237_v43 = vadd.f32 %v3582_v20, %v3225_v45 }
 0x5f5   :  { %v3171_v53 = vpop.f32.mrf.mxu0 }
 0x5f6   :  { %v3239_v29 = vpack.c.bf16 %v3237_v43, %v3237_v43  ;;  %3238 = vst [vmem:[#allocation2] sm:$0x3] %v3237_v43 }
 0x5f7   :  { %v3790_v6 = vpop.f32.mrf.mxu0 }
 0x5f8   :  { %3816 = vmatmul.mubr.bf16.vlgmr.msra.gmra.mxu1 %v3239_v29 }
 0x5f9   :  { %3949 = shalt.err (!%p3946_p4)
}
 0x5fa   :  { %3361 = dma.vmem_to_hbm [thread:$0]  %s3359_s4, 32, %s6370_s18, [#allocation3]   ;;  %v3583_v10 = vld [vmem:[%s6369_s17] ss:$0 sm:$0xff] }
 0x5fb   :  { %s3988_s28 = smov [#allocation4]  }
 0x5fc   :  { %s3368_s29 = sshll.u32 %s3988_s28, 4  ;;  %s3369_s29 = int_to_ptr.vmem [resolvable:$true] %s3368_s29 }
 0x5fd   :  { %s3958_s0 = scalar_lea.vmem %s3369_s29, 32  ;;  %p3963_p6 = scmp.lt.s32.totalorder %s3369_s29, %s3369_s29 }
 0x5fe   :  { %p3959_p5 = scmp.ne.s32.totalorder %s3369_s29, %s3958_s0  ;;  %p3964_p7 = scmp.lt.s32.totalorder %s3958_s0, %s3958_s0 }
 0x600   :  { %p3965_p8 = por %p3964_p7, %p3963_p6 }
 0x602   :  { %p3966_p9 = pnand %p3965_p8, %p3959_p5 }
 0x6b8   :  { %v3345_v15 = vpop.f32.mrf.mxu1 }
 0x6b9   :  { %v3346_v60 = vadd.f32 %v3583_v10, %v3345_v15 }
 0x6ba   :  { %v3817_v30 = vpop.f32.mrf.mxu1 }
 0x6bb   :  { %3351 = vst [vmem:[#allocation4] sm:$0x3] %v3346_v60 }
 0x6bc   :  { %v3348_v28 = vpop.f32.mrf.mxu1 }
 0x6bd   :  { %3969 = shalt.err (!%p3966_p9)
}
 0x6be   :  { %3371 = dma.vmem_to_hbm [thread:$0]  %s3369_s29, 32, %s6371_s19, [#allocation5]   ;;  %v3818_v21 = vpop.f32.mrf.mxu1 }
 0x6bf   :  { %3978 = dma.done.wait [#allocation3], 32  }
 0x6c0   :  { %3979 = vsyncadd [#allocation3], 4294967264 }
 0x6c1   :  { %3980 = dma.done.wait [#allocation5], 32  }
 0x6c2   :  { %3981 = vsyncadd [#allocation5], 4294967264 }
 0x6c3   :  { %3378 = vsyncpa [#allocation3], 1 }
 0x6c4   :  { %3379 = vsyncpa [#allocation5], 1 }

</bundles_post_ra>
